<compile_context>
chip_gen: v7x
topology: tpu7x:2x2x1
jax: 0.10.0
libtpu: 0.0.40
codegen_flags: <defaults>
</compile_context>

<pallas_src>
import numpy as np
import jax
import jax.numpy as jnp
from jax.experimental import pallas as pl
from jax.experimental.pallas import tpu as pltpu

POOL_OUT = 4      # see TODO above (module says 5, but fc1 expects 2048 = 128*4*4)


def _nsplit(nhid):
    """Hidden-dim 'parallel' split: 2 only where the parallel grid axis maps to 2
    TensorCores (v7x / megacore); on 1-TC chips (v5e/v6e) it would just double the grid
    steps and duplicate the k==0 pool/conv work.  Detection errors are perf-only."""
    if nhid % 2:
        return 1
    try:
        kind = jax.devices()[0].device_kind.lower()
    except Exception:
        return 1
    return 2 if (("v7" in kind) or ("v4" in kind) or ("v5p" in kind)) else 1


def adaptive_pool_matrix(H, W, P):
    """(H*W, P*P) matrix implementing AdaptiveAvgPool2d(P) exactly (PyTorch floor/ceil bins)."""
    M = np.zeros((H * W, P * P), dtype=np.float32)
    for p in range(P):
        hs, he = (p * H) // P, -(-((p + 1) * H) // P)
        for q in range(P):
            ws, we = (q * W) // P, -(-((q + 1) * W) // P)
            inv = 1.0 / float((he - hs) * (we - ws))
            for h in range(hs, he):
                for w in range(ws, we):
                    M[h * W + w, p * P + q] = inv
    return M


def prepare_params(params, H, W):
    """One-time parameter massaging: every transpose / permutation / padding / bf16 cast
    lives here, NOT in the per-call forward path."""
    P = POOL_OUT
    S = P * P
    C = params["wc"].shape[1]
    NHID = params["w1"].shape[0]
    NC = params["w2"].shape[0]
    NCP = ((NC + 127) // 128) * 128          # pad num_classes to a lane-dense multiple of 128
    assert params["w1"].shape[1] == 128 * S
    # fc1 weight (NHID, 2048) with PyTorch NCHW-flatten columns (idx = c*S + s)
    #   -> w1q[s*128 + c, j] = w1[j, c*S + s]   (rows match the kernel's y_sc layout)
    w1q = jnp.transpose(params["w1"].reshape(NHID, 128, S), (2, 1, 0)).reshape(S * 128, NHID)
    w2p = jnp.zeros((NHID, NCP), jnp.float32).at[:, :NC].set(params["w2"].T)
    return {
        "pmat": jnp.asarray(adaptive_pool_matrix(H, W, P)),     # (H*W, S) f32
        "wct": params["wc"].reshape(128, C).T,                  # (C, 128) f32
        "bc": params["bc"].reshape(1, 128),                     # (1, 128) f32
        "w1q": w1q.astype(jnp.bfloat16),                        # (S*128, NHID) bf16 stream
        "b1": params["b1"].reshape(1, NHID),                    # (1, NHID) f32
        "w2p": w2p.astype(jnp.bfloat16),                        # (NHID, NCP) bf16
        "b2": params["b2"],                                     # (NC,) f32
    }


def aux_classifier_forward(x_nchw, prep):
    B, C, H, W = x_nchw.shape
    HW = H * W
    S = prep["pmat"].shape[1]                # P*P
    NHID = prep["w1q"].shape[1]              # 1024
    NCP = prep["w2p"].shape[1]               # padded num_classes (multiple of 128)
    NC = prep["b2"].shape[0]
    NSPLIT = _nsplit(NHID)                   # 1 on v5e/v6e, 2 on 2-TC parts
    NH = NHID // NSPLIT                      # hidden columns per parallel slice
    SK = 2 if S % 2 == 0 else 1              # fc1 K-chunks (keep 2: amortizes step overhead
    SG = S // SK                             #   without inflating the per-step DMA)
    TK = SG * 128                            # fc1 contraction per chunk
    assert prep["w1q"].shape[0] == S * 128

    def kernel(x_ref, pmat_ref, wct_ref, bc_ref, w1_ref, b1_ref, w2_ref,
               out_ref, y_sc, h_acc):
        k = pl.program_id(1)

        @pl.when(k == 0)
        def _():
            # Adaptive avg-pool as ONE matmul on the lane-dense (B*C, HW) input.
            pooled = jnp.dot(x_ref[...], pmat_ref[...],
                             preferred_element_type=jnp.float32)          # (B*C, S)
            pooledT = pooled.T                                            # (S, B*C) tiny
            for b in range(B):
                # 1x1 conv as a small MXU matmul over the C input channels (+bias, ReLU).
                conv_b = jnp.dot(pooledT[:, b * C:(b + 1) * C], wct_ref[...],
                                 preferred_element_type=jnp.float32)      # (S, 128)
                yb = jnp.maximum(conv_b + bc_ref[...], 0.0)
                # Scatter rows into the flattened fc1-input layout:
                #   y_sc[kk, b, i*128 + c] with kk*SG + i == s  (row order matches w1q).
                for s in range(S):
                    off = (s % SG) * 128
                    y_sc[s // SG, b:b + 1, off:off + 128] = yb[s:s + 1, :]
            h_acc[...] = jnp.zeros_like(h_acc)

        # fc1: ONE K=TK bf16 MXU matmul for this chunk, accumulated in f32, while the next
        # bf16 w1 chunk streams in (double-buffered by the BlockSpec pipeline).
        lhs = y_sc[k].astype(jnp.bfloat16)                                # (B, TK)
        h_acc[...] += jnp.dot(lhs, w1_ref[...],
                              preferred_element_type=jnp.float32)         # (B, NH)

        @pl.when(k == pl.num_programs(1) - 1)
        def _():
            h = jnp.maximum(h_acc[...] + b1_ref[...], 0.0).astype(jnp.bfloat16)
            out_ref[0] = jnp.dot(h, w2_ref[...],
                                 preferred_element_type=jnp.float32)      # fc2 (padded N)

    # glue: NCHW -> (B*C, HW).  Contiguous reshape; last dim HW=256 is lane-dense.
    x2d = x_nchw.reshape(B * C, HW)

    flops = (2 * B * C * HW * S + 2 * B * S * C * 128
             + 2 * B * (S * 128) * NHID + 2 * B * NHID * NCP)
    bytes_accessed = (2 * prep["w1q"].size + 2 * prep["w2p"].size          # bf16 streams
                      + 4 * (B * C * HW + HW * S + C * 128 + 128 + NHID + NSPLIT * B * NCP))

    partials = pl.pallas_call(
        kernel,
        out_shape=jax.ShapeDtypeStruct((NSPLIT, B, NCP), jnp.float32),
        grid=(NSPLIT, SK),
        in_specs=[
            pl.BlockSpec((B * C, HW), lambda j, k: (0, 0)),          # x (lane-dense, loaded once)
            pl.BlockSpec((HW, S), lambda j, k: (0, 0)),              # pooling matrix
            pl.BlockSpec((C, 128), lambda j, k: (0, 0)),             # conv weight (C,128)
            pl.BlockSpec((1, 128), lambda j, k: (0, 0)),             # conv bias
            pl.BlockSpec((TK, NH), lambda j, k: (k, j)),             # fc1 weight chunk (bf16, streamed)
            pl.BlockSpec((1, NH), lambda j, k: (0, j)),              # fc1 bias slice
            pl.BlockSpec((NH, NCP), lambda j, k: (j, 0)),            # fc2 weight slice (bf16, padded)
        ],
        out_specs=pl.BlockSpec((1, B, NCP), lambda j, k: (j, 0, 0)),
        scratch_shapes=[pltpu.VMEM((SK, B, TK), jnp.float32),        # ReLU(conv) in fc1-input layout
                        pltpu.VMEM((B, NH), jnp.float32)],           # fc1 accumulator
        compiler_params=pltpu.CompilerParams(
            dimension_semantics=("parallel", "arbitrary")),
        cost_estimate=pl.CostEstimate(flops=flops, transcendentals=0,
                                      bytes_accessed=bytes_accessed),
    )(x2d, prep["pmat"], prep["wct"], prep["bc"],
      prep["w1q"], prep["b1"], prep["w2p"])

    # Combine hidden-dim slices (trivial when NSPLIT=1), drop class padding, add fc2 bias.
    return partials.sum(axis=0)[:, :NC] + prep["b2"]


def ref_forward(x, params, stream_dtype=None):
    """Pure-JAX reference of the module (eval mode, NCHW flatten order).
    With stream_dtype=bf16 it mirrors the kernel's weight/activation streaming numerics
    (bf16 MXU operands, f32 accumulation).  The reshape-mean pool is exact iff H%P==W%P==0."""
    B, C, H, W = x.shape
    P = POOL_OUT
    pooled = x.reshape(B, C, P, H // P, P, W // P).mean(axis=(3, 5))          # (B, C, P, P)
    y = jnp.einsum("oc,bcpq->bopq", params["wc"].reshape(128, C), pooled,
                   precision=jax.lax.Precision.HIGHEST)
    y = jnp.maximum(y + params["bc"][None, :, None, None], 0.0)
    flat = y.reshape(B, -1)                                                   # NCHW flatten
    w1, w2 = params["w1"], params["w2"]
    if stream_dtype is not None:
        flat, w1, w2 = flat.astype(stream_dtype), w1.astype(stream_dtype), w2.astype(stream_dtype)
    h = jnp.dot(flat, w1.T, preferred_element_type=jnp.float32,
                precision=jax.lax.Precision.HIGHEST) + params["b1"]
    h = jnp.maximum(h, 0.0)
    if stream_dtype is not None:
        h = h.astype(stream_dtype)
    return jnp.dot(h, w2.T, preferred_element_type=jnp.float32,
                   precision=jax.lax.Precision.HIGHEST) + params["b2"]


if __name__ == "__main__":
    key = jax.random.PRNGKey(0)
    B, C, H, W = 2, 4, 16, 16
    NUM_CLASSES = 10
    ks = jax.random.split(key, 7)

    x = jax.random.normal(ks[0], (B, C, H, W), jnp.float32)
    params = {
        "wc": jax.random.normal(ks[1], (128, C, 1, 1), jnp.float32) * 0.1,   # Conv2d(C,128,1)
        "bc": jax.random.normal(ks[2], (128,), jnp.float32) * 0.1,
        "w1": jax.random.normal(ks[3], (1024, 2048), jnp.float32) * 0.02,    # Linear(2048,1024)
        "b1": jax.random.normal(ks[4], (1024,), jnp.float32) * 0.02,
        "w2": jax.random.normal(ks[5], (NUM_CLASSES, 1024), jnp.float32) * 0.02,  # Linear(1024,NC)
        "b2": jax.random.normal(ks[6], (NUM_CLASSES,), jnp.float32) * 0.02,
    }

    prep = prepare_params(params, H, W)               # one-time weight rearrangement + bf16 cast
    fwd = jax.jit(aux_classifier_forward)

    out = jax.block_until_ready(fwd(x, prep))
    assert out.shape == (B, NUM_CLASSES), out.shape

    # Tight check against a reference with identical bf16 streaming numerics.
    ref_q = jax.block_until_ready(ref_forward(x, params, stream_dtype=jnp.bfloat16))
    np.testing.assert_allclose(np.asarray(out), np.asarray(ref_q), rtol=1e-3, atol=1e-3)

    # Semantic check against the pure-f32 module (loosened only for bf16 weight/activation
    # streaming of the fc layers).
    ref = jax.block_until_ready(ref_forward(x, params))
    np.testing.assert_allclose(np.asarray(out), np.asarray(ref), rtol=2e-2, atol=2e-2)

    print("KERNEL_OK")
</pallas_src>

<mosaic_0001>
module attributes {stable_mosaic.version = 11 : i64} {
  func.func @kernel(%arg0: i32, %arg1: i32, %arg2: memref<8x256xf32, #tpu.memory_space<vmem>>, %arg3: memref<256x16xf32, #tpu.memory_space<vmem>>, %arg4: memref<4x128xf32, #tpu.memory_space<vmem>>, %arg5: memref<1x128xf32, #tpu.memory_space<vmem>>, %arg6: memref<1024x1024xbf16, #tpu.memory_space<vmem>>, %arg7: memref<1x1024xf32, #tpu.memory_space<vmem>>, %arg8: memref<1024x128xbf16, #tpu.memory_space<vmem>>, %arg9: memref<1x2x128xf32, #tpu.memory_space<vmem>>, %arg10: memref<2x2x1024xf32, #tpu.memory_space<vmem>>, %arg11: memref<2x1024xf32, #tpu.memory_space<vmem>>) attributes {dimension_semantics = [#tpu.dimension_semantics<parallel>, #tpu.dimension_semantics<arbitrary>], iteration_bounds = array<i64: 1, 2>, scalar_prefetch = 0 : i64, scratch_operands = 2 : i64, tpu.core_type = #tpu.core_type<tc>, window_params = [{pipeline_mode = #tpu.pipeline_mode<synchronous>, transform_indices = @transform_0, window_bounds = array<i64: 8, 256>}, {pipeline_mode = #tpu.pipeline_mode<synchronous>, transform_indices = @transform_1, window_bounds = array<i64: 256, 16>}, {pipeline_mode = #tpu.pipeline_mode<synchronous>, transform_indices = @transform_2, window_bounds = array<i64: 4, 128>}, {pipeline_mode = #tpu.pipeline_mode<synchronous>, transform_indices = @transform_3, window_bounds = array<i64: 1, 128>}, {transform_indices = @transform_4, window_bounds = array<i64: 1024, 1024>}, {transform_indices = @transform_5, window_bounds = array<i64: 1, 1024>}, {transform_indices = @transform_6, window_bounds = array<i64: 1024, 128>}, {transform_indices = @transform_7, window_bounds = array<i64: 1, 2, 128>}]} {
    %c0_i32 = arith.constant 0 : i32
    %0 = arith.cmpi eq, %arg1, %c0_i32 : i32
    %1 = arith.extui %0 : i1 to i32
    %c0_i32_0 = arith.constant 0 : i32
    %2 = arith.cmpi ne, %1, %c0_i32_0 : i32
    scf.if %2 {
      %c0_9 = arith.constant 0 : index
      %c0_10 = arith.constant 0 : index
      %15 = vector.load %arg2[%c0_9, %c0_10] : memref<8x256xf32, #tpu.memory_space<vmem>>, vector<8x256xf32>
      %c0_11 = arith.constant 0 : index
      %c0_12 = arith.constant 0 : index
      %16 = vector.load %arg3[%c0_11, %c0_12] : memref<256x16xf32, #tpu.memory_space<vmem>>, vector<256x16xf32>
      %cst_13 = arith.constant dense<0.000000e+00> : vector<8x16xf32>
      %17 = tpu.matmul %15, %16, %cst_13 {dimension_numbers = #tpu.dot_dimension_numbers<[1], [0], [0], [1], [0, 0, 1, 1], [], []>} : vector<8x256xf32>, vector<256x16xf32>, vector<8x16xf32> -> vector<8x16xf32>
      %18 = tpu.transpose %17, [1, 0] : vector<8x16xf32> -> vector<16x8xf32>
      %19 = vector.extract_strided_slice %18 {offsets = [0, 0], sizes = [16, 4], strides = [1, 1]} : vector<16x8xf32> to vector<16x4xf32>
      %c0_14 = arith.constant 0 : index
      %c0_15 = arith.constant 0 : index
      %20 = vector.load %arg4[%c0_14, %c0_15] : memref<4x128xf32, #tpu.memory_space<vmem>>, vector<4x128xf32>
      %cst_16 = arith.constant dense<0.000000e+00> : vector<16x128xf32>
      %21 = tpu.matmul %19, %20, %cst_16 {dimension_numbers = #tpu.dot_dimension_numbers<[1], [0], [0], [1], [0, 0, 1, 1], [], []>} : vector<16x4xf32>, vector<4x128xf32>, vector<16x128xf32> -> vector<16x128xf32>
      %c0_17 = arith.constant 0 : index
      %c0_18 = arith.constant 0 : index
      %22 = vector.load %arg5[%c0_17, %c0_18] : memref<1x128xf32, #tpu.memory_space<vmem>>, vector<1x128xf32>
      %23 = vector.broadcast %22 : vector<1x128xf32> to vector<16x128xf32>
      %24 = arith.addf %21, %23 : vector<16x128xf32>
      %cst_19 = arith.constant 0.000000e+00 : f32
      %25 = vector.broadcast %cst_19 : f32 to vector<16x128xf32>
      %26 = arith.maximumf %24, %25 : vector<16x128xf32>
      %27 = vector.extract_strided_slice %26 {offsets = [0, 0], sizes = [1, 128], strides = [1, 1]} : vector<16x128xf32> to vector<1x128xf32>
      %c0_20 = arith.constant 0 : index
      %c0_21 = arith.constant 0 : index
      %c0_22 = arith.constant 0 : index
      %28 = vector.load %arg10[%c0_20, %c0_21, %c0_22] : memref<2x2x1024xf32, #tpu.memory_space<vmem>>, vector<1x1x128xf32>
      %29 = vector.shape_cast %28 : vector<1x1x128xf32> to vector<1x128xf32>
      %30 = vector.shape_cast %27 : vector<1x128xf32> to vector<1x1x128xf32>
      tpu.vector_store %arg10[%c0_20, %c0_21, %c0_22], %30 {strides = array<i32>} : memref<2x2x1024xf32, #tpu.memory_space<vmem>>, vector<1x1x128xf32>,
      %31 = vector.extract_strided_slice %26 {offsets = [1, 0], sizes = [1, 128], strides = [1, 1]} : vector<16x128xf32> to vector<1x128xf32>
      %c0_23 = arith.constant 0 : index
      %c0_24 = arith.constant 0 : index
      %c128 = arith.constant 128 : index
      %32 = vector.load %arg10[%c0_23, %c0_24, %c128] : memref<2x2x1024xf32, #tpu.memory_space<vmem>>, vector<1x1x128xf32>
      %33 = vector.shape_cast %32 : vector<1x1x128xf32> to vector<1x128xf32>
      %34 = vector.shape_cast %31 : vector<1x128xf32> to vector<1x1x128xf32>
      tpu.vector_store %arg10[%c0_23, %c0_24, %c128], %34 {strides = array<i32>} : memref<2x2x1024xf32, #tpu.memory_space<vmem>>, vector<1x1x128xf32>,
      %35 = vector.extract_strided_slice %26 {offsets = [2, 0], sizes = [1, 128], strides = [1, 1]} : vector<16x128xf32> to vector<1x128xf32>
      %c0_25 = arith.constant 0 : index
      %c0_26 = arith.constant 0 : index
      %c256 = arith.constant 256 : index
      %36 = vector.load %arg10[%c0_25, %c0_26, %c256] : memref<2x2x1024xf32, #tpu.memory_space<vmem>>, vector<1x1x128xf32>
      %37 = vector.shape_cast %36 : vector<1x1x128xf32> to vector<1x128xf32>
      %38 = vector.shape_cast %35 : vector<1x128xf32> to vector<1x1x128xf32>
      tpu.vector_store %arg10[%c0_25, %c0_26, %c256], %38 {strides = array<i32>} : memref<2x2x1024xf32, #tpu.memory_space<vmem>>, vector<1x1x128xf32>,
      %39 = vector.extract_strided_slice %26 {offsets = [3, 0], sizes = [1, 128], strides = [1, 1]} : vector<16x128xf32> to vector<1x128xf32>
      %c0_27 = arith.constant 0 : index
      %c0_28 = arith.constant 0 : index
      %c384 = arith.constant 384 : index
      %40 = vector.load %arg10[%c0_27, %c0_28, %c384] : memref<2x2x1024xf32, #tpu.memory_space<vmem>>, vector<1x1x128xf32>
      %41 = vector.shape_cast %40 : vector<1x1x128xf32> to vector<1x128xf32>
      %42 = vector.shape_cast %39 : vector<1x128xf32> to vector<1x1x128xf32>
      tpu.vector_store %arg10[%c0_27, %c0_28, %c384], %42 {strides = array<i32>} : memref<2x2x1024xf32, #tpu.memory_space<vmem>>, vector<1x1x128xf32>,
      %43 = vector.extract_strided_slice %26 {offsets = [4, 0], sizes = [1, 128], strides = [1, 1]} : vector<16x128xf32> to vector<1x128xf32>
      %c0_29 = arith.constant 0 : index
      %c0_30 = arith.constant 0 : index
      %c512 = arith.constant 512 : index
      %44 = vector.load %arg10[%c0_29, %c0_30, %c512] : memref<2x2x1024xf32, #tpu.memory_space<vmem>>, vector<1x1x128xf32>
      %45 = vector.shape_cast %44 : vector<1x1x128xf32> to vector<1x128xf32>
      %46 = vector.shape_cast %43 : vector<1x128xf32> to vector<1x1x128xf32>
      tpu.vector_store %arg10[%c0_29, %c0_30, %c512], %46 {strides = array<i32>} : memref<2x2x1024xf32, #tpu.memory_space<vmem>>, vector<1x1x128xf32>,
      %47 = vector.extract_strided_slice %26 {offsets = [5, 0], sizes = [1, 128], strides = [1, 1]} : vector<16x128xf32> to vector<1x128xf32>
      %c0_31 = arith.constant 0 : index
      %c0_32 = arith.constant 0 : index
      %c640 = arith.constant 640 : index
      %48 = vector.load %arg10[%c0_31, %c0_32, %c640] : memref<2x2x1024xf32, #tpu.memory_space<vmem>>, vector<1x1x128xf32>
      %49 = vector.shape_cast %48 : vector<1x1x128xf32> to vector<1x128xf32>
      %50 = vector.shape_cast %47 : vector<1x128xf32> to vector<1x1x128xf32>
      tpu.vector_store %arg10[%c0_31, %c0_32, %c640], %50 {strides = array<i32>} : memref<2x2x1024xf32, #tpu.memory_space<vmem>>, vector<1x1x128xf32>,
      %51 = vector.extract_strided_slice %26 {offsets = [6, 0], sizes = [1, 128], strides = [1, 1]} : vector<16x128xf32> to vector<1x128xf32>
      %c0_33 = arith.constant 0 : index
      %c0_34 = arith.constant 0 : index
      %c768 = arith.constant 768 : index
      %52 = vector.load %arg10[%c0_33, %c0_34, %c768] : memref<2x2x1024xf32, #tpu.memory_space<vmem>>, vector<1x1x128xf32>
      %53 = vector.shape_cast %52 : vector<1x1x128xf32> to vector<1x128xf32>
      %54 = vector.shape_cast %51 : vector<1x128xf32> to vector<1x1x128xf32>
      tpu.vector_store %arg10[%c0_33, %c0_34, %c768], %54 {strides = array<i32>} : memref<2x2x1024xf32, #tpu.memory_space<vmem>>, vector<1x1x128xf32>,
      %55 = vector.extract_strided_slice %26 {offsets = [7, 0], sizes = [1, 128], strides = [1, 1]} : vector<16x128xf32> to vector<1x128xf32>
      %c0_35 = arith.constant 0 : index
      %c0_36 = arith.constant 0 : index
      %c896 = arith.constant 896 : index
      %56 = vector.load %arg10[%c0_35, %c0_36, %c896] : memref<2x2x1024xf32, #tpu.memory_space<vmem>>, vector<1x1x128xf32>
      %57 = vector.shape_cast %56 : vector<1x1x128xf32> to vector<1x128xf32>
      %58 = vector.shape_cast %55 : vector<1x128xf32> to vector<1x1x128xf32>
      tpu.vector_store %arg10[%c0_35, %c0_36, %c896], %58 {strides = array<i32>} : memref<2x2x1024xf32, #tpu.memory_space<vmem>>, vector<1x1x128xf32>,
      %59 = vector.extract_strided_slice %26 {offsets = [8, 0], sizes = [1, 128], strides = [1, 1]} : vector<16x128xf32> to vector<1x128xf32>
      %c1 = arith.constant 1 : index
      %c0_37 = arith.constant 0 : index
      %c0_38 = arith.constant 0 : index
      %60 = vector.load %arg10[%c1, %c0_37, %c0_38] : memref<2x2x1024xf32, #tpu.memory_space<vmem>>, vector<1x1x128xf32>
      %61 = vector.shape_cast %60 : vector<1x1x128xf32> to vector<1x128xf32>
      %62 = vector.shape_cast %59 : vector<1x128xf32> to vector<1x1x128xf32>
      tpu.vector_store %arg10[%c1, %c0_37, %c0_38], %62 {strides = array<i32>} : memref<2x2x1024xf32, #tpu.memory_space<vmem>>, vector<1x1x128xf32>,
      %63 = vector.extract_strided_slice %26 {offsets = [9, 0], sizes = [1, 128], strides = [1, 1]} : vector<16x128xf32> to vector<1x128xf32>
      %c1_39 = arith.constant 1 : index
      %c0_40 = arith.constant 0 : index
      %c128_41 = arith.constant 128 : index
      %64 = vector.load %arg10[%c1_39, %c0_40, %c128_41] : memref<2x2x1024xf32, #tpu.memory_space<vmem>>, vector<1x1x128xf32>
      %65 = vector.shape_cast %64 : vector<1x1x128xf32> to vector<1x128xf32>
      %66 = vector.shape_cast %63 : vector<1x128xf32> to vector<1x1x128xf32>
      tpu.vector_store %arg10[%c1_39, %c0_40, %c128_41], %66 {strides = array<i32>} : memref<2x2x1024xf32, #tpu.memory_space<vmem>>, vector<1x1x128xf32>,
      %67 = vector.extract_strided_slice %26 {offsets = [10, 0], sizes = [1, 128], strides = [1, 1]} : vector<16x128xf32> to vector<1x128xf32>
      %c1_42 = arith.constant 1 : index
      %c0_43 = arith.constant 0 : index
      %c256_44 = arith.constant 256 : index
      %68 = vector.load %arg10[%c1_42, %c0_43, %c256_44] : memref<2x2x1024xf32, #tpu.memory_space<vmem>>, vector<1x1x128xf32>
      %69 = vector.shape_cast %68 : vector<1x1x128xf32> to vector<1x128xf32>
      %70 = vector.shape_cast %67 : vector<1x128xf32> to vector<1x1x128xf32>
      tpu.vector_store %arg10[%c1_42, %c0_43, %c256_44], %70 {strides = array<i32>} : memref<2x2x1024xf32, #tpu.memory_space<vmem>>, vector<1x1x128xf32>,
      %71 = vector.extract_strided_slice %26 {offsets = [11, 0], sizes = [1, 128], strides = [1, 1]} : vector<16x128xf32> to vector<1x128xf32>
      %c1_45 = arith.constant 1 : index
      %c0_46 = arith.constant 0 : index
      %c384_47 = arith.constant 384 : index
      %72 = vector.load %arg10[%c1_45, %c0_46, %c384_47] : memref<2x2x1024xf32, #tpu.memory_space<vmem>>, vector<1x1x128xf32>
      %73 = vector.shape_cast %72 : vector<1x1x128xf32> to vector<1x128xf32>
      %74 = vector.shape_cast %71 : vector<1x128xf32> to vector<1x1x128xf32>
      tpu.vector_store %arg10[%c1_45, %c0_46, %c384_47], %74 {strides = array<i32>} : memref<2x2x1024xf32, #tpu.memory_space<vmem>>, vector<1x1x128xf32>,
      %75 = vector.extract_strided_slice %26 {offsets = [12, 0], sizes = [1, 128], strides = [1, 1]} : vector<16x128xf32> to vector<1x128xf32>
      %c1_48 = arith.constant 1 : index
      %c0_49 = arith.constant 0 : index
      %c512_50 = arith.constant 512 : index
      %76 = vector.load %arg10[%c1_48, %c0_49, %c512_50] : memref<2x2x1024xf32, #tpu.memory_space<vmem>>, vector<1x1x128xf32>
      %77 = vector.shape_cast %76 : vector<1x1x128xf32> to vector<1x128xf32>
      %78 = vector.shape_cast %75 : vector<1x128xf32> to vector<1x1x128xf32>
      tpu.vector_store %arg10[%c1_48, %c0_49, %c512_50], %78 {strides = array<i32>} : memref<2x2x1024xf32, #tpu.memory_space<vmem>>, vector<1x1x128xf32>,
      %79 = vector.extract_strided_slice %26 {offsets = [13, 0], sizes = [1, 128], strides = [1, 1]} : vector<16x128xf32> to vector<1x128xf32>
      %c1_51 = arith.constant 1 : index
      %c0_52 = arith.constant 0 : index
      %c640_53 = arith.constant 640 : index
      %80 = vector.load %arg10[%c1_51, %c0_52, %c640_53] : memref<2x2x1024xf32, #tpu.memory_space<vmem>>, vector<1x1x128xf32>
      %81 = vector.shape_cast %80 : vector<1x1x128xf32> to vector<1x128xf32>
      %82 = vector.shape_cast %79 : vector<1x128xf32> to vector<1x1x128xf32>
      tpu.vector_store %arg10[%c1_51, %c0_52, %c640_53], %82 {strides = array<i32>} : memref<2x2x1024xf32, #tpu.memory_space<vmem>>, vector<1x1x128xf32>,
      %83 = vector.extract_strided_slice %26 {offsets = [14, 0], sizes = [1, 128], strides = [1, 1]} : vector<16x128xf32> to vector<1x128xf32>
      %c1_54 = arith.constant 1 : index
      %c0_55 = arith.constant 0 : index
      %c768_56 = arith.constant 768 : index
      %84 = vector.load %arg10[%c1_54, %c0_55, %c768_56] : memref<2x2x1024xf32, #tpu.memory_space<vmem>>, vector<1x1x128xf32>
      %85 = vector.shape_cast %84 : vector<1x1x128xf32> to vector<1x128xf32>
      %86 = vector.shape_cast %83 : vector<1x128xf32> to vector<1x1x128xf32>
      tpu.vector_store %arg10[%c1_54, %c0_55, %c768_56], %86 {strides = array<i32>} : memref<2x2x1024xf32, #tpu.memory_space<vmem>>, vector<1x1x128xf32>,
      %87 = vector.extract_strided_slice %26 {offsets = [15, 0], sizes = [1, 128], strides = [1, 1]} : vector<16x128xf32> to vector<1x128xf32>
      %c1_57 = arith.constant 1 : index
      %c0_58 = arith.constant 0 : index
      %c896_59 = arith.constant 896 : index
      %88 = vector.load %arg10[%c1_57, %c0_58, %c896_59] : memref<2x2x1024xf32, #tpu.memory_space<vmem>>, vector<1x1x128xf32>
      %89 = vector.shape_cast %88 : vector<1x1x128xf32> to vector<1x128xf32>
      %90 = vector.shape_cast %87 : vector<1x128xf32> to vector<1x1x128xf32>
      tpu.vector_store %arg10[%c1_57, %c0_58, %c896_59], %90 {strides = array<i32>} : memref<2x2x1024xf32, #tpu.memory_space<vmem>>, vector<1x1x128xf32>,
      %91 = vector.extract_strided_slice %18 {offsets = [0, 4], sizes = [16, 4], strides = [1, 1]} : vector<16x8xf32> to vector<16x4xf32>
      %c0_60 = arith.constant 0 : index
      %c0_61 = arith.constant 0 : index
      %92 = vector.load %arg4[%c0_60, %c0_61] : memref<4x128xf32, #tpu.memory_space<vmem>>, vector<4x128xf32>
      %cst_62 = arith.constant dense<0.000000e+00> : vector<16x128xf32>
      %93 = tpu.matmul %91, %92, %cst_62 {dimension_numbers = #tpu.dot_dimension_numbers<[1], [0], [0], [1], [0, 0, 1, 1], [], []>} : vector<16x4xf32>, vector<4x128xf32>, vector<16x128xf32> -> vector<16x128xf32>
      %c0_63 = arith.constant 0 : index
      %c0_64 = arith.constant 0 : index
      %94 = vector.load %arg5[%c0_63, %c0_64] : memref<1x128xf32, #tpu.memory_space<vmem>>, vector<1x128xf32>
      %95 = vector.broadcast %94 : vector<1x128xf32> to vector<16x128xf32>
      %96 = arith.addf %93, %95 : vector<16x128xf32>
      %cst_65 = arith.constant 0.000000e+00 : f32
      %97 = vector.broadcast %cst_65 : f32 to vector<16x128xf32>
      %98 = arith.maximumf %96, %97 : vector<16x128xf32>
      %99 = vector.extract_strided_slice %98 {offsets = [0, 0], sizes = [1, 128], strides = [1, 1]} : vector<16x128xf32> to vector<1x128xf32>
      %c0_66 = arith.constant 0 : index
      %c1_67 = arith.constant 1 : index
      %c0_68 = arith.constant 0 : index
      %100 = vector.load %arg10[%c0_66, %c1_67, %c0_68] : memref<2x2x1024xf32, #tpu.memory_space<vmem>>, vector<1x1x128xf32>
      %101 = vector.shape_cast %100 : vector<1x1x128xf32> to vector<1x128xf32>
      %102 = vector.shape_cast %99 : vector<1x128xf32> to vector<1x1x128xf32>
      tpu.vector_store %arg10[%c0_66, %c1_67, %c0_68], %102 {strides = array<i32>} : memref<2x2x1024xf32, #tpu.memory_space<vmem>>, vector<1x1x128xf32>,
      %103 = vector.extract_strided_slice %98 {offsets = [1, 0], sizes = [1, 128], strides = [1, 1]} : vector<16x128xf32> to vector<1x128xf32>
      %c0_69 = arith.constant 0 : index
      %c1_70 = arith.constant 1 : index
      %c128_71 = arith.constant 128 : index
      %104 = vector.load %arg10[%c0_69, %c1_70, %c128_71] : memref<2x2x1024xf32, #tpu.memory_space<vmem>>, vector<1x1x128xf32>
      %105 = vector.shape_cast %104 : vector<1x1x128xf32> to vector<1x128xf32>
      %106 = vector.shape_cast %103 : vector<1x128xf32> to vector<1x1x128xf32>
      tpu.vector_store %arg10[%c0_69, %c1_70, %c128_71], %106 {strides = array<i32>} : memref<2x2x1024xf32, #tpu.memory_space<vmem>>, vector<1x1x128xf32>,
      %107 = vector.extract_strided_slice %98 {offsets = [2, 0], sizes = [1, 128], strides = [1, 1]} : vector<16x128xf32> to vector<1x128xf32>
      %c0_72 = arith.constant 0 : index
      %c1_73 = arith.constant 1 : index
      %c256_74 = arith.constant 256 : index
      %108 = vector.load %arg10[%c0_72, %c1_73, %c256_74] : memref<2x2x1024xf32, #tpu.memory_space<vmem>>, vector<1x1x128xf32>
      %109 = vector.shape_cast %108 : vector<1x1x128xf32> to vector<1x128xf32>
      %110 = vector.shape_cast %107 : vector<1x128xf32> to vector<1x1x128xf32>
      tpu.vector_store %arg10[%c0_72, %c1_73, %c256_74], %110 {strides = array<i32>} : memref<2x2x1024xf32, #tpu.memory_space<vmem>>, vector<1x1x128xf32>,
      %111 = vector.extract_strided_slice %98 {offsets = [3, 0], sizes = [1, 128], strides = [1, 1]} : vector<16x128xf32> to vector<1x128xf32>
      %c0_75 = arith.constant 0 : index
      %c1_76 = arith.constant 1 : index
      %c384_77 = arith.constant 384 : index
      %112 = vector.load %arg10[%c0_75, %c1_76, %c384_77] : memref<2x2x1024xf32, #tpu.memory_space<vmem>>, vector<1x1x128xf32>
      %113 = vector.shape_cast %112 : vector<1x1x128xf32> to vector<1x128xf32>
      %114 = vector.shape_cast %111 : vector<1x128xf32> to vector<1x1x128xf32>
      tpu.vector_store %arg10[%c0_75, %c1_76, %c384_77], %114 {strides = array<i32>} : memref<2x2x1024xf32, #tpu.memory_space<vmem>>, vector<1x1x128xf32>,
      %115 = vector.extract_strided_slice %98 {offsets = [4, 0], sizes = [1, 128], strides = [1, 1]} : vector<16x128xf32> to vector<1x128xf32>
      %c0_78 = arith.constant 0 : index
      %c1_79 = arith.constant 1 : index
      %c512_80 = arith.constant 512 : index
      %116 = vector.load %arg10[%c0_78, %c1_79, %c512_80] : memref<2x2x1024xf32, #tpu.memory_space<vmem>>, vector<1x1x128xf32>
      %117 = vector.shape_cast %116 : vector<1x1x128xf32> to vector<1x128xf32>
      %118 = vector.shape_cast %115 : vector<1x128xf32> to vector<1x1x128xf32>
      tpu.vector_store %arg10[%c0_78, %c1_79, %c512_80], %118 {strides = array<i32>} : memref<2x2x1024xf32, #tpu.memory_space<vmem>>, vector<1x1x128xf32>,
      %119 = vector.extract_strided_slice %98 {offsets = [5, 0], sizes = [1, 128], strides = [1, 1]} : vector<16x128xf32> to vector<1x128xf32>
      %c0_81 = arith.constant 0 : index
      %c1_82 = arith.constant 1 : index
      %c640_83 = arith.constant 640 : index
      %120 = vector.load %arg10[%c0_81, %c1_82, %c640_83] : memref<2x2x1024xf32, #tpu.memory_space<vmem>>, vector<1x1x128xf32>
      %121 = vector.shape_cast %120 : vector<1x1x128xf32> to vector<1x128xf32>
      %122 = vector.shape_cast %119 : vector<1x128xf32> to vector<1x1x128xf32>
      tpu.vector_store %arg10[%c0_81, %c1_82, %c640_83], %122 {strides = array<i32>} : memref<2x2x1024xf32, #tpu.memory_space<vmem>>, vector<1x1x128xf32>,
      %123 = vector.extract_strided_slice %98 {offsets = [6, 0], sizes = [1, 128], strides = [1, 1]} : vector<16x128xf32> to vector<1x128xf32>
      %c0_84 = arith.constant 0 : index
      %c1_85 = arith.constant 1 : index
      %c768_86 = arith.constant 768 : index
      %124 = vector.load %arg10[%c0_84, %c1_85, %c768_86] : memref<2x2x1024xf32, #tpu.memory_space<vmem>>, vector<1x1x128xf32>
      %125 = vector.shape_cast %124 : vector<1x1x128xf32> to vector<1x128xf32>
      %126 = vector.shape_cast %123 : vector<1x128xf32> to vector<1x1x128xf32>
      tpu.vector_store %arg10[%c0_84, %c1_85, %c768_86], %126 {strides = array<i32>} : memref<2x2x1024xf32, #tpu.memory_space<vmem>>, vector<1x1x128xf32>,
      %127 = vector.extract_strided_slice %98 {offsets = [7, 0], sizes = [1, 128], strides = [1, 1]} : vector<16x128xf32> to vector<1x128xf32>
      %c0_87 = arith.constant 0 : index
      %c1_88 = arith.constant 1 : index
      %c896_89 = arith.constant 896 : index
      %128 = vector.load %arg10[%c0_87, %c1_88, %c896_89] : memref<2x2x1024xf32, #tpu.memory_space<vmem>>, vector<1x1x128xf32>
      %129 = vector.shape_cast %128 : vector<1x1x128xf32> to vector<1x128xf32>
      %130 = vector.shape_cast %127 : vector<1x128xf32> to vector<1x1x128xf32>
      tpu.vector_store %arg10[%c0_87, %c1_88, %c896_89], %130 {strides = array<i32>} : memref<2x2x1024xf32, #tpu.memory_space<vmem>>, vector<1x1x128xf32>,
      %131 = vector.extract_strided_slice %98 {offsets = [8, 0], sizes = [1, 128], strides = [1, 1]} : vector<16x128xf32> to vector<1x128xf32>
      %c1_90 = arith.constant 1 : index
      %c1_91 = arith.constant 1 : index
      %c0_92 = arith.constant 0 : index
      %132 = vector.load %arg10[%c1_90, %c1_91, %c0_92] : memref<2x2x1024xf32, #tpu.memory_space<vmem>>, vector<1x1x128xf32>
      %133 = vector.shape_cast %132 : vector<1x1x128xf32> to vector<1x128xf32>
      %134 = vector.shape_cast %131 : vector<1x128xf32> to vector<1x1x128xf32>
      tpu.vector_store %arg10[%c1_90, %c1_91, %c0_92], %134 {strides = array<i32>} : memref<2x2x1024xf32, #tpu.memory_space<vmem>>, vector<1x1x128xf32>,
      %135 = vector.extract_strided_slice %98 {offsets = [9, 0], sizes = [1, 128], strides = [1, 1]} : vector<16x128xf32> to vector<1x128xf32>
      %c1_93 = arith.constant 1 : index
      %c1_94 = arith.constant 1 : index
      %c128_95 = arith.constant 128 : index
      %136 = vector.load %arg10[%c1_93, %c1_94, %c128_95] : memref<2x2x1024xf32, #tpu.memory_space<vmem>>, vector<1x1x128xf32>
      %137 = vector.shape_cast %136 : vector<1x1x128xf32> to vector<1x128xf32>
      %138 = vector.shape_cast %135 : vector<1x128xf32> to vector<1x1x128xf32>
      tpu.vector_store %arg10[%c1_93, %c1_94, %c128_95], %138 {strides = array<i32>} : memref<2x2x1024xf32, #tpu.memory_space<vmem>>, vector<1x1x128xf32>,
      %139 = vector.extract_strided_slice %98 {offsets = [10, 0], sizes = [1, 128], strides = [1, 1]} : vector<16x128xf32> to vector<1x128xf32>
      %c1_96 = arith.constant 1 : index
      %c1_97 = arith.constant 1 : index
      %c256_98 = arith.constant 256 : index
      %140 = vector.load %arg10[%c1_96, %c1_97, %c256_98] : memref<2x2x1024xf32, #tpu.memory_space<vmem>>, vector<1x1x128xf32>
      %141 = vector.shape_cast %140 : vector<1x1x128xf32> to vector<1x128xf32>
      %142 = vector.shape_cast %139 : vector<1x128xf32> to vector<1x1x128xf32>
      tpu.vector_store %arg10[%c1_96, %c1_97, %c256_98], %142 {strides = array<i32>} : memref<2x2x1024xf32, #tpu.memory_space<vmem>>, vector<1x1x128xf32>,
      %143 = vector.extract_strided_slice %98 {offsets = [11, 0], sizes = [1, 128], strides = [1, 1]} : vector<16x128xf32> to vector<1x128xf32>
      %c1_99 = arith.constant 1 : index
      %c1_100 = arith.constant 1 : index
      %c384_101 = arith.constant 384 : index
      %144 = vector.load %arg10[%c1_99, %c1_100, %c384_101] : memref<2x2x1024xf32, #tpu.memory_space<vmem>>, vector<1x1x128xf32>
      %145 = vector.shape_cast %144 : vector<1x1x128xf32> to vector<1x128xf32>
      %146 = vector.shape_cast %143 : vector<1x128xf32> to vector<1x1x128xf32>
      tpu.vector_store %arg10[%c1_99, %c1_100, %c384_101], %146 {strides = array<i32>} : memref<2x2x1024xf32, #tpu.memory_space<vmem>>, vector<1x1x128xf32>,
      %147 = vector.extract_strided_slice %98 {offsets = [12, 0], sizes = [1, 128], strides = [1, 1]} : vector<16x128xf32> to vector<1x128xf32>
      %c1_102 = arith.constant 1 : index
      %c1_103 = arith.constant 1 : index
      %c512_104 = arith.constant 512 : index
      %148 = vector.load %arg10[%c1_102, %c1_103, %c512_104] : memref<2x2x1024xf32, #tpu.memory_space<vmem>>, vector<1x1x128xf32>
      %149 = vector.shape_cast %148 : vector<1x1x128xf32> to vector<1x128xf32>
      %150 = vector.shape_cast %147 : vector<1x128xf32> to vector<1x1x128xf32>
      tpu.vector_store %arg10[%c1_102, %c1_103, %c512_104], %150 {strides = array<i32>} : memref<2x2x1024xf32, #tpu.memory_space<vmem>>, vector<1x1x128xf32>,
      %151 = vector.extract_strided_slice %98 {offsets = [13, 0], sizes = [1, 128], strides = [1, 1]} : vector<16x128xf32> to vector<1x128xf32>
      %c1_105 = arith.constant 1 : index
      %c1_106 = arith.constant 1 : index
      %c640_107 = arith.constant 640 : index
      %152 = vector.load %arg10[%c1_105, %c1_106, %c640_107] : memref<2x2x1024xf32, #tpu.memory_space<vmem>>, vector<1x1x128xf32>
      %153 = vector.shape_cast %152 : vector<1x1x128xf32> to vector<1x128xf32>
      %154 = vector.shape_cast %151 : vector<1x128xf32> to vector<1x1x128xf32>
      tpu.vector_store %arg10[%c1_105, %c1_106, %c640_107], %154 {strides = array<i32>} : memref<2x2x1024xf32, #tpu.memory_space<vmem>>, vector<1x1x128xf32>,
      %155 = vector.extract_strided_slice %98 {offsets = [14, 0], sizes = [1, 128], strides = [1, 1]} : vector<16x128xf32> to vector<1x128xf32>
      %c1_108 = arith.constant 1 : index
      %c1_109 = arith.constant 1 : index
      %c768_110 = arith.constant 768 : index
      %156 = vector.load %arg10[%c1_108, %c1_109, %c768_110] : memref<2x2x1024xf32, #tpu.memory_space<vmem>>, vector<1x1x128xf32>
      %157 = vector.shape_cast %156 : vector<1x1x128xf32> to vector<1x128xf32>
      %158 = vector.shape_cast %155 : vector<1x128xf32> to vector<1x1x128xf32>
      tpu.vector_store %arg10[%c1_108, %c1_109, %c768_110], %158 {strides = array<i32>} : memref<2x2x1024xf32, #tpu.memory_space<vmem>>, vector<1x1x128xf32>,
      %159 = vector.extract_strided_slice %98 {offsets = [15, 0], sizes = [1, 128], strides = [1, 1]} : vector<16x128xf32> to vector<1x128xf32>
      %c1_111 = arith.constant 1 : index
      %c1_112 = arith.constant 1 : index
      %c896_113 = arith.constant 896 : index
      %160 = vector.load %arg10[%c1_111, %c1_112, %c896_113] : memref<2x2x1024xf32, #tpu.memory_space<vmem>>, vector<1x1x128xf32>
      %161 = vector.shape_cast %160 : vector<1x1x128xf32> to vector<1x128xf32>
      %162 = vector.shape_cast %159 : vector<1x128xf32> to vector<1x1x128xf32>
      tpu.vector_store %arg10[%c1_111, %c1_112, %c896_113], %162 {strides = array<i32>} : memref<2x2x1024xf32, #tpu.memory_space<vmem>>, vector<1x1x128xf32>,
      %cst_114 = arith.constant 0.000000e+00 : f32
      %163 = vector.broadcast %cst_114 : f32 to vector<2x1024xf32>
      %c0_115 = arith.constant 0 : index
      %c0_116 = arith.constant 0 : index
      %164 = vector.load %arg11[%c0_115, %c0_116] : memref<2x1024xf32, #tpu.memory_space<vmem>>, vector<2x1024xf32>
      tpu.vector_store %arg11[%c0_115, %c0_116], %163 {strides = array<i32>} : memref<2x1024xf32, #tpu.memory_space<vmem>>, vector<2x1024xf32>,
    } else {
    }
    %3 = arith.index_cast %arg1 : i32 to index
    %c0 = arith.constant 0 : index
    %c0_1 = arith.constant 0 : index
    %4 = vector.load %arg10[%3, %c0, %c0_1] : memref<2x2x1024xf32, #tpu.memory_space<vmem>>, vector<1x2x1024xf32>
    %5 = vector.shape_cast %4 : vector<1x2x1024xf32> to vector<2x1024xf32>
    %6 = arith.truncf %5 : vector<2x1024xf32> to vector<2x1024xbf16>
    %c0_2 = arith.constant 0 : index
    %c0_3 = arith.constant 0 : index
    %7 = vector.load %arg11[%c0_2, %c0_3] : memref<2x1024xf32, #tpu.memory_space<vmem>>, vector<2x1024xf32>
    %c0_4 = arith.constant 0 : index
    %c0_5 = arith.constant 0 : index
    %8 = vector.load %arg6[%c0_4, %c0_5] : memref<1024x1024xbf16, #tpu.memory_space<vmem>>, vector<1024x1024xbf16>
    %cst = arith.constant dense<0.000000e+00> : vector<2x1024xf32>
    %9 = tpu.matmul %6, %8, %cst {dimension_numbers = #tpu.dot_dimension_numbers<[1], [0], [0], [1], [0, 0, 1, 1], [], []>} : vector<2x1024xbf16>, vector<1024x1024xbf16>, vector<2x1024xf32> -> vector<2x1024xf32>
    %10 = arith.addf %7, %9 : vector<2x1024xf32>
    %c0_6 = arith.constant 0 : index
    %c0_7 = arith.constant 0 : index
    %11 = vector.load %arg11[%c0_6, %c0_7] : memref<2x1024xf32, #tpu.memory_space<vmem>>, vector<2x1024xf32>
    tpu.vector_store %arg11[%c0_6, %c0_7], %10 {strides = array<i32>} : memref<2x1024xf32, #tpu.memory_space<vmem>>, vector<2x1024xf32>,
    %c1_i32 = arith.constant 1 : i32
    %12 = arith.cmpi eq, %arg1, %c1_i32 : i32
    %13 = arith.extui %12 : i1 to i32
    %c0_i32_8 = arith.constant 0 : i32
    %14 = arith.cmpi ne, %13, %c0_i32_8 : i32
    scf.if %14 {
      %c0_9 = arith.constant 0 : index
      %c0_10 = arith.constant 0 : index
      %15 = vector.load %arg11[%c0_9, %c0_10] : memref<2x1024xf32, #tpu.memory_space<vmem>>, vector<2x1024xf32>
      %c0_11 = arith.constant 0 : index
      %c0_12 = arith.constant 0 : index
      %16 = vector.load %arg7[%c0_11, %c0_12] : memref<1x1024xf32, #tpu.memory_space<vmem>>, vector<1x1024xf32>
      %17 = vector.broadcast %16 : vector<1x1024xf32> to vector<2x1024xf32>
      %18 = arith.addf %15, %17 : vector<2x1024xf32>
      %cst_13 = arith.constant 0.000000e+00 : f32
      %19 = vector.broadcast %cst_13 : f32 to vector<2x1024xf32>
      %20 = arith.maximumf %18, %19 : vector<2x1024xf32>
      %21 = arith.truncf %20 : vector<2x1024xf32> to vector<2x1024xbf16>
      %c0_14 = arith.constant 0 : index
      %c0_15 = arith.constant 0 : index
      %22 = vector.load %arg8[%c0_14, %c0_15] : memref<1024x128xbf16, #tpu.memory_space<vmem>>, vector<1024x128xbf16>
      %cst_16 = arith.constant dense<0.000000e+00> : vector<2x128xf32>
      %23 = tpu.matmul %21, %22, %cst_16 {dimension_numbers = #tpu.dot_dimension_numbers<[1], [0], [0], [1], [0, 0, 1, 1], [], []>} : vector<2x1024xbf16>, vector<1024x128xbf16>, vector<2x128xf32> -> vector<2x128xf32>
      %c0_17 = arith.constant 0 : index
      %c0_18 = arith.constant 0 : index
      %c0_19 = arith.constant 0 : index
      %24 = vector.load %arg9[%c0_17, %c0_18, %c0_19] : memref<1x2x128xf32, #tpu.memory_space<vmem>>, vector<1x2x128xf32>
      %25 = vector.shape_cast %24 : vector<1x2x128xf32> to vector<2x128xf32>
      %26 = vector.shape_cast %23 : vector<2x128xf32> to vector<1x2x128xf32>
      tpu.vector_store %arg9[%c0_17, %c0_18, %c0_19], %26 {strides = array<i32>} : memref<1x2x128xf32, #tpu.memory_space<vmem>>, vector<1x2x128xf32>,
    } else {
    }
    return
  }
  func.func @transform_0(%arg0: i32, %arg1: i32) -> (i32, i32) {
    %c0_i32 = arith.constant 0 : i32
    %c0_i32_0 = arith.constant 0 : i32
    %c0_i32_1 = arith.constant 0 : i32
    return %c0_i32, %c0_i32_0 : i32, i32
  }
  func.func @transform_1(%arg0: i32, %arg1: i32) -> (i32, i32) {
    %c0_i32 = arith.constant 0 : i32
    %c0_i32_0 = arith.constant 0 : i32
    %c0_i32_1 = arith.constant 0 : i32
    return %c0_i32, %c0_i32_0 : i32, i32
  }
  func.func @transform_2(%arg0: i32, %arg1: i32) -> (i32, i32) {
    %c0_i32 = arith.constant 0 : i32
    %c0_i32_0 = arith.constant 0 : i32
    %c0_i32_1 = arith.constant 0 : i32
    return %c0_i32, %c0_i32_0 : i32, i32
  }
  func.func @transform_3(%arg0: i32, %arg1: i32) -> (i32, i32) {
    %c0_i32 = arith.constant 0 : i32
    %c0_i32_0 = arith.constant 0 : i32
    %c0_i32_1 = arith.constant 0 : i32
    return %c0_i32, %c0_i32_0 : i32, i32
  }
  func.func @transform_4(%arg0: i32, %arg1: i32) -> (i32, i32) {
    %c0_i32 = arith.constant 0 : i32
    return %arg1, %arg0 : i32, i32
  }
  func.func @transform_5(%arg0: i32, %arg1: i32) -> (i32, i32) {
    %c0_i32 = arith.constant 0 : i32
    %c0_i32_0 = arith.constant 0 : i32
    return %c0_i32, %arg0 : i32, i32
  }
  func.func @transform_6(%arg0: i32, %arg1: i32) -> (i32, i32) {
    %c0_i32 = arith.constant 0 : i32
    %c0_i32_0 = arith.constant 0 : i32
    return %arg0, %c0_i32 : i32, i32
  }
  func.func @transform_7(%arg0: i32, %arg1: i32) -> (i32, i32, i32) {
    %c0_i32 = arith.constant 0 : i32
    %c0_i32_0 = arith.constant 0 : i32
    %c0_i32_1 = arith.constant 0 : i32
    return %arg0, %c0_i32, %c0_i32_0 : i32, i32, i32
  }
}

</mosaic_0001>

<bundles_post_ra>
// kernel: aux_classifier_forward.1
= control target key start
LH: loop header
LB: loop body
LE: loop exit
PB: predicated region body
PF: predicated region fallthrough
CT: control target
= control target key end

     0   :  { %12 = vsyncpa [#allocation5], 0  ;;  %s7914_s0 = inlined_call_operand.vmem [shape: f32[8,256], index: 0, kind: input, shape index: {}]   ;;  %s7915_s1 = inlined_call_operand.vmem [shape: f32[256,16], index: 1, kind: input, shape index: {}]   ;;  %s7916_s2 = inlined_call_operand.hbm [shape: f32[4,128], index: 2, kind: input, shape index: {}]   ;;  %s7917_s3 = inlined_call_operand.hbm [shape: f32[1,128], index: 3, kind: input, shape index: {}]   ;;  %s7918_s4 = inlined_call_operand.hbm [shape: bf16[2048,1024], index: 4, kind: input, shape index: {}]   ;;  %s7919_s5 = inlined_call_operand.hbm [shape: f32[1,1024], index: 5, kind: input, shape index: {}]   ;;  %s7920_s6 = inlined_call_operand.hbm [shape: bf16[1024,128], index: 6, kind: input, shape index: {}]   ;;  %s7921_s7 = inlined_call_operand.vmem [shape: f32[1,2,128], index: 7, kind: output, shape index: {}]  }
   0x1   :  { %13 = vsyncpa [#allocation7], 0 }
   0x2   :  { %14 = vsyncpa [#allocation11], 0  ;;  %s6924_s24 = smov 0   ;;  %s6926_s25 = smov 0  }
   0x3   :  { %s6928_s26 = smov 0   ;;  %s6930_s27 = smov 0  }
   0x4   :  { %s6932_s28 = smov 0   ;;  %s6934_s29 = smov 0  }
   0x5 LB: > { %s5641_s30 = sadd.s32 4294967295, %s6869_s29   ;;  %p138_p0 = scmp.ne.s32.totalorder %s6853_s25, %s6849_s24  ;;  %s6869_s29 = sphi %s6934_s29, %s20_s29   ;;  %s6865_s28 = sphi %s6932_s28, %s7939_s28   ;;  %s6861_s27 = sphi %s6930_s27, %s7938_s27   ;;  %s6857_s26 = sphi %s6928_s26, %s7937_s26   ;;  %s6853_s25 = sphi %s6926_s25, %s7936_s25   ;;  %s6849_s24 = sphi %s6924_s24, %s7935_s24  }
   0x6   : > { %p6956_p1 = scmp.eq.s32.totalorder %s5641_s30, 0  ;;  %p5642_p2 = scmp.ge.s32.totalorder %s6869_s29, 1 }
   0x7   : > { %p227_p3 = scmp.lt.s32.totalorder %s6869_s29, 3  ;;  %s6871_s11 = smov [#allocation4]  }
   0x8   : > { %s7926_s8 = scalar_select %p6956_p1, 1, 0 }
   0x9   : > { %p6964_p4 = por %p6956_p1, %p138_p0  ;;  %p6968_p5 = pnand %p5642_p2, %p227_p3 }
   0xa   : > { %s246_s12 = sshll.u32 %s6871_s11, 4  ;;  %s6872_s13 = smov [#allocation6]   ;;  %s247_s12 = int_to_ptr.vmem [resolvable:$true] %s246_s12 }
   0xb   : > { %s7927_s9 = scalar_select %p6964_p4, 1, 0 }
   0xc   : > { %s7928_s10 = scalar_select %p6968_p5, 1, 0 }
   0xd   : > { %p6509_p6 = pneg %p6968_p5  ;;  %s257_s14 = sshll.u32 %s6872_s13, 4  ;;  %s6980_s14 = int_to_ptr.vmem [resolvable:$true] %s257_s14 }
   0xe   : > { %s6873_s16 = smov [#allocation9]   ;;  %s6661_s20 = scalar_lea.hbm %s7916_s2, 64 }
   0xf   : > { %p6976_p7 = pnand %p6509_p6, %p6956_p1  ;;  %s271_s17 = sshll.u32 %s6873_s16, 4  ;;  %s6982_s17 = int_to_ptr.vmem [resolvable:$true] %s271_s17 }
  0x10   : > { %p6662_p8 = scmp.ne.s32.totalorder %s7916_s2, %s6661_s20  ;;  %p6668_p12 = scmp.lt.u32.totalorder %s6661_s20, %s7916_s2 }
  0x11   : > { %p6992_p9 = pneg %p6976_p7 }
  0x13   : > { %p6664_p10 = pnand %p6992_p9, %p6662_p8 }
  0x15   : > { %p6665_p11 = pneg %p6664_p10 }
  0x17   : > { %p6670_p13 = pnand %p6668_p12, %p6665_p11 }
  0x19   : > { %6673 = shalt.err (!%p6670_p13)
}
  0x1a   : > { %s6674_s13 = scalar_lea.vmem %s247_s12, 64  ;;  %p6682_p6 = scmp.lt.s32.totalorder %s247_s12, %s247_s12 }
  0x1b   : > { %p6675_p0 = scmp.ne.s32.totalorder %s247_s12, %s6674_s13  ;;  %p6683_p4 = scmp.lt.s32.totalorder %s6674_s13, %s6674_s13 }
  0x1d   : > { %p6677_p2 = pnand %p6675_p0, %p6992_p9  ;;  %p6684_p1 = por %p6683_p4, %p6682_p6 }
  0x1f   : > { %p6678_p3 = pneg %p6677_p2 }
  0x21   : > { %p6685_p5 = pnand %p6684_p1, %p6678_p3 }
  0x23   : > { %6688 = shalt.err (!%p6685_p5)
}
  0x24   : > { %6512 = dma.hbm_to_vmem [thread:$0]  (!%p6976_p7), %s7916_s2, 64, %s247_s12, [#allocation5]  }
  0x25   : > { %s6689_s21 = scalar_lea.hbm %s7917_s3, 16 }
  0x26   : > { %p6690_p8 = scmp.ne.s32.totalorder %s7917_s3, %s6689_s21  ;;  %p6696_p1 = scmp.lt.u32.totalorder %s6689_s21, %s7917_s3 }
  0x28   : > { %p6692_p10 = pnand %p6690_p8, %p6992_p9 }
  0x2a   : > { %p6693_p4 = pneg %p6692_p10 }
  0x2c   : > { %p6698_p5 = pnand %p6696_p1, %p6693_p4 }
  0x2e   : > { %6701 = shalt.err (!%p6698_p5)
}
  0x2f   : > { %s6702_s12 = scalar_lea.vmem %s6980_s14, 16  ;;  %s6709_s16 = scalar_lea.vmem %s6980_s14, 32 }
  0x30   : > { %p6703_p11 = scmp.ne.s32.totalorder %s6980_s14, %s6702_s12  ;;  %p6710_p0 = scmp.lt.s32.totalorder %s6980_s14, %s6980_s14 }
  0x31   : > { %p6711_p2 = scmp.lt.s32.totalorder %s6709_s16, %s6702_s12 }
  0x32   : > { %p6705_p12 = pnand %p6703_p11, %p6992_p9 }
  0x33   : > { %p6712_p3 = por %p6711_p2, %p6710_p0 }
  0x34   : > { %p6706_p13 = pneg %p6705_p12 }
  0x36   : > { %p6713_p6 = pnand %p6712_p3, %p6706_p13 }
  0x38   : > { %6716 = shalt.err (!%p6713_p6)
}
  0x39   : > { %6515 = dma.hbm_to_vmem [thread:$0]  (!%p6976_p7), %s7917_s3, 16, %s6980_s14, [#allocation7]  }
  0x3a   : > { %s6717_s22 = scalar_lea.hbm %s7919_s5, 128 }
  0x3b   : > { %p6718_p8 = scmp.ne.s32.totalorder %s7919_s5, %s6717_s22  ;;  %p6724_p1 = scmp.lt.u32.totalorder %s6717_s22, %s7919_s5 }
  0x3d   : > { %p6720_p10 = pnand %p6718_p8, %p6992_p9 }
  0x3f   : > { %p6721_p4 = pneg %p6720_p10 }
  0x41   : > { %p6726_p5 = pnand %p6724_p1, %p6721_p4 }
  0x43   : > { %6729 = shalt.err (!%p6726_p5)
}
  0x44   : > { %s6730_s14 = scalar_lea.vmem %s6982_s17, 128  ;;  %p6738_p0 = scmp.lt.s32.totalorder %s6982_s17, %s6982_s17 }
  0x45   : > { %p6731_p11 = scmp.ne.s32.totalorder %s6982_s17, %s6730_s14  ;;  %p6739_p2 = scmp.lt.s32.totalorder %s6730_s14, %s6730_s14 }
  0x47   : > { %p6733_p12 = pnand %p6731_p11, %p6992_p9  ;;  %p6740_p3 = por %p6739_p2, %p6738_p0 }
  0x49   : > { %p6734_p13 = pneg %p6733_p12 }
  0x4b   : > { %p6741_p6 = pnand %p6740_p3, %p6734_p13 }
  0x4d   : > { %6744 = shalt.err (!%p6741_p6)
}
  0x4e   : > { %6518 = dma.hbm_to_vmem [thread:$0]  (!%p6976_p7), %s7919_s5, 128, %s6982_s17, [#allocation7]  }
  0x4f   : > { %s6874_s19 = smov [#allocation10]   ;;  %s6745_s24 = scalar_lea.hbm %s7920_s6, 8192 }
  0x50   : > { %s284_s20 = sshll.u32 %s6874_s19, 4  ;;  %p6746_p8 = scmp.ne.s32.totalorder %s7920_s6, %s6745_s24  ;;  %s285_s20 = int_to_ptr.vmem [resolvable:$true] %s284_s20 }
  0x51   : > { %p6752_p1 = scmp.lt.u32.totalorder %s6745_s24, %s7920_s6 }
  0x52   : > { %p6748_p10 = pnand %p6746_p8, %p6992_p9 }
  0x54   : > { %p6749_p4 = pneg %p6748_p10 }
  0x56   : > { %p6754_p5 = pnand %p6752_p1, %p6749_p4 }
  0x58   : > { %6757 = shalt.err (!%p6754_p5)
}
  0x59   : > { %s6758_s17 = scalar_lea.vmem %s285_s20, 8192  ;;  %p6766_p0 = scmp.lt.s32.totalorder %s285_s20, %s285_s20 }
  0x5a   : > { %p6759_p11 = scmp.ne.s32.totalorder %s285_s20, %s6758_s17  ;;  %p6767_p2 = scmp.lt.s32.totalorder %s6758_s17, %s6758_s17 }
  0x5c   : > { %p6761_p12 = pnand %p6759_p11, %p6992_p9  ;;  %p6768_p3 = por %p6767_p2, %p6766_p0 }
  0x5e   : > { %p6762_p13 = pneg %p6761_p12 }
  0x60   : > { %p6769_p6 = pnand %p6768_p3, %p6762_p13 }
  0x62   : > { %6772 = shalt.err (!%p6769_p6)
}
  0x63   : > { %s6875_s16 = smov 64   ;;  %s6876_s23 = smov 4  }
  0x64   : > { %6521 = dma.hbm_to_vmem [thread:$0]  (!%p6976_p7), %s7920_s6, 8192, %s285_s20, [#allocation11], %s6875_s16, %s6875_s16, %s6876_s23  }
  0x65   : > { %s29_s21 = sadd.s32 1, %s6865_s28  ;;  %s125_s22 = sadd.s32 1, %s6857_s26 }
  0x66   : > { %p30_p9 = scmp.ge.s32.totalorder %s29_s21, 2  ;;  %p132_p8 = scmp.ne.s32.totalorder %s6857_s26, %s6853_s25 }
  0x67   : > { %p133_p10 = scmp.eq.s32.totalorder %s6869_s29, 0  ;;  %p6530_p4 = scmp.lt.s32.totalorder %s6869_s29, 2 }
  0x68   : > { %s7941_s21 = smov (%p30_p9, %s29_s21), 0  ;;  %s298_s24 = sand.u32 1, %s6869_s29  }
  0x69   : > { %p134_p1 = por %p133_p10, %p132_p8  ;;  %s120_s11 = ssub.s32 %s6865_s28, %s7941_s21 }
  0x6a   : > { %p123_p5 = scmp.eq.s32.totalorder %s120_s11, 0  ;;  %s300_s15 = sand.u32 1, %s6857_s26  }
  0x6b   : > { %s5648_s13 = sshll.u32 %s300_s15, 12  ;;  %s6270_s12 = sshll.u32 %s6865_s28, 16 }
  0x6c   : > { %s7087_s14 = scalar_select %p123_p5, %s6857_s26, %s125_s22  }
  0x6d   : > { %s7092_s16 = scalar_lea.hbm %s7918_s4, %s6270_s12  ;;  %s302_s23 = scalar_lea.vmem [#allocation8], %s5648_s13 }
  0x6e   : > { %s312_s18 = sshll.u32 %s302_s23, 4  ;;  %p7096_p7 = pnand %p6530_p4, %p134_p1  ;;  %s7100_s18 = int_to_ptr.vmem [resolvable:$true] %s312_s18 }
  0x6f   : > { %s7102_s22 = scalar_lea.sflag [#allocation5], %s298_s24  ;;  %s6773_s11 = scalar_lea.hbm %s7092_s16, 65536 }
  0x70   : > { %p6774_p11 = scmp.ne.s32.totalorder %s7092_s16, %s6773_s11  ;;  %p6775_p12 = pneg %p7096_p7 }
  0x71   : > { %s6778_s12 = scalar_lea.hbm %s7918_s4, 131072  ;;  %p6779_p2 = scmp.lt.u32.totalorder %s7092_s16, %s7918_s4 }
  0x72   : > { %p6776_p13 = pnand %p6775_p12, %p6774_p11  ;;  %p6780_p3 = scmp.lt.u32.totalorder %s6778_s12, %s6773_s11 }
  0x73   : > { %p6782_p9 = scmp.lt.u32.totalorder %s6773_s11, %s7092_s16 }
  0x74   : > { %p6777_p0 = pneg %p6776_p13  ;;  %p6781_p6 = por %p6780_p3, %p6779_p2 }
  0x76   : > { %p6783_p8 = por %p6782_p9, %p6781_p6 }
  0x78   : > { %p6784_p10 = pnand %p6783_p8, %p6777_p0 }
  0x7a   : > { %6787 = shalt.err (!%p6784_p10)
}
  0x7b   : > { %s6788_s24 = scalar_lea.vmem %s7100_s18, 65536  ;;  %s6877_s23 = smov [#allocation8]  }
  0x7c   : > { %p6789_p4 = scmp.ne.s32.totalorder %s7100_s18, %s6788_s24  ;;  %s6793_s15 = sshll.u32 %s6877_s23, 4  ;;  %s6794_s15 = int_to_ptr.vmem [resolvable:$false] %s6793_s15 }
  0x7d   : > { %s6795_s13 = scalar_lea.vmem %s6794_s15, 131072  ;;  %p6796_p11 = scmp.lt.s32.totalorder %s7100_s18, %s6794_s15 }
  0x7e   : > { %p6791_p1 = pnand %p6789_p4, %p6775_p12  ;;  %p6797_p13 = scmp.lt.s32.totalorder %s6795_s13, %s6788_s24 }
  0x80   : > { %p6792_p5 = pneg %p6791_p1  ;;  %p6798_p2 = por %p6797_p13, %p6796_p11 }
  0x82   : > { %p6799_p3 = pnand %p6798_p2, %p6792_p5 }
  0x84   : > { %6802 = shalt.err (!%p6799_p3)
}
  0x85   : > { %s6878_s11 = smov 512   ;;  %s6879_s12 = smov 32  }
  0x86   : > { %6525 = dma.hbm_to_vmem [thread:$0]  (!%p7096_p7), %s7092_s16, 65536, %s7100_s18, %s7102_s22, %s6878_s11, %s6878_s11, %s6879_s12  }
  0x87   : > { %p7932_p12 = scmp.ne.s32.totalorder %s7928_s10, 0 }
  0x88   : > { %p7933_p0 = scmp.ne.s32.totalorder (!%p7932_p12), %s7926_s8, 0 }
  0x89   : > { %324 = sbr.rel (%p7932_p12) target bundleno = 1875 (0x753), region = 48 }
  0x90   : > { %6828 = dma.done.wait (%p7933_p0), [#allocation5], 64  }
  0x91   : > { %6830 = vsyncadd (%p7933_p0), [#allocation5], 4294967232 }
  0x92   : > { %6832 = dma.done.wait (%p7933_p0), [#allocation7], 16  }
  0x93   : > { %6834 = vsyncadd (%p7933_p0), [#allocation7], 4294967280  ;;  %s334_s16 = sand.u32 1, %s5641_s30   ;;  %s336_s18 = sand.u32 1, %s6853_s25  }
  0x94   : > { %s5655_s10 = sshll.u32 %s336_s18, 12  ;;  %s335_s19 = scalar_lea.sflag [#allocation5], %s334_s16 }
  0x95   : > { %s7143_s22 = scalar_lea.vmem [#allocation8], %s5655_s10  ;;  %p7934_p7 = scmp.ne.s32.totalorder %s7927_s9, 0 }
  0x97   : > { %6836 = dma.done.wait (%p7934_p7), %s335_s19, 65536  }
  0x98   : > { %6838 = vsyncadd (%p7934_p7), %s335_s19, 4294901760 }
  0x99   : > { %6840 = dma.done.wait (%p7933_p0), [#allocation7], 128  }
  0x9a   : > { %6842 = vsyncadd (%p7933_p0), [#allocation7], 4294967168 }
  0x9b   : > { %6844 = dma.done.wait (%p7933_p0), [#allocation11], 8192  }
  0x9c   : > { %6846 = vsyncadd (%p7933_p0), [#allocation11], 4294959104  ;;  %p5658_p6 = scmp.ne.s32.totalorder %s6861_s27, 0 }
  0x9d   : > { %v407_v0 = vld [vmem:[%s7915_s1 + $0x80] sm:$0xff] (!%p5658_p6)  ;;  %v408_v1 = vld [vmem:[%s7915_s1 + $0x88] sm:$0xff] (!%p5658_p6)  ;;  %v409_v5 = vld [vmem:[%s7915_s1 + $0x90] sm:$0xff] (!%p5658_p6)  ;;  %vm540_vm0 = vcmask (!%p5658_p6), 1043456   ;;  %v6880_v54 = vmov (!%p5658_p6), 0.0   ;;  %vm533_vm1 = vcmask (!%p5658_p6), 31744   ;;  %v626_v62 = vlaneseq (!%p5658_p6) }
  0x9e   : > { %388 = sbr.rel (%p5658_p6) target bundleno = 881 (0x371), region = 72  ;;  %v391_v2 = vld [vmem:[%s7915_s1] sm:$0xff] (!%p5658_p6)  ;;  %v6411_v3 = vpack.c.bf16 (!%p5658_p6), %v408_v1, %v407_v0  ;;  %v392_v4 = vld [vmem:[%s7915_s1 + $0x8] sm:$0xff] (!%p5658_p6)  ;;  %v410_v6 = vld [vmem:[%s7915_s1 + $0x98] sm:$0xff] (!%p5658_p6)  ;;  %882 = vst [vmem:[#allocation3] sm:$0xff] (!%p5658_p6), %v6880_v54  ;;  %s6881_s8 = smov (!%p5658_p6), 124  }
  0x9f   : > { %v6413_v7 = vpack.c.bf16 (!%p5658_p6), %v392_v4, %v391_v2  ;;  %v6415_v8 = vpack.c.bf16 (!%p5658_p6), %v410_v6, %v409_v5  ;;  %v393_v9 = vld [vmem:[%s7915_s1 + $0x10] sm:$0xff] (!%p5658_p6)  ;;  %v394_v10 = vld [vmem:[%s7915_s1 + $0x18] sm:$0xff] (!%p5658_p6)  ;;  %v411_v11 = vld [vmem:[%s7915_s1 + $0xa0] sm:$0xff] (!%p5658_p6)  ;;  %883 = vst [vmem:[#allocation3 + $0x8] sm:$0xff] (!%p5658_p6), %v6880_v54  ;;  %v6882_v60 = vmov (!%p5658_p6), 1983009808  }
  0xa0   : > { %6412 = vmatprep.subr.bf16.mxu0 (!%p5658_p6), %v6411_v3  ;;  %v412_v12 = vld [vmem:[%s7915_s1 + $0xa8] sm:$0xff] (!%p5658_p6)  ;;  %v6417_v13 = vpack.c.bf16 (!%p5658_p6), %v394_v10, %v393_v9  ;;  %v395_v15 = vld [vmem:[%s7915_s1 + $0x20] sm:$0xff] (!%p5658_p6)  ;;  %v413_v17 = vld [vmem:[%s7915_s1 + $0xb0] sm:$0xff] (!%p5658_p6)  ;;  %v624_v61 = vunpack.c.l.s4 (!%p5658_p6), %v6882_v60  ;;  %v627_v0 = vshrl.u32 (!%p5658_p6), %v626_v62, 7 }
  0xa1   : > { %6414 = vmatpush3.bf16.msra.mxu0 (!%p5658_p6), %v6413_v7  ;;  %v6419_v14 = vpack.c.bf16 (!%p5658_p6), %v412_v12, %v411_v11  ;;  %v396_v16 = vld [vmem:[%s7915_s1 + $0x28] sm:$0xff] (!%p5658_p6)  ;;  %v414_v18 = vld [vmem:[%s7915_s1 + $0xb8] sm:$0xff] (!%p5658_p6)  ;;  %v397_v21 = vld [vmem:[%s7915_s1 + $0x30] sm:$0xff] (!%p5658_p6) }
  0xa2   : > { %6416 = vmatprep.subr.bf16.mxu0 (!%p5658_p6), %v6415_v8  ;;  %v6421_v19 = vpack.c.bf16 (!%p5658_p6), %v396_v16, %v395_v15  ;;  %v6423_v20 = vpack.c.bf16 (!%p5658_p6), %v414_v18, %v413_v17  ;;  %v398_v22 = vld [vmem:[%s7915_s1 + $0x38] sm:$0xff] (!%p5658_p6)  ;;  %v415_v23 = vld [vmem:[%s7915_s1 + $0xc0] sm:$0xff] (!%p5658_p6)  ;;  %v416_v24 = vld [vmem:[%s7915_s1 + $0xc8] sm:$0xff] (!%p5658_p6)  ;;  %v625_v63 = vunpack.c.0.s8 (!%p5658_p6), %v624_v61 }
  0xa3   : > { %v390_v25 = vld [vmem:[%s7914_s0 + $0x8] sm:$0xff] (!%p5658_p6)  ;;  %v6425_v26 = vpack.c.bf16 (!%p5658_p6), %v398_v22, %v397_v21  ;;  %v6427_v27 = vpack.c.bf16 (!%p5658_p6), %v416_v24, %v415_v23  ;;  %v399_v28 = vld [vmem:[%s7915_s1 + $0x40] sm:$0xff] (!%p5658_p6)  ;;  %v417_v30 = vld [vmem:[%s7915_s1 + $0xd0] sm:$0xff] (!%p5658_p6) }
  0xa4   : > { %487 = vmatprep.mubr.f32.mxu0 (!%p5658_p6), %v390_v25  ;;  %v400_v29 = vld [vmem:[%s7915_s1 + $0x48] sm:$0xff] (!%p5658_p6)  ;;  %v418_v31 = vld [vmem:[%s7915_s1 + $0xd8] sm:$0xff] (!%p5658_p6)  ;;  %v401_v34 = vld [vmem:[%s7915_s1 + $0x50] sm:$0xff] (!%p5658_p6)  ;;  %v628_v4 = vsub.s32 (!%p5658_p6), %v625_v63, %v627_v0 }
  0xa5   : > { %6418 = vmatpush3.bf16.msra.mxu0 %v6417_v13  ;;  %v6429_v32 = vpack.c.bf16 %v400_v29, %v399_v28  ;;  %v6431_v33 = vpack.c.bf16 %v418_v31, %v417_v30  ;;  %v402_v35 = vld [vmem:[%s7915_s1 + $0x58] sm:$0xff]  ;;  %v419_v36 = vld [vmem:[%s7915_s1 + $0xe0] sm:$0xff]  ;;  %v420_v37 = vld [vmem:[%s7915_s1 + $0xe8] sm:$0xff] }
  0xa6   : > { %6420 = vmatprep.subr.bf16.mxu0 %v6419_v14  ;;  %v6433_v38 = vpack.c.bf16 %v402_v35, %v401_v34  ;;  %v6435_v39 = vpack.c.bf16 %v420_v37, %v419_v36  ;;  %v403_v40 = vld [vmem:[%s7915_s1 + $0x60] sm:$0xff]  ;;  %v404_v41 = vld [vmem:[%s7915_s1 + $0x68] sm:$0xff]  ;;  %v421_v42 = vld [vmem:[%s7915_s1 + $0xf0] sm:$0xff] }
  0xa7   : > { %v422_v43 = vld [vmem:[%s7915_s1 + $0xf8] sm:$0xff]  ;;  %v6437_v44 = vpack.c.bf16 %v404_v41, %v403_v40  ;;  %v405_v46 = vld [vmem:[%s7915_s1 + $0x70] sm:$0xff]  ;;  %v389_v49 = vld [vmem:[%s7914_s0] sm:$0xff] }
  0xa8   : > { %v6439_v45 = vpack.c.bf16 %v422_v43, %v421_v42  ;;  %v406_v47 = vld [vmem:[%s7915_s1 + $0x78] sm:$0xff]  ;;  %v525_v53 = vld [vmem:[#allocation4] sm:$0xf]  ;;  %v5659_v1 = vld [vmem:[#allocation6] ss:$0 sm:$0xff] }
  0xa9   : > { %6422 = vmatpush3.bf16.msra.mxu0 %v6421_v19  ;;  %v6441_v48 = vpack.c.bf16 %v406_v47, %v405_v46  ;;  %6401 = vmatprep.subr.msk.mxu1 %vm540_vm0, %v525_v53  ;;  %v704_v55 = vld [vmem:[#allocation4] sm:$0xf] }
  0xaa   : > { %6424 = vmatprep.subr.bf16.mxu0 %v6423_v20  ;;  %6402 = vmatpush3.msk.msra.mxu1 %vm540_vm0, %v525_v53 }
  0xab   : > { %6406 = vmatprep.subr.msk.mxu1 %vm540_vm0, %v704_v55 }
  0xad   : > { %6426 = vmatpush3.bf16.msra.mxu0 %v6425_v26 }
  0xae   : > { %6428 = vmatprep.subr.bf16.mxu0 %v6427_v27 }
  0xb1   : > { %6430 = vmatpush3.bf16.msra.mxu0 %v6429_v32 }
  0xb2   : > { %6432 = vmatprep.subr.bf16.mxu0 %v6431_v33 }
  0xb5   : > { %6434 = vmatpush3.bf16.msra.mxu0 %v6433_v38 }
  0xb6   : > { %6436 = vmatprep.subr.bf16.mxu0 %v6435_v39 }
  0xb9   : > { %6438 = vmatpush3.bf16.msra.mxu0 %v6437_v44 }
  0xba   : > { %6440 = vmatprep.subr.bf16.mxu0 %v6439_v45 }
  0xbd   : > { %6442 = vmatpush3.bf16.msra.mxu0 %v6441_v48 }
  0xc0   : > { %488 = vmatmul.mubr.f32.vlgmr.msra.gmra.mrb[0].mxu0 %v389_v49 }
 0x193   : > { %v6304_v50 = vpop.f32.mrb[0].mxu0 }
 0x194   : > { %v6305_v51 = vpop.f32.mrb[1].mxu0 }
 0x195   : > { %v6306_v52 = vadd.f32 %v6305_v51, %v6304_v50 }
 0x197   : > { %493 = vxpose.xlu0.b32.start.end [1/1] (short) (narrow) %v6306_v52, 16 }
 0x217   : > { %v509_v56 = vpop.trf.xlu0 }
 0x218   : > { %6403 = vmatprep.mubr.msk.f32.mxu1 %vm533_vm1, %v509_v56  ;;  %712 = vrot.lane.b32.xlu0 %v509_v56, %s6881_s8 }
 0x21b   : > { %v510_v57 = vpop.trf.xlu0 }
 0x21c   : > { %6404 = vmatmul.mubr.msk.f32.vlgmr.msra.gmra.mrb[0].mxu1 %vm533_vm1, %v510_v57  ;;  %714 = vrot.lane.b32.xlu1 %v510_v57, %s6881_s8 }
 0x21d   : > { %6407 = vmatpush3.msk.msra.mxu1 %vm540_vm0, %v704_v55 }
 0x28a   : > { %v713_v58 = vpop.permute.xlu0 %712 }
 0x28b   : > { %6408 = vmatprep.mubr.msk.f32.mxu1 %vm533_vm1, %v713_v58 }
 0x28e   : > { %v715_v59 = vpop.permute.xlu1 %714 }
 0x28f   : > { %6409 = vmatmul.mubr.msk.f32.vlgmr.msra.gmra.mrb[2].mxu1 %vm533_vm1, %v715_v59 }
 0x2ef   : > { %v6405_v2 = vpop.f32.mrb[0].mxu1 }
 0x2f0   : > { %v616_v3 = vadd.f32 %v6405_v2, %v5659_v1  ;;  %v610_v5 = vpop.f32.mrb[1].mxu1 }
 0x2f1   : > { %v611_v6 = vadd.f32 %v5659_v1, %v610_v5 }
 0x2f2   : > { %v620_v7 = vmax.f32 %v616_v3, 0.0 }
 0x2f3   : > { %v619_v8 = vmax.f32 %v611_v6, 0.0 }
 0x2f4   : > { %663 = vst [vmem:[#allocation2 + $0x10] sm:$0x1] %v620_v7  ;;  %v671_v9 = vrot.slane %v620_v7, %v628_v4  ;;  %v683_v10 = vcombine.high %v620_v7, %v620_v7 }
 0x2f5   : > { %621 = vst [vmem:[#allocation2] sm:$0x1] %v619_v8  ;;  %v629_v11 = vrot.slane %v619_v8, %v628_v4  ;;  %v641_v12 = vcombine.high %v619_v8, %v619_v8 }
 0x2f6   : > { %v5668_v13 = vrot.slane %v671_v9, 9  ;;  %v676_v14 = vcombine.high %v671_v9, %v671_v9  ;;  %v690_v15 = vrot.slane %v683_v10, %v628_v4  ;;  %5670 = vst.sshfl [vmem:[#allocation2 + $0x18] sm:$0x1 pattern:$0x76325410] %v683_v10 }
 0x2f7   : > { %v5663_v16 = vrot.slane %v629_v11, 9  ;;  %v634_v17 = vcombine.high %v629_v11, %v629_v11  ;;  %v648_v18 = vrot.slane %v641_v12, %v628_v4  ;;  %5665 = vst.sshfl [vmem:[#allocation2 + $0x8] sm:$0x1 pattern:$0x76325410] %v641_v12 }
 0x2f8   : > { %675 = vst [vmem:[#allocation2 + $0x12] sm:$0x1] %v5668_v13  ;;  %678 = vst [vmem:[#allocation2 + $0x14] sm:$0x1] %v676_v14  ;;  %v5669_v19 = vrot.slane %v676_v14, 9  ;;  %v5671_v20 = vrot.slane %v690_v15, 9  ;;  %v697_v21 = vcombine.high %v690_v15, %v690_v15 }
 0x2f9   : > { %633 = vst [vmem:[#allocation2 + $0x2] sm:$0x1] %v5663_v16  ;;  %636 = vst [vmem:[#allocation2 + $0x4] sm:$0x1] %v634_v17  ;;  %v5664_v22 = vrot.slane %v634_v17, 9  ;;  %v5666_v23 = vrot.slane %v648_v18, 9  ;;  %v655_v24 = vcombine.high %v648_v18, %v648_v18 }
 0x2fa   : > { %682 = vst [vmem:[#allocation2 + $0x16] sm:$0x1] %v5669_v19  ;;  %696 = vst [vmem:[#allocation2 + $0x1a] sm:$0x1] %v5671_v20  ;;  %v5672_v25 = vrot.slane %v697_v21, 9 }
 0x2fb   : > { %699 = vst [vmem:[#allocation2 + $0x1c] sm:$0x1] %v697_v21  ;;  %640 = vst [vmem:[#allocation2 + $0x6] sm:$0x1] %v5664_v22  ;;  %v5667_v26 = vrot.slane %v655_v24, 9 }
 0x2fc   : > { %654 = vst [vmem:[#allocation2 + $0xa] sm:$0x1] %v5666_v23  ;;  %657 = vst [vmem:[#allocation2 + $0xc] sm:$0x1] %v655_v24 }
 0x2fd   : > { %703 = vst [vmem:[#allocation2 + $0x1e] sm:$0x1] %v5672_v25  ;;  %661 = vst [vmem:[#allocation2 + $0xe] sm:$0x1] %v5667_v26 }
 0x362   : > { %v6410_v27 = vpop.f32.mrb[2].mxu1 }
 0x363   : > { %v795_v28 = vadd.f32 %v6410_v27, %v5659_v1  ;;  %v789_v29 = vpop.f32.mrb[3].mxu1 }
 0x364   : > { %v790_v30 = vadd.f32 %v5659_v1, %v789_v29 }
 0x365   : > { %v799_v31 = vmax.f32 %v795_v28, 0.0 }
 0x366   : > { %v798_v32 = vmax.f32 %v790_v30, 0.0 }
 0x367   : > { %841 = vst [vmem:[#allocation2 + $0x11] sm:$0x1] %v799_v31  ;;  %v849_v33 = vrot.slane %v799_v31, %v628_v4  ;;  %v861_v34 = vcombine.high %v799_v31, %v799_v31 }
 0x368   : > { %800 = vst [vmem:[#allocation2 + $0x1] sm:$0x1] %v798_v32  ;;  %v808_v35 = vrot.slane %v798_v32, %v628_v4  ;;  %v820_v36 = vcombine.high %v798_v32, %v798_v32 }
 0x369   : > { %v5682_v37 = vrot.slane %v849_v33, 9  ;;  %v854_v38 = vcombine.high %v849_v33, %v849_v33  ;;  %v868_v39 = vrot.slane %v861_v34, %v628_v4  ;;  %5684 = vst.sshfl [vmem:[#allocation2 + $0x19] sm:$0x1 pattern:$0x76325410] %v861_v34 }
 0x36a   : > { %v5677_v40 = vrot.slane %v808_v35, 9  ;;  %v813_v41 = vcombine.high %v808_v35, %v808_v35  ;;  %v827_v42 = vrot.slane %v820_v36, %v628_v4  ;;  %5679 = vst.sshfl [vmem:[#allocation2 + $0x9] sm:$0x1 pattern:$0x76325410] %v820_v36 }
 0x36b   : > { %853 = vst [vmem:[#allocation2 + $0x13] sm:$0x1] %v5682_v37  ;;  %856 = vst [vmem:[#allocation2 + $0x15] sm:$0x1] %v854_v38  ;;  %v5683_v43 = vrot.slane %v854_v38, 9  ;;  %v5685_v44 = vrot.slane %v868_v39, 9  ;;  %v875_v45 = vcombine.high %v868_v39, %v868_v39 }
 0x36c   : > { %812 = vst [vmem:[#allocation2 + $0x3] sm:$0x1] %v5677_v40  ;;  %815 = vst [vmem:[#allocation2 + $0x5] sm:$0x1] %v813_v41  ;;  %v5678_v46 = vrot.slane %v813_v41, 9  ;;  %v5680_v47 = vrot.slane %v827_v42, 9  ;;  %v834_v48 = vcombine.high %v827_v42, %v827_v42 }
 0x36d   : > { %860 = vst [vmem:[#allocation2 + $0x17] sm:$0x1] %v5683_v43  ;;  %874 = vst [vmem:[#allocation2 + $0x1b] sm:$0x1] %v5685_v44  ;;  %v5686_v49 = vrot.slane %v875_v45, 9 }
 0x36e   : > { %877 = vst [vmem:[#allocation2 + $0x1d] sm:$0x1] %v875_v45  ;;  %819 = vst [vmem:[#allocation2 + $0x7] sm:$0x1] %v5678_v46  ;;  %v5681_v50 = vrot.slane %v834_v48, 9 }
 0x36f   : > { %833 = vst [vmem:[#allocation2 + $0xb] sm:$0x1] %v5680_v47  ;;  %836 = vst [vmem:[#allocation2 + $0xd] sm:$0x1] %v834_v48 }
 0x370   : > { %881 = vst [vmem:[#allocation2 + $0x1f] sm:$0x1] %v5686_v49  ;;  %840 = vst [vmem:[#allocation2 + $0xf] sm:$0x1] %v5681_v50 }
 0x371 PF: > { %v943_v51 = vld [vmem:[%s7143_s22] sm:$0xff]  ;;  %v944_v53 = vld [vmem:[%s7143_s22 + $0x8] sm:$0xff]  ;;  %v6883_v19 = vmov 1983009808   ;;  %v895_v21 = vlaneseq  ;;  %s6271_s11 = sshll.u32 %s6861_s27, 4  ;;  %p6201_p9 = scmp.ne.s32.totalorder %s6861_s27, 1 }
 0x372   : > { %v947_v52 = vld [vmem:[%s7143_s22 + $0x20] sm:$0xff]  ;;  %v948_v55 = vld [vmem:[%s7143_s22 + $0x28] sm:$0xff]  ;;  %v893_v20 = vunpack.c.l.s4 %v6883_v19  ;;  %s7298_s12 = scalar_lea.vmem [#allocation2], %s6271_s11 }
 0x373   : > { %v5690_v54 = vcombine.high %v943_v51, %v947_v52  ;;  %v5689_v56 = vcombine.low %v943_v51, %v947_v52  ;;  %v951_v57 = vld [vmem:[%s7143_s22 + $0x40] sm:$0xff]  ;;  %v5692_v59 = vcombine.high %v944_v53, %v948_v55  ;;  %v5691_v60 = vcombine.low %v944_v53, %v948_v55  ;;  %v952_v62 = vld [vmem:[%s7143_s22 + $0x48] sm:$0xff] }
 0x374   : > { %v955_v58 = vld [vmem:[%s7143_s22 + $0x60] sm:$0xff]  ;;  %v956_v63 = vld [vmem:[%s7143_s22 + $0x68] sm:$0xff]  ;;  %v894_v30 = vunpack.c.0.s8 %v893_v20  ;;  %v7286_v31 = vshrl.u32 %v895_v21, 7 }
 0x375   : > { %v5698_v61 = vcombine.high %v951_v57, %v955_v58  ;;  %v959_v0 = vld [vmem:[%s7143_s22 + $0x80] sm:$0xff]  ;;  %4015 = vmatprep.subr.bf16.mxu0 %v5690_v54  ;;  %v5700_v1 = vcombine.high %v952_v62, %v956_v63  ;;  %v960_v3 = vld [vmem:[%s7143_s22 + $0x88] sm:$0xff]  ;;  %4179 = vmatprep.subr.bf16.mxu1 %v5692_v59  ;;  %v5697_v5 = vcombine.low %v951_v57, %v955_v58 }
 0x376   : > { %v963_v2 = vld [vmem:[%s7143_s22 + $0xa0] sm:$0xff]  ;;  %v964_v4 = vld [vmem:[%s7143_s22 + $0xa8] sm:$0xff]  ;;  %4016 = vmatpush1.bf16.msra.mxu0 %v5689_v56  ;;  %4180 = vmatpush1.bf16.msra.mxu1 %v5691_v60  ;;  %v5699_v6 = vcombine.low %v952_v62, %v956_v63  ;;  %v7294_v40 = vsub.s32 %v894_v30, %v7286_v31 }
 0x377   : > { %4017 = vmatprep.subr.bf16.mxu0 %v5698_v61  ;;  %v5706_v7 = vcombine.high %v959_v0, %v963_v2  ;;  %4181 = vmatprep.subr.bf16.mxu1 %v5700_v1  ;;  %v5708_v8 = vcombine.high %v960_v3, %v964_v4  ;;  %v967_v9 = vld [vmem:[%s7143_s22 + $0xc0] sm:$0xff]  ;;  %v968_v11 = vld [vmem:[%s7143_s22 + $0xc8] sm:$0xff]  ;;  %v5705_v13 = vcombine.low %v959_v0, %v963_v2 }
 0x378   : > { %v971_v10 = vld [vmem:[%s7143_s22 + $0xe0] sm:$0xff]  ;;  %v972_v12 = vld [vmem:[%s7143_s22 + $0xe8] sm:$0xff]  ;;  %v5707_v14 = vcombine.low %v960_v3, %v964_v4 }
 0x379   : > { %v5714_v15 = vcombine.high %v967_v9, %v971_v10  ;;  %v5716_v16 = vcombine.high %v968_v11, %v972_v12  ;;  %v975_v17 = vld [vmem:[%s7143_s22 + $0x100] sm:$0xff]  ;;  %v976_v22 = vld [vmem:[%s7143_s22 + $0x108] sm:$0xff]  ;;  %v5713_v24 = vcombine.low %v967_v9, %v971_v10  ;;  %v5715_v25 = vcombine.low %v968_v11, %v972_v12 }
 0x37a   : > { %4018 = vmatpush1.bf16.msra.mxu0 %v5697_v5  ;;  %4182 = vmatpush1.bf16.msra.mxu1 %v5699_v6  ;;  %v979_v18 = vld [vmem:[%s7143_s22 + $0x120] sm:$0xff]  ;;  %v980_v23 = vld [vmem:[%s7143_s22 + $0x128] sm:$0xff] }
 0x37b   : > { %4019 = vmatprep.subr.bf16.mxu0 %v5706_v7  ;;  %4183 = vmatprep.subr.bf16.mxu1 %v5708_v8  ;;  %v5722_v26 = vcombine.high %v975_v17, %v979_v18  ;;  %v5724_v27 = vcombine.high %v976_v22, %v980_v23  ;;  %v983_v28 = vld [vmem:[%s7143_s22 + $0x140] sm:$0xff]  ;;  %v984_v32 = vld [vmem:[%s7143_s22 + $0x148] sm:$0xff]  ;;  %v5721_v34 = vcombine.low %v975_v17, %v979_v18 }
 0x37c   : > { %v987_v29 = vld [vmem:[%s7143_s22 + $0x160] sm:$0xff]  ;;  %v988_v33 = vld [vmem:[%s7143_s22 + $0x168] sm:$0xff]  ;;  %v5723_v35 = vcombine.low %v976_v22, %v980_v23 }
 0x37d   : > { %v5730_v36 = vcombine.high %v983_v28, %v987_v29  ;;  %v5732_v37 = vcombine.high %v984_v32, %v988_v33  ;;  %v991_v38 = vld [vmem:[%s7143_s22 + $0x180] sm:$0xff]  ;;  %v992_v41 = vld [vmem:[%s7143_s22 + $0x188] sm:$0xff]  ;;  %v5729_v43 = vcombine.low %v983_v28, %v987_v29  ;;  %v5731_v44 = vcombine.low %v984_v32, %v988_v33 }
 0x37e   : > { %4020 = vmatpush1.bf16.msra.mxu0 %v5705_v13  ;;  %4184 = vmatpush1.bf16.msra.mxu1 %v5707_v14  ;;  %v995_v39 = vld [vmem:[%s7143_s22 + $0x1a0] sm:$0xff]  ;;  %v996_v42 = vld [vmem:[%s7143_s22 + $0x1a8] sm:$0xff] }
 0x37f   : > { %4021 = vmatprep.subr.bf16.mxu0 %v5714_v15  ;;  %4185 = vmatprep.subr.bf16.mxu1 %v5716_v16  ;;  %v5738_v45 = vcombine.high %v991_v38, %v995_v39  ;;  %v7301_v46 = vld [vmem:[%s7298_s12] sm:$0xff]  ;;  %v5740_v47 = vcombine.high %v992_v41, %v996_v42  ;;  %v999_v48 = vld [vmem:[%s7143_s22 + $0x1c0] sm:$0xff]  ;;  %v5737_v53 = vcombine.low %v991_v38, %v995_v39 }
 0x380   : > { %v1003_v49 = vld [vmem:[%s7143_s22 + $0x1e0] sm:$0xff]  ;;  %v7307_v50 = vrot.slane %v7301_v46, %v7294_v40  ;;  %v1000_v51 = vld [vmem:[%s7143_s22 + $0x1c8] sm:$0xff]  ;;  %v5739_v55 = vcombine.low %v992_v41, %v996_v42 }
 0x381   : > { %v1004_v52 = vld [vmem:[%s7143_s22 + $0x1e8] sm:$0xff]  ;;  %v5746_v56 = vcombine.high %v999_v48, %v1003_v49  ;;  %v1007_v58 = vld [vmem:[%s7143_s22 + $0x200] sm:$0xff]  ;;  %v5745_v63 = vcombine.low %v999_v48, %v1003_v49 }
 0x382   : > { %4022 = vmatpush1.bf16.msra.mxu0 %v5713_v24  ;;  %4186 = vmatpush1.bf16.msra.mxu1 %v5715_v25  ;;  %v906_v54 = vcombine.high %v7307_v50, %v7307_v50  ;;  %v5748_v57 = vcombine.high %v1000_v51, %v1004_v52  ;;  %v1011_v59 = vld [vmem:[%s7143_s22 + $0x220] sm:$0xff]  ;;  %v1008_v61 = vld [vmem:[%s7143_s22 + $0x208] sm:$0xff]  ;;  %v5747_v0 = vcombine.low %v1000_v51, %v1004_v52 }
 0x383   : > { %4023 = vmatprep.subr.bf16.mxu0 %v5722_v26  ;;  %4187 = vmatprep.subr.bf16.mxu1 %v5724_v27  ;;  %v1012_v62 = vld [vmem:[%s7143_s22 + $0x228] sm:$0xff]  ;;  %v5754_v1 = vcombine.high %v1007_v58, %v1011_v59  ;;  %v1015_v3 = vld [vmem:[%s7143_s22 + $0x240] sm:$0xff]  ;;  %v5753_v7 = vcombine.low %v1007_v58, %v1011_v59 }
 0x384   : > { %v7315_v60 = vpack.c.bf16 %v906_v54, %v906_v54  ;;  %v5756_v2 = vcombine.high %v1008_v61, %v1012_v62  ;;  %v1019_v4 = vld [vmem:[%s7143_s22 + $0x260] sm:$0xff]  ;;  %v1016_v5 = vld [vmem:[%s7143_s22 + $0x248] sm:$0xff]  ;;  %v5755_v8 = vcombine.low %v1008_v61, %v1012_v62 }
 0x385   : > { %v1020_v6 = vld [vmem:[%s7143_s22 + $0x268] sm:$0xff]  ;;  %v5762_v9 = vcombine.high %v1015_v3, %v1019_v4  ;;  %v1023_v11 = vld [vmem:[%s7143_s22 + $0x280] sm:$0xff]  ;;  %v5761_v15 = vcombine.low %v1015_v3, %v1019_v4 }
 0x386   : > { %4024 = vmatpush1.bf16.msra.mxu0 %v5721_v34  ;;  %4188 = vmatpush1.bf16.msra.mxu1 %v5723_v35  ;;  %v5764_v10 = vcombine.high %v1016_v5, %v1020_v6  ;;  %v1027_v12 = vld [vmem:[%s7143_s22 + $0x2a0] sm:$0xff]  ;;  %v1024_v13 = vld [vmem:[%s7143_s22 + $0x288] sm:$0xff]  ;;  %v5763_v16 = vcombine.low %v1016_v5, %v1020_v6 }
 0x387   : > { %4025 = vmatprep.subr.bf16.mxu0 %v5730_v36  ;;  %4189 = vmatprep.subr.bf16.mxu1 %v5732_v37  ;;  %v1028_v14 = vld [vmem:[%s7143_s22 + $0x2a8] sm:$0xff]  ;;  %v5770_v17 = vcombine.high %v1023_v11, %v1027_v12  ;;  %v1031_v19 = vld [vmem:[%s7143_s22 + $0x2c0] sm:$0xff]  ;;  %v5769_v23 = vcombine.low %v1023_v11, %v1027_v12  ;;  %v7364_v12 = vpack.c.bf16 %v7307_v50, %v7307_v50 }
 0x388   : > { %4047 = vmatprep.mubr.bf16.mxu0 %v7315_v60  ;;  %4211 = vmatprep.mubr.bf16.mxu1 %v7315_v60  ;;  %v5772_v18 = vcombine.high %v1024_v13, %v1028_v14  ;;  %v1035_v20 = vld [vmem:[%s7143_s22 + $0x2e0] sm:$0xff]  ;;  %v1032_v21 = vld [vmem:[%s7143_s22 + $0x2c8] sm:$0xff]  ;;  %v5771_v24 = vcombine.low %v1024_v13, %v1028_v14 }
 0x389   : > { %v1036_v22 = vld [vmem:[%s7143_s22 + $0x2e8] sm:$0xff]  ;;  %v5778_v25 = vcombine.high %v1031_v19, %v1035_v20  ;;  %v1039_v27 = vld [vmem:[%s7143_s22 + $0x300] sm:$0xff]  ;;  %v5777_v32 = vcombine.low %v1031_v19, %v1035_v20 }
 0x38a   : > { %4026 = vmatpush1.bf16.msra.mxu0 %v5729_v43  ;;  %4190 = vmatpush1.bf16.msra.mxu1 %v5731_v44  ;;  %v5780_v26 = vcombine.high %v1032_v21, %v1036_v22  ;;  %v1043_v28 = vld [vmem:[%s7143_s22 + $0x320] sm:$0xff]  ;;  %v1040_v29 = vld [vmem:[%s7143_s22 + $0x308] sm:$0xff]  ;;  %v5779_v33 = vcombine.low %v1032_v21, %v1036_v22 }
 0x38b   : > { %4027 = vmatprep.subr.bf16.mxu0 %v5738_v45  ;;  %4191 = vmatprep.subr.bf16.mxu1 %v5740_v47  ;;  %v1044_v30 = vld [vmem:[%s7143_s22 + $0x328] sm:$0xff]  ;;  %v5786_v34 = vcombine.high %v1039_v27, %v1043_v28  ;;  %v1047_v36 = vld [vmem:[%s7143_s22 + $0x340] sm:$0xff]  ;;  %v5785_v41 = vcombine.low %v1039_v27, %v1043_v28 }
 0x38c   : > { %v5788_v35 = vcombine.high %v1040_v29, %v1044_v30  ;;  %v1051_v37 = vld [vmem:[%s7143_s22 + $0x360] sm:$0xff]  ;;  %v1048_v38 = vld [vmem:[%s7143_s22 + $0x348] sm:$0xff]  ;;  %v5787_v42 = vcombine.low %v1040_v29, %v1044_v30 }
 0x38d   : > { %v1052_v39 = vld [vmem:[%s7143_s22 + $0x368] sm:$0xff]  ;;  %v5794_v43 = vcombine.high %v1047_v36, %v1051_v37  ;;  %v1055_v45 = vld [vmem:[%s7143_s22 + $0x380] sm:$0xff]  ;;  %v5793_v51 = vcombine.low %v1047_v36, %v1051_v37 }
 0x38e   : > { %4028 = vmatpush1.bf16.msra.mxu0 %v5737_v53  ;;  %4192 = vmatpush1.bf16.msra.mxu1 %v5739_v55  ;;  %v5796_v44 = vcombine.high %v1048_v38, %v1052_v39  ;;  %v1059_v47 = vld [vmem:[%s7143_s22 + $0x3a0] sm:$0xff]  ;;  %v1056_v48 = vld [vmem:[%s7143_s22 + $0x388] sm:$0xff]  ;;  %v5795_v52 = vcombine.low %v1048_v38, %v1052_v39 }
 0x38f   : > { %4029 = vmatprep.subr.bf16.mxu0 %v5746_v56  ;;  %4193 = vmatprep.subr.bf16.mxu1 %v5748_v57  ;;  %v1060_v49 = vld [vmem:[%s7143_s22 + $0x3a8] sm:$0xff]  ;;  %v5802_v53 = vcombine.high %v1055_v45, %v1059_v47  ;;  %v1063_v55 = vld [vmem:[%s7143_s22 + $0x3c0] sm:$0xff]  ;;  %v891_v57 = vcombine.high %v7301_v46, %v7301_v46  ;;  %v5801_v61 = vcombine.low %v1055_v45, %v1059_v47 }
 0x390   : > { %v5804_v54 = vcombine.high %v1056_v48, %v1060_v49  ;;  %v1067_v56 = vld [vmem:[%s7143_s22 + $0x3e0] sm:$0xff]  ;;  %v1064_v58 = vld [vmem:[%s7143_s22 + $0x3c8] sm:$0xff]  ;;  %v5803_v62 = vcombine.low %v1056_v48, %v1060_v49 }
 0x391   : > { %v1068_v59 = vld [vmem:[%s7143_s22 + $0x3e8] sm:$0xff]  ;;  %v7354_v3 = vrot.slane %v891_v57, %v7294_v40  ;;  %v5809_v5 = vcombine.low %v1063_v55, %v1067_v56  ;;  %v1087_v19 = vld [vmem:[%s7143_s22 + $0x480] sm:$0xff] }
 0x392   : > { %4030 = vmatpush1.bf16.msra.mxu0 %v5745_v63  ;;  %4194 = vmatpush1.bf16.msra.mxu1 %v5747_v0  ;;  %v5810_v63 = vcombine.high %v1063_v55, %v1067_v56  ;;  %v5812_v0 = vcombine.high %v1064_v58, %v1068_v59  ;;  %v1072_v46 = vld [vmem:[%s7143_s22 + $0x408] sm:$0xff]  ;;  %v5811_v6 = vcombine.low %v1064_v58, %v1068_v59  ;;  %v1091_v20 = vld [vmem:[%s7143_s22 + $0x4a0] sm:$0xff] }
 0x393   : > { %4031 = vmatprep.subr.bf16.mxu0 %v5754_v1  ;;  %4195 = vmatprep.subr.bf16.mxu1 %v5756_v2  ;;  %v1071_v1 = vld [vmem:[%s7143_s22 + $0x400] sm:$0xff]  ;;  %v1076_v4 = vld [vmem:[%s7143_s22 + $0x428] sm:$0xff]  ;;  %v907_v11 = vcombine.high %v7354_v3, %v7354_v3 }
 0x394   : > { %v1075_v2 = vld [vmem:[%s7143_s22 + $0x420] sm:$0xff]  ;;  %v1080_v13 = vld [vmem:[%s7143_s22 + $0x448] sm:$0xff] }
 0x395   : > { %v1084_v14 = vld [vmem:[%s7143_s22 + $0x468] sm:$0xff]  ;;  %v7370_v21 = vpack.c.bf16 %v907_v11, %v907_v11  ;;  %v1095_v27 = vld [vmem:[%s7143_s22 + $0x4c0] sm:$0xff] }
 0x396   : > { %4032 = vmatpush1.bf16.msra.mxu0 %v5753_v7  ;;  %4196 = vmatpush1.bf16.msra.mxu1 %v5755_v8  ;;  %v5818_v7 = vcombine.high %v1071_v1, %v1075_v2  ;;  %v5820_v8 = vcombine.high %v1072_v46, %v1076_v4  ;;  %v1088_v50 = vld [vmem:[%s7143_s22 + $0x488] sm:$0xff]  ;;  %v1099_v28 = vld [vmem:[%s7143_s22 + $0x4e0] sm:$0xff] }
 0x397   : > { %4033 = vmatprep.subr.bf16.mxu0 %v5762_v9  ;;  %4197 = vmatprep.subr.bf16.mxu1 %v5764_v10  ;;  %v1079_v9 = vld [vmem:[%s7143_s22 + $0x440] sm:$0xff]  ;;  %v1092_v22 = vld [vmem:[%s7143_s22 + $0x4a8] sm:$0xff] }
 0x398   : > { %v1083_v10 = vld [vmem:[%s7143_s22 + $0x460] sm:$0xff]  ;;  %v1096_v29 = vld [vmem:[%s7143_s22 + $0x4c8] sm:$0xff] }
 0x399   : > { %v1100_v30 = vld [vmem:[%s7143_s22 + $0x4e8] sm:$0xff]  ;;  %v1103_v36 = vld [vmem:[%s7143_s22 + $0x500] sm:$0xff] }
 0x39a   : > { %4034 = vmatpush1.bf16.msra.mxu0 %v5761_v15  ;;  %4198 = vmatpush1.bf16.msra.mxu1 %v5763_v16  ;;  %v5817_v15 = vcombine.low %v1071_v1, %v1075_v2  ;;  %v5819_v16 = vcombine.low %v1072_v46, %v1076_v4  ;;  %v1107_v37 = vld [vmem:[%s7143_s22 + $0x520] sm:$0xff]  ;;  %v1104_v38 = vld [vmem:[%s7143_s22 + $0x508] sm:$0xff] }
 0x39b   : > { %4035 = vmatprep.subr.bf16.mxu0 %v5770_v17  ;;  %4199 = vmatprep.subr.bf16.mxu1 %v5772_v18  ;;  %v5826_v17 = vcombine.high %v1079_v9, %v1083_v10  ;;  %v5828_v18 = vcombine.high %v1080_v13, %v1084_v14  ;;  %v1108_v39 = vld [vmem:[%s7143_s22 + $0x528] sm:$0xff]  ;;  %v1111_v45 = vld [vmem:[%s7143_s22 + $0x540] sm:$0xff] }
 0x39c   : > { %v1115_v47 = vld [vmem:[%s7143_s22 + $0x560] sm:$0xff]  ;;  %v1112_v48 = vld [vmem:[%s7143_s22 + $0x548] sm:$0xff] }
 0x39d   : > { %v1116_v49 = vld [vmem:[%s7143_s22 + $0x568] sm:$0xff]  ;;  %v1119_v55 = vld [vmem:[%s7143_s22 + $0x580] sm:$0xff]  ;;  %v5857_v59 = vcombine.low %v1111_v45, %v1115_v47 }
 0x39e   : > { %4036 = vmatpush1.bf16.msra.mxu0 %v5769_v23  ;;  %4200 = vmatpush1.bf16.msra.mxu1 %v5771_v24  ;;  %v5825_v23 = vcombine.low %v1079_v9, %v1083_v10  ;;  %v5827_v24 = vcombine.low %v1080_v13, %v1084_v14  ;;  %v1123_v56 = vld [vmem:[%s7143_s22 + $0x5a0] sm:$0xff]  ;;  %v1120_v57 = vld [vmem:[%s7143_s22 + $0x588] sm:$0xff] }
 0x39f   : > { %4037 = vmatprep.subr.bf16.mxu0 %v5778_v25  ;;  %4201 = vmatprep.subr.bf16.mxu1 %v5780_v26  ;;  %v5834_v25 = vcombine.high %v1087_v19, %v1091_v20  ;;  %v5836_v26 = vcombine.high %v1088_v50, %v1092_v22  ;;  %v1124_v58 = vld [vmem:[%s7143_s22 + $0x5a8] sm:$0xff]  ;;  %v1131_v1 = vld [vmem:[%s7143_s22 + $0x5e0] sm:$0xff]  ;;  %v5865_v4 = vcombine.low %v1119_v55, %v1123_v56 }
 0x3a0   : > { %v1128_v2 = vld [vmem:[%s7143_s22 + $0x5c8] sm:$0xff]  ;;  %v1139_v9 = vld [vmem:[%s7143_s22 + $0x620] sm:$0xff] }
 0x3a1   : > { %v1132_v46 = vld [vmem:[%s7143_s22 + $0x5e8] sm:$0xff] }
 0x3a2   : > { %4038 = vmatpush1.bf16.msra.mxu0 %v5777_v32  ;;  %4202 = vmatpush1.bf16.msra.mxu1 %v5779_v33  ;;  %v5833_v32 = vcombine.low %v1087_v19, %v1091_v20  ;;  %v5835_v33 = vcombine.low %v1088_v50, %v1092_v22  ;;  %v1136_v10 = vld [vmem:[%s7143_s22 + $0x608] sm:$0xff]  ;;  %v5875_v14 = vcombine.low %v1128_v2, %v1132_v46 }
 0x3a3   : > { %4039 = vmatprep.subr.bf16.mxu0 %v5786_v34  ;;  %4203 = vmatprep.subr.bf16.mxu1 %v5788_v35  ;;  %v5842_v34 = vcombine.high %v1095_v27, %v1099_v28  ;;  %v5844_v35 = vcombine.high %v1096_v29, %v1100_v30  ;;  %v1140_v11 = vld [vmem:[%s7143_s22 + $0x628] sm:$0xff] }
 0x3a4   : > { %v1144_v19 = vld [vmem:[%s7143_s22 + $0x648] sm:$0xff]  ;;  %v5883_v22 = vcombine.low %v1136_v10, %v1140_v11 }
 0x3a5   : > { %v1148_v20 = vld [vmem:[%s7143_s22 + $0x668] sm:$0xff] }
 0x3a6   : > { %4040 = vmatpush1.bf16.msra.mxu0 %v5785_v41  ;;  %4204 = vmatpush1.bf16.msra.mxu1 %v5787_v42  ;;  %v5841_v41 = vcombine.low %v1095_v27, %v1099_v28  ;;  %v5843_v42 = vcombine.low %v1096_v29, %v1100_v30  ;;  %v1152_v27 = vld [vmem:[%s7143_s22 + $0x688] sm:$0xff]  ;;  %v5891_v30 = vcombine.low %v1144_v19, %v1148_v20 }
 0x3a7   : > { %4041 = vmatprep.subr.bf16.mxu0 %v5794_v43  ;;  %4205 = vmatprep.subr.bf16.mxu1 %v5796_v44  ;;  %v5850_v43 = vcombine.high %v1103_v36, %v1107_v37  ;;  %v5852_v44 = vcombine.high %v1104_v38, %v1108_v39  ;;  %v1156_v28 = vld [vmem:[%s7143_s22 + $0x6a8] sm:$0xff] }
 0x3aa   : > { %4042 = vmatpush1.bf16.msra.mxu0 %v5793_v51  ;;  %4206 = vmatpush1.bf16.msra.mxu1 %v5795_v52  ;;  %v5849_v51 = vcombine.low %v1103_v36, %v1107_v37  ;;  %v5851_v52 = vcombine.low %v1104_v38, %v1108_v39  ;;  %v1160_v36 = vld [vmem:[%s7143_s22 + $0x6c8] sm:$0xff]  ;;  %v5899_v39 = vcombine.low %v1152_v27, %v1156_v28 }
 0x3ab   : > { %4043 = vmatprep.subr.bf16.mxu0 %v5802_v53  ;;  %4207 = vmatprep.subr.bf16.mxu1 %v5804_v54  ;;  %v5858_v53 = vcombine.high %v1111_v45, %v1115_v47  ;;  %v5860_v54 = vcombine.high %v1112_v48, %v1116_v49  ;;  %v1164_v37 = vld [vmem:[%s7143_s22 + $0x6e8] sm:$0xff] }
 0x3ac   : > { %v1168_v45 = vld [vmem:[%s7143_s22 + $0x708] sm:$0xff] }
 0x3ad   : > { %v1172_v47 = vld [vmem:[%s7143_s22 + $0x728] sm:$0xff] }
 0x3ae   : > { %4044 = vmatpush1.bf16.msra.mxu0 %v5801_v61  ;;  %4208 = vmatpush1.bf16.msra.mxu1 %v5803_v62  ;;  %v5859_v61 = vcombine.low %v1112_v48, %v1116_v49  ;;  %v5866_v62 = vcombine.high %v1119_v55, %v1123_v56  ;;  %v5907_v49 = vcombine.low %v1160_v36, %v1164_v37  ;;  %v1176_v55 = vld [vmem:[%s7143_s22 + $0x748] sm:$0xff] }
 0x3af   : > { %4045 = vmatprep.subr.bf16.mxu0 %v5810_v63  ;;  %4209 = vmatprep.subr.bf16.mxu1 %v5812_v0  ;;  %v5868_v63 = vcombine.high %v1120_v57, %v1124_v58  ;;  %v1127_v0 = vld [vmem:[%s7143_s22 + $0x5c0] sm:$0xff]  ;;  %v1180_v56 = vld [vmem:[%s7143_s22 + $0x768] sm:$0xff] }
 0x3b0   : > { %v5873_v13 = vcombine.low %v1127_v0, %v1131_v1 }
 0x3b2   : > { %4046 = vmatpush1.bf16.msra.mxu0 %v5809_v5  ;;  %4210 = vmatpush1.bf16.msra.mxu1 %v5811_v6  ;;  %v5867_v5 = vcombine.low %v1120_v57, %v1124_v58  ;;  %v5874_v6 = vcombine.high %v1127_v0, %v1131_v1  ;;  %v5915_v58 = vcombine.low %v1168_v45, %v1172_v47  ;;  %v1184_v0 = vld [vmem:[%s7143_s22 + $0x788] sm:$0xff] }
 0x3b3   : > { %4056 = vmatprep.subr.bf16.mxu0 %v5818_v7  ;;  %4220 = vmatprep.subr.bf16.mxu1 %v5820_v8  ;;  %v5876_v7 = vcombine.high %v1128_v2, %v1132_v46  ;;  %v1135_v8 = vld [vmem:[%s7143_s22 + $0x600] sm:$0xff]  ;;  %v1188_v1 = vld [vmem:[%s7143_s22 + $0x7a8] sm:$0xff]  ;;  %v5923_v46 = vcombine.low %v1176_v55, %v1180_v56 }
 0x3b4   : > { %v5881_v50 = vcombine.low %v1135_v8, %v1139_v9 }
 0x3b5   : > { %4048 = vmatmul.mubr.bf16.vlgmr.msra.gmra.mrb[0].mxu0 %v7364_v12  ;;  %4212 = vmatmul.mubr.bf16.vlgmr.msra.gmra.mrb[0].mxu1 %v7364_v12 }
 0x3b6   : > { %4057 = vmatpush1.bf16.msra.mxu0 %v5817_v15  ;;  %4221 = vmatpush1.bf16.msra.mxu1 %v5819_v16  ;;  %v5882_v15 = vcombine.high %v1135_v8, %v1139_v9  ;;  %v5884_v16 = vcombine.high %v1136_v10, %v1140_v11  ;;  %v1192_v8 = vld [vmem:[%s7143_s22 + $0x7c8] sm:$0xff]  ;;  %v7431_v10 = vld [vmem:[%s7298_s12 + $0x8] sm:$0xff] }
 0x3b7   : > { %4058 = vmatprep.subr.bf16.mxu0 %v5826_v17  ;;  %4222 = vmatprep.subr.bf16.mxu1 %v5828_v18  ;;  %v1143_v17 = vld [vmem:[%s7143_s22 + $0x640] sm:$0xff]  ;;  %v1196_v9 = vld [vmem:[%s7143_s22 + $0x7e8] sm:$0xff] }
 0x3b8   : > { %4088 = vmatprep.mubr.bf16.mxu0 %v7370_v21  ;;  %4252 = vmatprep.mubr.bf16.mxu1 %v7370_v21  ;;  %v1147_v18 = vld [vmem:[%s7143_s22 + $0x660] sm:$0xff] }
 0x3b9   : > { %v5889_v29 = vcombine.low %v1143_v17, %v1147_v18 }
 0x3ba   : > { %4059 = vmatpush1.bf16.msra.mxu0 %v5825_v23  ;;  %4223 = vmatpush1.bf16.msra.mxu1 %v5827_v24  ;;  %v5890_v23 = vcombine.high %v1143_v17, %v1147_v18  ;;  %v5892_v24 = vcombine.high %v1144_v19, %v1148_v20  ;;  %v1203_v17 = vld [vmem:[%s7143_s22 + $0x820] sm:$0xff]  ;;  %v7437_v18 = vrot.slane %v7431_v10, %v7294_v40  ;;  %v1200_v19 = vld [vmem:[%s7143_s22 + $0x808] sm:$0xff] }
 0x3bb   : > { %4060 = vmatprep.subr.bf16.mxu0 %v5834_v25  ;;  %4224 = vmatprep.subr.bf16.mxu1 %v5836_v26  ;;  %v1151_v25 = vld [vmem:[%s7143_s22 + $0x680] sm:$0xff]  ;;  %v1204_v20 = vld [vmem:[%s7143_s22 + $0x828] sm:$0xff] }
 0x3bc   : > { %v1155_v26 = vld [vmem:[%s7143_s22 + $0x6a0] sm:$0xff] }
 0x3bd   : > { %v5897_v38 = vcombine.low %v1151_v25, %v1155_v26 }
 0x3be   : > { %4061 = vmatpush1.bf16.msra.mxu0 %v5833_v32  ;;  %4225 = vmatpush1.bf16.msra.mxu1 %v5835_v33  ;;  %v5898_v32 = vcombine.high %v1151_v25, %v1155_v26  ;;  %v5900_v33 = vcombine.high %v1152_v27, %v1156_v28  ;;  %v1207_v25 = vld [vmem:[%s7143_s22 + $0x840] sm:$0xff]  ;;  %v923_v27 = vcombine.high %v7437_v18, %v7437_v18 }
 0x3bf   : > { %4062 = vmatprep.subr.bf16.mxu0 %v5842_v34  ;;  %4226 = vmatprep.subr.bf16.mxu1 %v5844_v35  ;;  %v1159_v34 = vld [vmem:[%s7143_s22 + $0x6c0] sm:$0xff]  ;;  %v7447_v28 = vpack.c.bf16 %v7354_v3, %v7354_v3  ;;  %v1216_v3 = vld [vmem:[%s7143_s22 + $0x888] sm:$0xff] }
 0x3c0   : > { %v1163_v35 = vld [vmem:[%s7143_s22 + $0x6e0] sm:$0xff] }
 0x3c1   : > { %v5905_v48 = vcombine.low %v1159_v34, %v1163_v35  ;;  %v1211_v26 = vld [vmem:[%s7143_s22 + $0x860] sm:$0xff] }
 0x3c2   : > { %4063 = vmatpush1.bf16.msra.mxu0 %v5841_v41  ;;  %4227 = vmatpush1.bf16.msra.mxu1 %v5843_v42  ;;  %v5906_v41 = vcombine.high %v1159_v34, %v1163_v35  ;;  %v5908_v42 = vcombine.high %v1160_v36, %v1164_v37  ;;  %v5954_v34 = vcombine.high %v1207_v25, %v1211_v26  ;;  %v1215_v36 = vld [vmem:[%s7143_s22 + $0x880] sm:$0xff] }
 0x3c3   : > { %4064 = vmatprep.subr.bf16.mxu0 %v5850_v43  ;;  %4228 = vmatprep.subr.bf16.mxu1 %v5852_v44  ;;  %v1167_v43 = vld [vmem:[%s7143_s22 + $0x700] sm:$0xff] }
 0x3c4   : > { %v1171_v44 = vld [vmem:[%s7143_s22 + $0x720] sm:$0xff] }
 0x3c5   : > { %v5913_v57 = vcombine.low %v1167_v43, %v1171_v44  ;;  %v1219_v37 = vld [vmem:[%s7143_s22 + $0x8a0] sm:$0xff] }
 0x3c6   : > { %4065 = vmatpush1.bf16.msra.mxu0 %v5849_v51  ;;  %4229 = vmatpush1.bf16.msra.mxu1 %v5851_v52  ;;  %v5914_v51 = vcombine.high %v1167_v43, %v1171_v44  ;;  %v5916_v52 = vcombine.high %v1168_v45, %v1172_v47  ;;  %v5962_v43 = vcombine.high %v1215_v36, %v1219_v37  ;;  %v1223_v45 = vld [vmem:[%s7143_s22 + $0x8c0] sm:$0xff] }
 0x3c7   : > { %4066 = vmatprep.subr.bf16.mxu0 %v5858_v53  ;;  %4230 = vmatprep.subr.bf16.mxu1 %v5860_v54  ;;  %v1175_v53 = vld [vmem:[%s7143_s22 + $0x740] sm:$0xff] }
 0x3c8   : > { %v1179_v54 = vld [vmem:[%s7143_s22 + $0x760] sm:$0xff] }
 0x3c9   : > { %v5921_v2 = vcombine.low %v1175_v53, %v1179_v54  ;;  %v1227_v47 = vld [vmem:[%s7143_s22 + $0x8e0] sm:$0xff] }
 0x3ca   : > { %4067 = vmatpush1.bf16.msra.mxu0 %v5857_v59  ;;  %4231 = vmatpush1.bf16.msra.mxu1 %v5859_v61  ;;  %v5922_v59 = vcombine.high %v1175_v53, %v1179_v54  ;;  %v5924_v61 = vcombine.high %v1176_v55, %v1180_v56  ;;  %v5970_v53 = vcombine.high %v1223_v45, %v1227_v47  ;;  %v1231_v55 = vld [vmem:[%s7143_s22 + $0x900] sm:$0xff] }
 0x3cb   : > { %4068 = vmatprep.subr.bf16.mxu0 %v5866_v62  ;;  %4232 = vmatprep.subr.bf16.mxu1 %v5868_v63  ;;  %v1183_v62 = vld [vmem:[%s7143_s22 + $0x780] sm:$0xff] }
 0x3cc   : > { %v1187_v63 = vld [vmem:[%s7143_s22 + $0x7a0] sm:$0xff] }
 0x3cd   : > { %v5929_v11 = vcombine.low %v1183_v62, %v1187_v63  ;;  %v1235_v56 = vld [vmem:[%s7143_s22 + $0x920] sm:$0xff] }
 0x3ce   : > { %4069 = vmatpush1.bf16.msra.mxu0 %v5865_v4  ;;  %4233 = vmatpush1.bf16.msra.mxu1 %v5867_v5  ;;  %v5930_v4 = vcombine.high %v1183_v62, %v1187_v63  ;;  %v5932_v5 = vcombine.high %v1184_v0, %v1188_v1  ;;  %v5978_v62 = vcombine.high %v1231_v55, %v1235_v56 }
 0x3cf   : > { %4070 = vmatprep.subr.bf16.mxu0 %v5874_v6  ;;  %4234 = vmatprep.subr.bf16.mxu1 %v5876_v7  ;;  %v1191_v6 = vld [vmem:[%s7143_s22 + $0x7c0] sm:$0xff] }
 0x3d0   : > { %v1195_v7 = vld [vmem:[%s7143_s22 + $0x7e0] sm:$0xff] }
 0x3d2   : > { %4071 = vmatpush1.bf16.msra.mxu0 %v5873_v13  ;;  %4235 = vmatpush1.bf16.msra.mxu1 %v5875_v14  ;;  %v5931_v13 = vcombine.low %v1184_v0, %v1188_v1  ;;  %v5938_v14 = vcombine.high %v1191_v6, %v1195_v7  ;;  %v1239_v0 = vld [vmem:[%s7143_s22 + $0x940] sm:$0xff] }
 0x3d3   : > { %4072 = vmatprep.subr.bf16.mxu0 %v5882_v15  ;;  %4236 = vmatprep.subr.bf16.mxu1 %v5884_v16  ;;  %v5940_v15 = vcombine.high %v1192_v8, %v1196_v9  ;;  %v1199_v16 = vld [vmem:[%s7143_s22 + $0x800] sm:$0xff] }
 0x3d4   : > { %v1243_v1 = vld [vmem:[%s7143_s22 + $0x960] sm:$0xff] }
 0x3d6   : > { %4073 = vmatpush1.bf16.msra.mxu0 %v5881_v50  ;;  %4237 = vmatpush1.bf16.msra.mxu1 %v5883_v22  ;;  %v5937_v50 = vcombine.low %v1191_v6, %v1195_v7  ;;  %v5939_v22 = vcombine.low %v1192_v8, %v1196_v9  ;;  %v5986_v6 = vcombine.high %v1239_v0, %v1243_v1  ;;  %v1247_v8 = vld [vmem:[%s7143_s22 + $0x980] sm:$0xff] }
 0x3d7   : > { %4074 = vmatprep.subr.bf16.mxu0 %v5890_v23  ;;  %4238 = vmatprep.subr.bf16.mxu1 %v5892_v24  ;;  %v5946_v23 = vcombine.high %v1199_v16, %v1203_v17  ;;  %v5948_v24 = vcombine.high %v1200_v19, %v1204_v20  ;;  %v1251_v9 = vld [vmem:[%s7143_s22 + $0x9a0] sm:$0xff] }
 0x3da   : > { %4075 = vmatpush1.bf16.msra.mxu0 %v5889_v29  ;;  %4239 = vmatpush1.bf16.msra.mxu1 %v5891_v30  ;;  %v1208_v29 = vld [vmem:[%s7143_s22 + $0x848] sm:$0xff] }
 0x3db   : > { %4076 = vmatprep.subr.bf16.mxu0 %v5898_v32  ;;  %4240 = vmatprep.subr.bf16.mxu1 %v5900_v33  ;;  %v1212_v30 = vld [vmem:[%s7143_s22 + $0x868] sm:$0xff]  ;;  %v5945_v32 = vcombine.low %v1199_v16, %v1203_v17  ;;  %v5947_v33 = vcombine.low %v1200_v19, %v1204_v20  ;;  %v5994_v16 = vcombine.high %v1247_v8, %v1251_v9  ;;  %v1255_v19 = vld [vmem:[%s7143_s22 + $0x9c0] sm:$0xff] }
 0x3dc   : > { %v5956_v35 = vcombine.high %v1208_v29, %v1212_v30  ;;  %v1259_v20 = vld [vmem:[%s7143_s22 + $0x9e0] sm:$0xff] }
 0x3de   : > { %4077 = vmatpush1.bf16.msra.mxu0 %v5897_v38  ;;  %4241 = vmatpush1.bf16.msra.mxu1 %v5899_v39  ;;  %v7453_v38 = vpack.c.bf16 %v923_v27, %v923_v27  ;;  %v1220_v39 = vld [vmem:[%s7143_s22 + $0x8a8] sm:$0xff]  ;;  %v1263_v27 = vld [vmem:[%s7143_s22 + $0xa00] sm:$0xff] }
 0x3df   : > { %4078 = vmatprep.subr.bf16.mxu0 %v5906_v41  ;;  %4242 = vmatprep.subr.bf16.mxu1 %v5908_v42  ;;  %v5953_v41 = vcombine.low %v1207_v25, %v1211_v26  ;;  %v5955_v42 = vcombine.low %v1208_v29, %v1212_v30  ;;  %v5964_v44 = vcombine.high %v1216_v3, %v1220_v39  ;;  %v1267_v29 = vld [vmem:[%s7143_s22 + $0xa20] sm:$0xff]  ;;  %v1264_v30 = vld [vmem:[%s7143_s22 + $0xa08] sm:$0xff] }
 0x3e0   : > { %v6002_v25 = vcombine.high %v1255_v19, %v1259_v20 }
 0x3e2   : > { %4079 = vmatpush1.bf16.msra.mxu0 %v5905_v48  ;;  %4243 = vmatpush1.bf16.msra.mxu1 %v5907_v49  ;;  %v1224_v48 = vld [vmem:[%s7143_s22 + $0x8c8] sm:$0xff] }
 0x3e3   : > { %4080 = vmatprep.subr.bf16.mxu0 %v5914_v51  ;;  %4244 = vmatprep.subr.bf16.mxu1 %v5916_v52  ;;  %v1228_v49 = vld [vmem:[%s7143_s22 + $0x8e8] sm:$0xff]  ;;  %v5961_v51 = vcombine.low %v1215_v36, %v1219_v37  ;;  %v5963_v52 = vcombine.low %v1216_v3, %v1220_v39  ;;  %v1271_v37 = vld [vmem:[%s7143_s22 + $0xa40] sm:$0xff] }
 0x3e4   : > { %v5972_v54 = vcombine.high %v1224_v48, %v1228_v49  ;;  %v1275_v3 = vld [vmem:[%s7143_s22 + $0xa60] sm:$0xff]  ;;  %v1272_v39 = vld [vmem:[%s7143_s22 + $0xa48] sm:$0xff] }
 0x3e6   : > { %4081 = vmatpush1.bf16.msra.mxu0 %v5913_v57  ;;  %4245 = vmatpush1.bf16.msra.mxu1 %v5915_v58  ;;  %v1232_v57 = vld [vmem:[%s7143_s22 + $0x908] sm:$0xff] }
 0x3e7   : > { %4082 = vmatprep.subr.bf16.mxu0 %v5922_v59  ;;  %4246 = vmatprep.subr.bf16.mxu1 %v5924_v61  ;;  %v1236_v58 = vld [vmem:[%s7143_s22 + $0x928] sm:$0xff]  ;;  %v5969_v59 = vcombine.low %v1223_v45, %v1227_v47  ;;  %v5971_v61 = vcombine.low %v1224_v48, %v1228_v49  ;;  %v1279_v47 = vld [vmem:[%s7143_s22 + $0xa80] sm:$0xff] }
 0x3e8   : > { %v5980_v63 = vcombine.high %v1232_v57, %v1236_v58  ;;  %v1283_v48 = vld [vmem:[%s7143_s22 + $0xaa0] sm:$0xff]  ;;  %v1280_v49 = vld [vmem:[%s7143_s22 + $0xa88] sm:$0xff] }
 0x3ea   : > { %4083 = vmatpush1.bf16.msra.mxu0 %v5921_v2  ;;  %4247 = vmatpush1.bf16.msra.mxu1 %v5923_v46  ;;  %v1240_v2 = vld [vmem:[%s7143_s22 + $0x948] sm:$0xff] }
 0x3eb   : > { %4084 = vmatprep.subr.bf16.mxu0 %v5930_v4  ;;  %4248 = vmatprep.subr.bf16.mxu1 %v5932_v5  ;;  %v1244_v46 = vld [vmem:[%s7143_s22 + $0x968] sm:$0xff]  ;;  %v5977_v4 = vcombine.low %v1231_v55, %v1235_v56  ;;  %v5979_v5 = vcombine.low %v1232_v57, %v1236_v58  ;;  %v1287_v56 = vld [vmem:[%s7143_s22 + $0xac0] sm:$0xff] }
 0x3ec   : > { %v5988_v7 = vcombine.high %v1240_v2, %v1244_v46  ;;  %v1291_v57 = vld [vmem:[%s7143_s22 + $0xae0] sm:$0xff]  ;;  %v1288_v58 = vld [vmem:[%s7143_s22 + $0xac8] sm:$0xff] }
 0x3ee   : > { %4085 = vmatpush1.bf16.msra.mxu0 %v5929_v11  ;;  %4249 = vmatpush1.bf16.msra.mxu1 %v5931_v13  ;;  %v1248_v11 = vld [vmem:[%s7143_s22 + $0x988] sm:$0xff] }
 0x3ef   : > { %4086 = vmatprep.subr.bf16.mxu0 %v5938_v14  ;;  %4250 = vmatprep.subr.bf16.mxu1 %v5940_v15  ;;  %v1252_v13 = vld [vmem:[%s7143_s22 + $0x9a8] sm:$0xff]  ;;  %v5985_v14 = vcombine.low %v1239_v0, %v1243_v1  ;;  %v5987_v15 = vcombine.low %v1240_v2, %v1244_v46  ;;  %v1295_v1 = vld [vmem:[%s7143_s22 + $0xb00] sm:$0xff] }
 0x3f0   : > { %v5996_v17 = vcombine.high %v1248_v11, %v1252_v13  ;;  %v1299_v2 = vld [vmem:[%s7143_s22 + $0xb20] sm:$0xff]  ;;  %v1296_v46 = vld [vmem:[%s7143_s22 + $0xb08] sm:$0xff] }
 0x3f2   : > { %4087 = vmatpush1.bf16.msra.mxu0 %v5937_v50  ;;  %4251 = vmatpush1.bf16.msra.mxu1 %v5939_v22  ;;  %v1256_v50 = vld [vmem:[%s7143_s22 + $0x9c8] sm:$0xff] }
 0x3f3   : > { %4097 = vmatprep.subr.bf16.mxu0 %v5946_v23  ;;  %4261 = vmatprep.subr.bf16.mxu1 %v5948_v24  ;;  %v1260_v22 = vld [vmem:[%s7143_s22 + $0x9e8] sm:$0xff]  ;;  %v5993_v23 = vcombine.low %v1247_v8, %v1251_v9  ;;  %v5995_v24 = vcombine.low %v1248_v11, %v1252_v13  ;;  %v1303_v9 = vld [vmem:[%s7143_s22 + $0xb40] sm:$0xff] }
 0x3f4   : > { %v6004_v26 = vcombine.high %v1256_v50, %v1260_v22  ;;  %v1307_v11 = vld [vmem:[%s7143_s22 + $0xb60] sm:$0xff]  ;;  %v1304_v13 = vld [vmem:[%s7143_s22 + $0xb48] sm:$0xff] }
 0x3f5   : > { %4089 = vmatmul.mubr.bf16.vlgmr.msra.gmra.mrb[0].mxu0 %v7447_v28  ;;  %4253 = vmatmul.mubr.bf16.vlgmr.msra.gmra.mrb[0].mxu1 %v7447_v28 }
 0x3f6   : > { %4098 = vmatpush1.bf16.msra.mxu0 %v5945_v32  ;;  %4262 = vmatpush1.bf16.msra.mxu1 %v5947_v33  ;;  %v1268_v32 = vld [vmem:[%s7143_s22 + $0xa28] sm:$0xff]  ;;  %v6001_v33 = vcombine.low %v1255_v19, %v1259_v20  ;;  %v1311_v20 = vld [vmem:[%s7143_s22 + $0xb80] sm:$0xff] }
 0x3f7   : > { %4099 = vmatprep.subr.bf16.mxu0 %v5954_v34  ;;  %4263 = vmatprep.subr.bf16.mxu1 %v5956_v35  ;;  %v6003_v34 = vcombine.low %v1256_v50, %v1260_v22  ;;  %v6010_v35 = vcombine.high %v1263_v27, %v1267_v29  ;;  %v6012_v36 = vcombine.high %v1264_v30, %v1268_v32  ;;  %v1315_v50 = vld [vmem:[%s7143_s22 + $0xba0] sm:$0xff]  ;;  %v1312_v22 = vld [vmem:[%s7143_s22 + $0xb88] sm:$0xff] }
 0x3f8   : > { %4129 = vmatprep.mubr.bf16.mxu0 %v7453_v38  ;;  %4293 = vmatprep.mubr.bf16.mxu1 %v7453_v38 }
 0x3fa   : > { %4100 = vmatpush1.bf16.msra.mxu0 %v5953_v41  ;;  %4264 = vmatpush1.bf16.msra.mxu1 %v5955_v42  ;;  %v1276_v41 = vld [vmem:[%s7143_s22 + $0xa68] sm:$0xff]  ;;  %v6009_v42 = vcombine.low %v1263_v27, %v1267_v29  ;;  %v1319_v29 = vld [vmem:[%s7143_s22 + $0xbc0] sm:$0xff] }
 0x3fb   : > { %4101 = vmatprep.subr.bf16.mxu0 %v5962_v43  ;;  %4265 = vmatprep.subr.bf16.mxu1 %v5964_v44  ;;  %v6011_v43 = vcombine.low %v1264_v30, %v1268_v32  ;;  %v6018_v44 = vcombine.high %v1271_v37, %v1275_v3  ;;  %v6020_v45 = vcombine.high %v1272_v39, %v1276_v41  ;;  %v1323_v30 = vld [vmem:[%s7143_s22 + $0xbe0] sm:$0xff] }
 0x3fc   : > { %v908_v32 = vcombine.high %v7431_v10, %v7431_v10  ;;  %v1328_v10 = vld [vmem:[%s7143_s22 + $0xc08] sm:$0xff] }
 0x3fe   : > { %4102 = vmatpush1.bf16.msra.mxu0 %v5961_v51  ;;  %4266 = vmatpush1.bf16.msra.mxu1 %v5963_v52  ;;  %v1284_v51 = vld [vmem:[%s7143_s22 + $0xaa8] sm:$0xff]  ;;  %v6017_v52 = vcombine.low %v1271_v37, %v1275_v3  ;;  %v6066_v37 = vcombine.high %v1319_v29, %v1323_v30 }
 0x3ff   : > { %4103 = vmatprep.subr.bf16.mxu0 %v5970_v53  ;;  %4267 = vmatprep.subr.bf16.mxu1 %v5972_v54  ;;  %v6019_v53 = vcombine.low %v1272_v39, %v1276_v41  ;;  %v6026_v54 = vcombine.high %v1279_v47, %v1283_v48  ;;  %v6028_v55 = vcombine.high %v1280_v49, %v1284_v51  ;;  %v1327_v39 = vld [vmem:[%s7143_s22 + $0xc00] sm:$0xff] }
 0x400   : > { %v1331_v41 = vld [vmem:[%s7143_s22 + $0xc20] sm:$0xff] }
 0x402   : > { %4104 = vmatpush1.bf16.msra.mxu0 %v5969_v59  ;;  %4268 = vmatpush1.bf16.msra.mxu1 %v5971_v61  ;;  %v1292_v59 = vld [vmem:[%s7143_s22 + $0xae8] sm:$0xff]  ;;  %v6025_v61 = vcombine.low %v1279_v47, %v1283_v48  ;;  %v6074_v47 = vcombine.high %v1327_v39, %v1331_v41 }
 0x403   : > { %4105 = vmatprep.subr.bf16.mxu0 %v5978_v62  ;;  %4269 = vmatprep.subr.bf16.mxu1 %v5980_v63  ;;  %v6027_v62 = vcombine.low %v1280_v49, %v1284_v51  ;;  %v6034_v63 = vcombine.high %v1287_v56, %v1291_v57  ;;  %v6036_v0 = vcombine.high %v1288_v58, %v1292_v59  ;;  %v1335_v49 = vld [vmem:[%s7143_s22 + $0xc40] sm:$0xff] }
 0x404   : > { %v1339_v51 = vld [vmem:[%s7143_s22 + $0xc60] sm:$0xff] }
 0x406   : > { %4106 = vmatpush1.bf16.msra.mxu0 %v5977_v4  ;;  %4270 = vmatpush1.bf16.msra.mxu1 %v5979_v5  ;;  %v1300_v4 = vld [vmem:[%s7143_s22 + $0xb28] sm:$0xff]  ;;  %v6033_v5 = vcombine.low %v1287_v56, %v1291_v57  ;;  %v6073_v56 = vcombine.low %v1327_v39, %v1331_v41 }
 0x407   : > { %4107 = vmatprep.subr.bf16.mxu0 %v5986_v6  ;;  %4271 = vmatprep.subr.bf16.mxu1 %v5988_v7  ;;  %v6035_v6 = vcombine.low %v1288_v58, %v1292_v59  ;;  %v6042_v7 = vcombine.high %v1295_v1, %v1299_v2  ;;  %v6044_v8 = vcombine.high %v1296_v46, %v1300_v4 }
 0x408   : > { %v6082_v58 = vcombine.high %v1335_v49, %v1339_v51 }
 0x40a   : > { %4108 = vmatpush1.bf16.msra.mxu0 %v5985_v14  ;;  %4272 = vmatpush1.bf16.msra.mxu1 %v5987_v15  ;;  %v1308_v14 = vld [vmem:[%s7143_s22 + $0xb68] sm:$0xff]  ;;  %v6041_v15 = vcombine.low %v1295_v1, %v1299_v2  ;;  %v6081_v1 = vcombine.low %v1335_v49, %v1339_v51 }
 0x40b   : > { %4109 = vmatprep.subr.bf16.mxu0 %v5994_v16  ;;  %4273 = vmatprep.subr.bf16.mxu1 %v5996_v17  ;;  %v6043_v16 = vcombine.low %v1296_v46, %v1300_v4  ;;  %v6050_v17 = vcombine.high %v1303_v9, %v1307_v11  ;;  %v6052_v19 = vcombine.high %v1304_v13, %v1308_v14 }
 0x40e   : > { %4110 = vmatpush1.bf16.msra.mxu0 %v5993_v23  ;;  %4274 = vmatpush1.bf16.msra.mxu1 %v5995_v24  ;;  %v1316_v23 = vld [vmem:[%s7143_s22 + $0xba8] sm:$0xff]  ;;  %v6049_v24 = vcombine.low %v1303_v9, %v1307_v11 }
 0x40f   : > { %4111 = vmatprep.subr.bf16.mxu0 %v6002_v25  ;;  %4275 = vmatprep.subr.bf16.mxu1 %v6004_v26  ;;  %v6051_v25 = vcombine.low %v1304_v13, %v1308_v14  ;;  %v6058_v26 = vcombine.high %v1311_v20, %v1315_v50  ;;  %v6060_v27 = vcombine.high %v1312_v22, %v1316_v23 }
 0x412   : > { %4112 = vmatpush1.bf16.msra.mxu0 %v6001_v33  ;;  %4276 = vmatpush1.bf16.msra.mxu1 %v6003_v34  ;;  %v1320_v33 = vld [vmem:[%s7143_s22 + $0xbc8] sm:$0xff] }
 0x413   : > { %4113 = vmatprep.subr.bf16.mxu0 %v6010_v35  ;;  %4277 = vmatprep.subr.bf16.mxu1 %v6012_v36  ;;  %v1324_v34 = vld [vmem:[%s7143_s22 + $0xbe8] sm:$0xff]  ;;  %v6057_v35 = vcombine.low %v1311_v20, %v1315_v50  ;;  %v6059_v36 = vcombine.low %v1312_v22, %v1316_v23 }
 0x414   : > { %v6068_v3 = vcombine.high %v1320_v33, %v1324_v34 }
 0x416   : > { %4114 = vmatpush1.bf16.msra.mxu0 %v6009_v42  ;;  %4278 = vmatpush1.bf16.msra.mxu1 %v6011_v43  ;;  %v7518_v42 = vrot.slane %v908_v32, %v7294_v40  ;;  %v1332_v43 = vld [vmem:[%s7143_s22 + $0xc28] sm:$0xff] }
 0x417   : > { %4115 = vmatprep.subr.bf16.mxu0 %v6018_v44  ;;  %4279 = vmatprep.subr.bf16.mxu1 %v6020_v45  ;;  %v6065_v44 = vcombine.low %v1319_v29, %v1323_v30  ;;  %v6067_v45 = vcombine.low %v1320_v33, %v1324_v34  ;;  %v6076_v48 = vcombine.high %v1328_v10, %v1332_v43  ;;  %v1375_v34 = vld [vmem:[%s7143_s22 + $0xd80] sm:$0xff] }
 0x418   : > { %v6075_v57 = vcombine.low %v1328_v10, %v1332_v43  ;;  %v1383_v43 = vld [vmem:[%s7143_s22 + $0xdc0] sm:$0xff] }
 0x41a   : > { %4116 = vmatpush1.bf16.msra.mxu0 %v6017_v52  ;;  %4280 = vmatpush1.bf16.msra.mxu1 %v6019_v53  ;;  %v924_v52 = vcombine.high %v7518_v42, %v7518_v42  ;;  %v7528_v53 = vpack.c.bf16 %v7437_v18, %v7437_v18  ;;  %v1344_v18 = vld [vmem:[%s7143_s22 + $0xc88] sm:$0xff] }
 0x41b   : > { %4117 = vmatprep.subr.bf16.mxu0 %v6026_v54  ;;  %4281 = vmatprep.subr.bf16.mxu1 %v6028_v55  ;;  %v1336_v54 = vld [vmem:[%s7143_s22 + $0xc48] sm:$0xff] }
 0x41c   : > { %v1340_v55 = vld [vmem:[%s7143_s22 + $0xc68] sm:$0xff] }
 0x41d   : > { %v6084_v59 = vcombine.high %v1336_v54, %v1340_v55  ;;  %v6083_v2 = vcombine.low %v1336_v54, %v1340_v55  ;;  %v1391_v54 = vld [vmem:[%s7143_s22 + $0xe00] sm:$0xff] }
 0x41e   : > { %4118 = vmatpush1.bf16.msra.mxu0 %v6025_v61  ;;  %4282 = vmatpush1.bf16.msra.mxu1 %v6027_v62  ;;  %v1343_v61 = vld [vmem:[%s7143_s22 + $0xc80] sm:$0xff] }
 0x41f   : > { %4119 = vmatprep.subr.bf16.mxu0 %v6034_v63  ;;  %4283 = vmatprep.subr.bf16.mxu1 %v6036_v0  ;;  %v1347_v62 = vld [vmem:[%s7143_s22 + $0xca0] sm:$0xff]  ;;  %v7534_v63 = vpack.c.bf16 %v924_v52, %v924_v52  ;;  %v1348_v0 = vld [vmem:[%s7143_s22 + $0xca8] sm:$0xff] }
 0x420   : > { %v6090_v46 = vcombine.high %v1343_v61, %v1347_v62  ;;  %v6092_v4 = vcombine.high %v1344_v18, %v1348_v0  ;;  %v6089_v9 = vcombine.low %v1343_v61, %v1347_v62  ;;  %v6091_v11 = vcombine.low %v1344_v18, %v1348_v0  ;;  %v1395_v55 = vld [vmem:[%s7143_s22 + $0xe20] sm:$0xff] }
 0x421   : > { %v6138_v61 = vcombine.high %v1391_v54, %v1395_v55  ;;  %v1399_v18 = vld [vmem:[%s7143_s22 + $0xe40] sm:$0xff] }
 0x422   : > { %4120 = vmatpush1.bf16.msra.mxu0 %v6033_v5  ;;  %4284 = vmatpush1.bf16.msra.mxu1 %v6035_v6  ;;  %v1351_v5 = vld [vmem:[%s7143_s22 + $0xcc0] sm:$0xff] }
 0x423   : > { %4121 = vmatprep.subr.bf16.mxu0 %v6042_v7  ;;  %4285 = vmatprep.subr.bf16.mxu1 %v6044_v8  ;;  %v1355_v6 = vld [vmem:[%s7143_s22 + $0xce0] sm:$0xff]  ;;  %v1352_v7 = vld [vmem:[%s7143_s22 + $0xcc8] sm:$0xff] }
 0x424   : > { %v1356_v8 = vld [vmem:[%s7143_s22 + $0xce8] sm:$0xff]  ;;  %v6098_v13 = vcombine.high %v1351_v5, %v1355_v6  ;;  %v6097_v20 = vcombine.low %v1351_v5, %v1355_v6  ;;  %v1403_v0 = vld [vmem:[%s7143_s22 + $0xe60] sm:$0xff] }
 0x425   : > { %v6100_v14 = vcombine.high %v1352_v7, %v1356_v8  ;;  %v6099_v50 = vcombine.low %v1352_v7, %v1356_v8  ;;  %v6146_v5 = vcombine.high %v1399_v18, %v1403_v0  ;;  %v1407_v7 = vld [vmem:[%s7143_s22 + $0xe80] sm:$0xff] }
 0x426   : > { %4122 = vmatpush1.bf16.msra.mxu0 %v6041_v15  ;;  %4286 = vmatpush1.bf16.msra.mxu1 %v6043_v16  ;;  %v1359_v15 = vld [vmem:[%s7143_s22 + $0xd00] sm:$0xff] }
 0x427   : > { %4123 = vmatprep.subr.bf16.mxu0 %v6050_v17  ;;  %4287 = vmatprep.subr.bf16.mxu1 %v6052_v19  ;;  %v1363_v16 = vld [vmem:[%s7143_s22 + $0xd20] sm:$0xff]  ;;  %v1360_v17 = vld [vmem:[%s7143_s22 + $0xd08] sm:$0xff] }
 0x428   : > { %v1364_v19 = vld [vmem:[%s7143_s22 + $0xd28] sm:$0xff]  ;;  %v6106_v22 = vcombine.high %v1359_v15, %v1363_v16  ;;  %v6105_v29 = vcombine.low %v1359_v15, %v1363_v16  ;;  %v1411_v8 = vld [vmem:[%s7143_s22 + $0xea0] sm:$0xff] }
 0x429   : > { %v6108_v23 = vcombine.high %v1360_v17, %v1364_v19  ;;  %v6107_v30 = vcombine.low %v1360_v17, %v1364_v19  ;;  %v6154_v15 = vcombine.high %v1407_v7, %v1411_v8  ;;  %v1415_v17 = vld [vmem:[%s7143_s22 + $0xec0] sm:$0xff] }
 0x42a   : > { %4124 = vmatpush1.bf16.msra.mxu0 %v6049_v24  ;;  %4288 = vmatpush1.bf16.msra.mxu1 %v6051_v25  ;;  %v1367_v24 = vld [vmem:[%s7143_s22 + $0xd40] sm:$0xff] }
 0x42b   : > { %4125 = vmatprep.subr.bf16.mxu0 %v6058_v26  ;;  %4289 = vmatprep.subr.bf16.mxu1 %v6060_v27  ;;  %v1371_v25 = vld [vmem:[%s7143_s22 + $0xd60] sm:$0xff]  ;;  %v1368_v26 = vld [vmem:[%s7143_s22 + $0xd48] sm:$0xff] }
 0x42c   : > { %v1372_v27 = vld [vmem:[%s7143_s22 + $0xd68] sm:$0xff]  ;;  %v6114_v32 = vcombine.high %v1367_v24, %v1371_v25  ;;  %v1419_v19 = vld [vmem:[%s7143_s22 + $0xee0] sm:$0xff] }
 0x42d   : > { %v6116_v33 = vcombine.high %v1368_v26, %v1372_v27  ;;  %v6115_v39 = vcombine.low %v1368_v26, %v1372_v27  ;;  %v1423_v26 = vld [vmem:[%s7143_s22 + $0xf00] sm:$0xff] }
 0x42e   : > { %4126 = vmatpush1.bf16.msra.mxu0 %v6057_v35  ;;  %4290 = vmatpush1.bf16.msra.mxu1 %v6059_v36  ;;  %v1379_v35 = vld [vmem:[%s7143_s22 + $0xda0] sm:$0xff]  ;;  %v1376_v36 = vld [vmem:[%s7143_s22 + $0xd88] sm:$0xff] }
 0x42f   : > { %4127 = vmatprep.subr.bf16.mxu0 %v6066_v37  ;;  %4291 = vmatprep.subr.bf16.mxu1 %v6068_v3  ;;  %v1380_v37 = vld [vmem:[%s7143_s22 + $0xda8] sm:$0xff]  ;;  %v6113_v3 = vcombine.low %v1367_v24, %v1371_v25  ;;  %v6122_v41 = vcombine.high %v1375_v34, %v1379_v35  ;;  %v6162_v24 = vcombine.high %v1415_v17, %v1419_v19  ;;  %v1427_v27 = vld [vmem:[%s7143_s22 + $0xf20] sm:$0xff] }
 0x430   : > { %v6124_v10 = vcombine.high %v1376_v36, %v1380_v37  ;;  %v6123_v49 = vcombine.low %v1376_v36, %v1380_v37  ;;  %v1431_v36 = vld [vmem:[%s7143_s22 + $0xf40] sm:$0xff] }
 0x431   : > { %v1435_v37 = vld [vmem:[%s7143_s22 + $0xf60] sm:$0xff] }
 0x432   : > { %4128 = vmatpush1.bf16.msra.mxu0 %v6065_v44  ;;  %4292 = vmatpush1.bf16.msra.mxu1 %v6067_v45  ;;  %v1387_v44 = vld [vmem:[%s7143_s22 + $0xde0] sm:$0xff]  ;;  %v1384_v45 = vld [vmem:[%s7143_s22 + $0xdc8] sm:$0xff] }
 0x433   : > { %4138 = vmatprep.subr.bf16.mxu0 %v6074_v47  ;;  %4302 = vmatprep.subr.bf16.mxu1 %v6076_v48  ;;  %v1388_v47 = vld [vmem:[%s7143_s22 + $0xde8] sm:$0xff]  ;;  %v6121_v48 = vcombine.low %v1375_v34, %v1379_v35  ;;  %v6130_v51 = vcombine.high %v1383_v43, %v1387_v44  ;;  %v6170_v34 = vcombine.high %v1423_v26, %v1427_v27 }
 0x434   : > { %v6132_v52 = vcombine.high %v1384_v45, %v1388_v47 }
 0x435   : > { %4130 = vmatmul.mubr.bf16.vlgmr.msra.gmra.mrb[0].mxu0 %v7528_v53  ;;  %4294 = vmatmul.mubr.bf16.vlgmr.msra.gmra.mrb[0].mxu1 %v7528_v53 }
 0x436   : > { %4139 = vmatpush1.bf16.msra.mxu0 %v6073_v56  ;;  %4303 = vmatpush1.bf16.msra.mxu1 %v6075_v57  ;;  %v1392_v56 = vld [vmem:[%s7143_s22 + $0xe08] sm:$0xff] }
 0x437   : > { %4140 = vmatprep.subr.bf16.mxu0 %v6082_v58  ;;  %4304 = vmatprep.subr.bf16.mxu1 %v6084_v59  ;;  %v1396_v57 = vld [vmem:[%s7143_s22 + $0xe28] sm:$0xff]  ;;  %v6129_v58 = vcombine.low %v1383_v43, %v1387_v44  ;;  %v6131_v59 = vcombine.low %v1384_v45, %v1388_v47  ;;  %v6178_v43 = vcombine.high %v1431_v36, %v1435_v37  ;;  %v1439_v45 = vld [vmem:[%s7143_s22 + $0xf80] sm:$0xff] }
 0x438   : > { %4170 = vmatprep.mubr.bf16.mxu0 %v7534_v63  ;;  %4334 = vmatprep.mubr.bf16.mxu1 %v7534_v63  ;;  %v6140_v62 = vcombine.high %v1392_v56, %v1396_v57  ;;  %v1443_v47 = vld [vmem:[%s7143_s22 + $0xfa0] sm:$0xff] }
 0x43a   : > { %4141 = vmatpush1.bf16.msra.mxu0 %v6081_v1  ;;  %4305 = vmatpush1.bf16.msra.mxu1 %v6083_v2  ;;  %v1400_v1 = vld [vmem:[%s7143_s22 + $0xe48] sm:$0xff] }
 0x43b   : > { %4142 = vmatprep.subr.bf16.mxu0 %v6090_v46  ;;  %4306 = vmatprep.subr.bf16.mxu1 %v6092_v4  ;;  %v1404_v2 = vld [vmem:[%s7143_s22 + $0xe68] sm:$0xff]  ;;  %v6137_v46 = vcombine.low %v1391_v54, %v1395_v55  ;;  %v6139_v4 = vcombine.low %v1392_v56, %v1396_v57  ;;  %v6186_v54 = vcombine.high %v1439_v45, %v1443_v47  ;;  %v1447_v56 = vld [vmem:[%s7143_s22 + $0xfc0] sm:$0xff] }
 0x43c   : > { %v6148_v6 = vcombine.high %v1400_v1, %v1404_v2  ;;  %v1451_v57 = vld [vmem:[%s7143_s22 + $0xfe0] sm:$0xff] }
 0x43e   : > { %4143 = vmatpush1.bf16.msra.mxu0 %v6089_v9  ;;  %4307 = vmatpush1.bf16.msra.mxu1 %v6091_v11  ;;  %v1408_v9 = vld [vmem:[%s7143_s22 + $0xe88] sm:$0xff] }
 0x43f   : > { %4144 = vmatprep.subr.bf16.mxu0 %v6098_v13  ;;  %4308 = vmatprep.subr.bf16.mxu1 %v6100_v14  ;;  %v1412_v11 = vld [vmem:[%s7143_s22 + $0xea8] sm:$0xff]  ;;  %v6145_v13 = vcombine.low %v1399_v18, %v1403_v0  ;;  %v6147_v14 = vcombine.low %v1400_v1, %v1404_v2  ;;  %v6194_v18 = vcombine.high %v1447_v56, %v1451_v57  ;;  %v945_v1 = vld [vmem:[%s7143_s22 + $0x10] sm:$0xff] }
 0x440   : > { %v6156_v16 = vcombine.high %v1408_v9, %v1412_v11  ;;  %v949_v2 = vld [vmem:[%s7143_s22 + $0x30] sm:$0xff] }
 0x442   : > { %4145 = vmatpush1.bf16.msra.mxu0 %v6097_v20  ;;  %4309 = vmatpush1.bf16.msra.mxu1 %v6099_v50  ;;  %v1416_v20 = vld [vmem:[%s7143_s22 + $0xec8] sm:$0xff] }
 0x443   : > { %4146 = vmatprep.subr.bf16.mxu0 %v6106_v22  ;;  %4310 = vmatprep.subr.bf16.mxu1 %v6108_v23  ;;  %v1420_v50 = vld [vmem:[%s7143_s22 + $0xee8] sm:$0xff]  ;;  %v6153_v22 = vcombine.low %v1407_v7, %v1411_v8  ;;  %v6155_v23 = vcombine.low %v1408_v9, %v1412_v11  ;;  %v5694_v7 = vcombine.high %v945_v1, %v949_v2  ;;  %v953_v9 = vld [vmem:[%s7143_s22 + $0x50] sm:$0xff] }
 0x444   : > { %v6164_v25 = vcombine.high %v1416_v20, %v1420_v50  ;;  %v957_v11 = vld [vmem:[%s7143_s22 + $0x70] sm:$0xff] }
 0x446   : > { %4147 = vmatpush1.bf16.msra.mxu0 %v6105_v29  ;;  %4311 = vmatpush1.bf16.msra.mxu1 %v6107_v30  ;;  %v1424_v29 = vld [vmem:[%s7143_s22 + $0xf08] sm:$0xff] }
 0x447   : > { %4148 = vmatprep.subr.bf16.mxu0 %v6114_v32  ;;  %4312 = vmatprep.subr.bf16.mxu1 %v6116_v33  ;;  %v1428_v30 = vld [vmem:[%s7143_s22 + $0xf28] sm:$0xff]  ;;  %v6161_v32 = vcombine.low %v1415_v17, %v1419_v19  ;;  %v6163_v33 = vcombine.low %v1416_v20, %v1420_v50  ;;  %v5702_v19 = vcombine.high %v953_v9, %v957_v11  ;;  %v961_v50 = vld [vmem:[%s7143_s22 + $0x90] sm:$0xff] }
 0x448   : > { %v6172_v35 = vcombine.high %v1424_v29, %v1428_v30 }
 0x44a   : > { %4149 = vmatpush1.bf16.msra.mxu0 %v6113_v3  ;;  %4313 = vmatpush1.bf16.msra.mxu1 %v6115_v39  ;;  %v1432_v3 = vld [vmem:[%s7143_s22 + $0xf48] sm:$0xff] }
 0x44b   : > { %4150 = vmatprep.subr.bf16.mxu0 %v6122_v41  ;;  %4314 = vmatprep.subr.bf16.mxu1 %v6124_v10  ;;  %v1436_v39 = vld [vmem:[%s7143_s22 + $0xf68] sm:$0xff]  ;;  %v6169_v41 = vcombine.low %v1423_v26, %v1427_v27  ;;  %v6171_v10 = vcombine.low %v1424_v29, %v1428_v30  ;;  %v969_v29 = vld [vmem:[%s7143_s22 + $0xd0] sm:$0xff] }
 0x44c   : > { %v6180_v44 = vcombine.high %v1432_v3, %v1436_v39  ;;  %v973_v30 = vld [vmem:[%s7143_s22 + $0xf0] sm:$0xff] }
 0x44e   : > { %4151 = vmatpush1.bf16.msra.mxu0 %v6121_v48  ;;  %4315 = vmatpush1.bf16.msra.mxu1 %v6123_v49  ;;  %v1440_v48 = vld [vmem:[%s7143_s22 + $0xf88] sm:$0xff] }
 0x44f   : > { %4152 = vmatprep.subr.bf16.mxu0 %v6130_v51  ;;  %4316 = vmatprep.subr.bf16.mxu1 %v6132_v52  ;;  %v1444_v49 = vld [vmem:[%s7143_s22 + $0xfa8] sm:$0xff]  ;;  %v6177_v51 = vcombine.low %v1431_v36, %v1435_v37  ;;  %v6179_v52 = vcombine.low %v1432_v3, %v1436_v39  ;;  %v5718_v36 = vcombine.high %v969_v29, %v973_v30  ;;  %v977_v3 = vld [vmem:[%s7143_s22 + $0x110] sm:$0xff] }
 0x450   : > { %v6188_v55 = vcombine.high %v1440_v48, %v1444_v49  ;;  %v981_v39 = vld [vmem:[%s7143_s22 + $0x130] sm:$0xff] }
 0x452   : > { %4153 = vmatpush1.bf16.msra.mxu0 %v6129_v58  ;;  %4317 = vmatpush1.bf16.msra.mxu1 %v6131_v59  ;;  %v1448_v58 = vld [vmem:[%s7143_s22 + $0xfc8] sm:$0xff] }
 0x453   : > { %4154 = vmatprep.subr.bf16.mxu0 %v6138_v61  ;;  %4318 = vmatprep.subr.bf16.mxu1 %v6140_v62  ;;  %v1452_v59 = vld [vmem:[%s7143_s22 + $0xfe8] sm:$0xff]  ;;  %v6185_v61 = vcombine.low %v1439_v45, %v1443_v47  ;;  %v6187_v62 = vcombine.low %v1440_v48, %v1444_v49  ;;  %v985_v47 = vld [vmem:[%s7143_s22 + $0x150] sm:$0xff]  ;;  %v986_v49 = vld [vmem:[%s7143_s22 + $0x158] sm:$0xff] }
 0x454   : > { %v6196_v0 = vcombine.high %v1448_v58, %v1452_v59  ;;  %v989_v48 = vld [vmem:[%s7143_s22 + $0x170] sm:$0xff] }
 0x456   : > { %4155 = vmatpush1.bf16.msra.mxu0 %v6137_v46  ;;  %4319 = vmatpush1.bf16.msra.mxu1 %v6139_v4  ;;  %v946_v46 = vld [vmem:[%s7143_s22 + $0x18] sm:$0xff] }
 0x457   : > { %4156 = vmatprep.subr.bf16.mxu0 %v6146_v5  ;;  %4320 = vmatprep.subr.bf16.mxu1 %v6148_v6  ;;  %v950_v4 = vld [vmem:[%s7143_s22 + $0x38] sm:$0xff]  ;;  %v6193_v5 = vcombine.low %v1447_v56, %v1451_v57  ;;  %v6195_v6 = vcombine.low %v1448_v58, %v1452_v59  ;;  %v993_v57 = vld [vmem:[%s7143_s22 + $0x190] sm:$0xff] }
 0x458   : > { %v5696_v8 = vcombine.high %v946_v46, %v950_v4  ;;  %v5695_v17 = vcombine.low %v946_v46, %v950_v4  ;;  %v997_v58 = vld [vmem:[%s7143_s22 + $0x1b0] sm:$0xff]  ;;  %v994_v59 = vld [vmem:[%s7143_s22 + $0x198] sm:$0xff] }
 0x459   : > { %v1005_v46 = vld [vmem:[%s7143_s22 + $0x1f0] sm:$0xff]  ;;  %v1002_v4 = vld [vmem:[%s7143_s22 + $0x1d8] sm:$0xff] }
 0x45a   : > { %4157 = vmatpush1.bf16.msra.mxu0 %v6145_v13  ;;  %4321 = vmatpush1.bf16.msra.mxu1 %v6147_v14  ;;  %v7602_v13 = vpack.c.bf16 %v7518_v42, %v7518_v42  ;;  %v954_v14 = vld [vmem:[%s7143_s22 + $0x58] sm:$0xff] }
 0x45b   : > { %4158 = vmatprep.subr.bf16.mxu0 %v6154_v15  ;;  %4322 = vmatprep.subr.bf16.mxu1 %v6156_v16  ;;  %v958_v15 = vld [vmem:[%s7143_s22 + $0x78] sm:$0xff]  ;;  %v5693_v16 = vcombine.low %v945_v1, %v949_v2  ;;  %v1001_v2 = vld [vmem:[%s7143_s22 + $0x1d0] sm:$0xff] }
 0x45c   : > { %v5704_v20 = vcombine.high %v954_v14, %v958_v15  ;;  %v962_v42 = vld [vmem:[%s7143_s22 + $0x98] sm:$0xff] }
 0x45e   : > { %4159 = vmatpush1.bf16.msra.mxu0 %v6153_v22  ;;  %4323 = vmatpush1.bf16.msra.mxu1 %v6155_v23  ;;  %v965_v22 = vld [vmem:[%s7143_s22 + $0xb0] sm:$0xff]  ;;  %v966_v23 = vld [vmem:[%s7143_s22 + $0xb8] sm:$0xff] }
 0x45f   : > { %4160 = vmatprep.subr.bf16.mxu0 %v6162_v24  ;;  %4324 = vmatprep.subr.bf16.mxu1 %v6164_v25  ;;  %v5701_v24 = vcombine.low %v953_v9, %v957_v11  ;;  %v5703_v25 = vcombine.low %v954_v14, %v958_v15  ;;  %v5710_v26 = vcombine.high %v961_v50, %v965_v22  ;;  %v1009_v11 = vld [vmem:[%s7143_s22 + $0x210] sm:$0xff]  ;;  %v1010_v15 = vld [vmem:[%s7143_s22 + $0x218] sm:$0xff] }
 0x460   : > { %v5712_v27 = vcombine.high %v962_v42, %v966_v23  ;;  %v1013_v14 = vld [vmem:[%s7143_s22 + $0x230] sm:$0xff] }
 0x462   : > { %4161 = vmatpush1.bf16.msra.mxu0 %v6161_v32  ;;  %4325 = vmatpush1.bf16.msra.mxu1 %v6163_v33  ;;  %v970_v32 = vld [vmem:[%s7143_s22 + $0xd8] sm:$0xff] }
 0x463   : > { %4162 = vmatprep.subr.bf16.mxu0 %v6170_v34  ;;  %4326 = vmatprep.subr.bf16.mxu1 %v6172_v35  ;;  %v974_v33 = vld [vmem:[%s7143_s22 + $0xf8] sm:$0xff]  ;;  %v5709_v34 = vcombine.low %v961_v50, %v965_v22  ;;  %v5711_v35 = vcombine.low %v962_v42, %v966_v23  ;;  %v1017_v22 = vld [vmem:[%s7143_s22 + $0x250] sm:$0xff] }
 0x464   : > { %v5720_v37 = vcombine.high %v970_v32, %v974_v33  ;;  %v1021_v42 = vld [vmem:[%s7143_s22 + $0x270] sm:$0xff]  ;;  %v1018_v23 = vld [vmem:[%s7143_s22 + $0x258] sm:$0xff] }
 0x466   : > { %4163 = vmatpush1.bf16.msra.mxu0 %v6169_v41  ;;  %4327 = vmatpush1.bf16.msra.mxu1 %v6171_v10  ;;  %v978_v41 = vld [vmem:[%s7143_s22 + $0x118] sm:$0xff] }
 0x467   : > { %4164 = vmatprep.subr.bf16.mxu0 %v6178_v43  ;;  %4328 = vmatprep.subr.bf16.mxu1 %v6180_v44  ;;  %v982_v10 = vld [vmem:[%s7143_s22 + $0x138] sm:$0xff]  ;;  %v5717_v43 = vcombine.low %v969_v29, %v973_v30  ;;  %v5726_v44 = vcombine.high %v977_v3, %v981_v39  ;;  %v1025_v30 = vld [vmem:[%s7143_s22 + $0x290] sm:$0xff] }
 0x468   : > { %v5728_v45 = vcombine.high %v978_v41, %v982_v10 }
 0x46a   : > { %4165 = vmatpush1.bf16.msra.mxu0 %v6177_v51  ;;  %4329 = vmatpush1.bf16.msra.mxu1 %v6179_v52  ;;  %v990_v51 = vld [vmem:[%s7143_s22 + $0x178] sm:$0xff]  ;;  %v5725_v52 = vcombine.low %v977_v3, %v981_v39  ;;  %v1033_v39 = vld [vmem:[%s7143_s22 + $0x2d0] sm:$0xff] }
 0x46b   : > { %4166 = vmatprep.subr.bf16.mxu0 %v6186_v54  ;;  %4330 = vmatprep.subr.bf16.mxu1 %v6188_v55  ;;  %v5727_v54 = vcombine.low %v978_v41, %v982_v10  ;;  %v5734_v55 = vcombine.high %v985_v47, %v989_v48  ;;  %v5736_v56 = vcombine.high %v986_v49, %v990_v51  ;;  %v1037_v41 = vld [vmem:[%s7143_s22 + $0x2f0] sm:$0xff]  ;;  %v1034_v10 = vld [vmem:[%s7143_s22 + $0x2d8] sm:$0xff] }
 0x46e   : > { %4167 = vmatpush1.bf16.msra.mxu0 %v6185_v61  ;;  %4331 = vmatpush1.bf16.msra.mxu1 %v6187_v62  ;;  %v998_v61 = vld [vmem:[%s7143_s22 + $0x1b8] sm:$0xff]  ;;  %v5733_v62 = vcombine.low %v985_v47, %v989_v48  ;;  %v1041_v48 = vld [vmem:[%s7143_s22 + $0x310] sm:$0xff] }
 0x46f   : > { %4168 = vmatprep.subr.bf16.mxu0 %v6194_v18  ;;  %4332 = vmatprep.subr.bf16.mxu1 %v6196_v0  ;;  %v5735_v18 = vcombine.low %v986_v49, %v990_v51  ;;  %v5742_v0 = vcombine.high %v993_v57, %v997_v58  ;;  %v5744_v1 = vcombine.high %v994_v59, %v998_v61  ;;  %v1045_v49 = vld [vmem:[%s7143_s22 + $0x330] sm:$0xff]  ;;  %v1042_v51 = vld [vmem:[%s7143_s22 + $0x318] sm:$0xff] }
 0x472   : > { %4169 = vmatpush1.bf16.msra.mxu0 %v6193_v5  ;;  %4333 = vmatpush1.bf16.msra.mxu1 %v6195_v6  ;;  %v1006_v5 = vld [vmem:[%s7143_s22 + $0x1f8] sm:$0xff]  ;;  %v5741_v6 = vcombine.low %v993_v57, %v997_v58  ;;  %v1049_v58 = vld [vmem:[%s7143_s22 + $0x350] sm:$0xff] }
 0x473   : > { %4343 = vmatprep.subr.bf16.mxu0 %v5694_v7  ;;  %4507 = vmatprep.subr.bf16.mxu1 %v5696_v8  ;;  %v5743_v7 = vcombine.low %v994_v59, %v998_v61  ;;  %v5750_v8 = vcombine.high %v1001_v2, %v1005_v46  ;;  %v5752_v9 = vcombine.high %v1002_v4, %v1006_v5  ;;  %v1053_v59 = vld [vmem:[%s7143_s22 + $0x370] sm:$0xff]  ;;  %v1050_v61 = vld [vmem:[%s7143_s22 + $0x358] sm:$0xff] }
 0x475   : > { %4171 = vmatmul.mubr.bf16.vlgmr.msra.gmra.mrb[0].mxu0 %v7602_v13  ;;  %4335 = vmatmul.mubr.bf16.vlgmr.msra.gmra.mrb[0].mxu1 %v7602_v13 }
 0x476   : > { %4344 = vmatpush1.bf16.msra.mxu0 %v5693_v16  ;;  %4508 = vmatpush1.bf16.msra.mxu1 %v5695_v17  ;;  %v1014_v16 = vld [vmem:[%s7143_s22 + $0x238] sm:$0xff]  ;;  %v5749_v17 = vcombine.low %v1001_v2, %v1005_v46  ;;  %v1057_v46 = vld [vmem:[%s7143_s22 + $0x390] sm:$0xff] }
 0x477   : > { %4345 = vmatprep.subr.bf16.mxu0 %v5702_v19  ;;  %4509 = vmatprep.subr.bf16.mxu1 %v5704_v20  ;;  %v5751_v19 = vcombine.low %v1002_v4, %v1006_v5  ;;  %v5758_v20 = vcombine.high %v1009_v11, %v1013_v14  ;;  %v5760_v50 = vcombine.high %v1010_v15, %v1014_v16  ;;  %v1061_v4 = vld [vmem:[%s7143_s22 + $0x3b0] sm:$0xff]  ;;  %v1058_v5 = vld [vmem:[%s7143_s22 + $0x398] sm:$0xff] }
 0x478   : > { %4375 = vmatprep.mubr.bf16.mxu0 %v7315_v60  ;;  %4539 = vmatprep.mubr.bf16.mxu1 %v7315_v60  ;;  %v5719_v60 = vcombine.low %v970_v32, %v974_v33  ;;  %v1029_v32 = vld [vmem:[%s7143_s22 + $0x2b0] sm:$0xff]  ;;  %v1026_v33 = vld [vmem:[%s7143_s22 + $0x298] sm:$0xff] }
 0x47a   : > { %4346 = vmatpush1.bf16.msra.mxu0 %v5701_v24  ;;  %4510 = vmatpush1.bf16.msra.mxu1 %v5703_v25  ;;  %v1022_v24 = vld [vmem:[%s7143_s22 + $0x278] sm:$0xff]  ;;  %v5757_v25 = vcombine.low %v1009_v11, %v1013_v14  ;;  %v1065_v14 = vld [vmem:[%s7143_s22 + $0x3d0] sm:$0xff] }
 0x47b   : > { %4347 = vmatprep.subr.bf16.mxu0 %v5710_v26  ;;  %4511 = vmatprep.subr.bf16.mxu1 %v5712_v27  ;;  %v5759_v26 = vcombine.low %v1010_v15, %v1014_v16  ;;  %v5766_v27 = vcombine.high %v1017_v22, %v1021_v42  ;;  %v5768_v29 = vcombine.high %v1018_v23, %v1022_v24  ;;  %v1069_v15 = vld [vmem:[%s7143_s22 + $0x3f0] sm:$0xff]  ;;  %v1066_v16 = vld [vmem:[%s7143_s22 + $0x3d8] sm:$0xff] }
 0x47e   : > { %4348 = vmatpush1.bf16.msra.mxu0 %v5709_v34  ;;  %4512 = vmatpush1.bf16.msra.mxu1 %v5711_v35  ;;  %v1030_v34 = vld [vmem:[%s7143_s22 + $0x2b8] sm:$0xff]  ;;  %v5765_v35 = vcombine.low %v1017_v22, %v1021_v42  ;;  %v1073_v42 = vld [vmem:[%s7143_s22 + $0x410] sm:$0xff] }
 0x47f   : > { %4349 = vmatprep.subr.bf16.mxu0 %v5718_v36  ;;  %4513 = vmatprep.subr.bf16.mxu1 %v5720_v37  ;;  %v5767_v36 = vcombine.low %v1018_v23, %v1022_v24  ;;  %v5774_v37 = vcombine.high %v1025_v30, %v1029_v32  ;;  %v5776_v3 = vcombine.high %v1026_v33, %v1030_v34  ;;  %v1077_v23 = vld [vmem:[%s7143_s22 + $0x430] sm:$0xff]  ;;  %v1074_v24 = vld [vmem:[%s7143_s22 + $0x418] sm:$0xff] }
 0x482   : > { %4350 = vmatpush1.bf16.msra.mxu0 %v5717_v43  ;;  %4514 = vmatpush1.bf16.msra.mxu1 %v5719_v60  ;;  %v1038_v43 = vld [vmem:[%s7143_s22 + $0x2f8] sm:$0xff]  ;;  %v5773_v60 = vcombine.low %v1025_v30, %v1029_v32  ;;  %v1081_v32 = vld [vmem:[%s7143_s22 + $0x450] sm:$0xff] }
 0x483   : > { %4351 = vmatprep.subr.bf16.mxu0 %v5726_v44  ;;  %4515 = vmatprep.subr.bf16.mxu1 %v5728_v45  ;;  %v5775_v44 = vcombine.low %v1026_v33, %v1030_v34  ;;  %v5782_v45 = vcombine.high %v1033_v39, %v1037_v41  ;;  %v5784_v47 = vcombine.high %v1034_v10, %v1038_v43  ;;  %v1085_v33 = vld [vmem:[%s7143_s22 + $0x470] sm:$0xff]  ;;  %v1082_v34 = vld [vmem:[%s7143_s22 + $0x458] sm:$0xff] }
 0x486   : > { %4352 = vmatpush1.bf16.msra.mxu0 %v5725_v52  ;;  %4516 = vmatpush1.bf16.msra.mxu1 %v5727_v54  ;;  %v1046_v52 = vld [vmem:[%s7143_s22 + $0x338] sm:$0xff]  ;;  %v5781_v54 = vcombine.low %v1033_v39, %v1037_v41  ;;  %v1089_v41 = vld [vmem:[%s7143_s22 + $0x490] sm:$0xff] }
 0x487   : > { %4353 = vmatprep.subr.bf16.mxu0 %v5734_v55  ;;  %4517 = vmatprep.subr.bf16.mxu1 %v5736_v56  ;;  %v5783_v55 = vcombine.low %v1034_v10, %v1038_v43  ;;  %v5790_v56 = vcombine.high %v1041_v48, %v1045_v49  ;;  %v5792_v57 = vcombine.high %v1042_v51, %v1046_v52  ;;  %v1093_v10 = vld [vmem:[%s7143_s22 + $0x4b0] sm:$0xff]  ;;  %v1090_v43 = vld [vmem:[%s7143_s22 + $0x498] sm:$0xff] }
 0x48a   : > { %4354 = vmatpush1.bf16.msra.mxu0 %v5733_v62  ;;  %4518 = vmatpush1.bf16.msra.mxu1 %v5735_v18  ;;  %v1054_v62 = vld [vmem:[%s7143_s22 + $0x378] sm:$0xff]  ;;  %v5789_v18 = vcombine.low %v1041_v48, %v1045_v49  ;;  %v1097_v49 = vld [vmem:[%s7143_s22 + $0x4d0] sm:$0xff] }
 0x48b   : > { %4355 = vmatprep.subr.bf16.mxu0 %v5742_v0  ;;  %4519 = vmatprep.subr.bf16.mxu1 %v5744_v1  ;;  %v5791_v0 = vcombine.low %v1042_v51, %v1046_v52  ;;  %v5798_v1 = vcombine.high %v1049_v58, %v1053_v59  ;;  %v5800_v2 = vcombine.high %v1050_v61, %v1054_v62  ;;  %v1101_v51 = vld [vmem:[%s7143_s22 + $0x4f0] sm:$0xff]  ;;  %v1098_v52 = vld [vmem:[%s7143_s22 + $0x4d8] sm:$0xff] }
 0x48e   : > { %4356 = vmatpush1.bf16.msra.mxu0 %v5741_v6  ;;  %4520 = vmatpush1.bf16.msra.mxu1 %v5743_v7  ;;  %v1062_v6 = vld [vmem:[%s7143_s22 + $0x3b8] sm:$0xff]  ;;  %v5797_v7 = vcombine.low %v1049_v58, %v1053_v59  ;;  %v1105_v58 = vld [vmem:[%s7143_s22 + $0x510] sm:$0xff] }
 0x48f   : > { %4357 = vmatprep.subr.bf16.mxu0 %v5750_v8  ;;  %4521 = vmatprep.subr.bf16.mxu1 %v5752_v9  ;;  %v5799_v8 = vcombine.low %v1050_v61, %v1054_v62  ;;  %v5806_v9 = vcombine.high %v1057_v46, %v1061_v4  ;;  %v5808_v11 = vcombine.high %v1058_v5, %v1062_v6  ;;  %v1109_v59 = vld [vmem:[%s7143_s22 + $0x530] sm:$0xff]  ;;  %v1106_v61 = vld [vmem:[%s7143_s22 + $0x518] sm:$0xff] }
 0x490   : > { %v1110_v62 = vld [vmem:[%s7143_s22 + $0x538] sm:$0xff] }
 0x492   : > { %4358 = vmatpush1.bf16.msra.mxu0 %v5749_v17  ;;  %4522 = vmatpush1.bf16.msra.mxu1 %v5751_v19  ;;  %v1070_v17 = vld [vmem:[%s7143_s22 + $0x3f8] sm:$0xff]  ;;  %v5805_v19 = vcombine.low %v1057_v46, %v1061_v4  ;;  %v1117_v46 = vld [vmem:[%s7143_s22 + $0x570] sm:$0xff] }
 0x493   : > { %4359 = vmatprep.subr.bf16.mxu0 %v5758_v20  ;;  %4523 = vmatprep.subr.bf16.mxu1 %v5760_v50  ;;  %v5807_v20 = vcombine.low %v1058_v5, %v1062_v6  ;;  %v5814_v50 = vcombine.high %v1065_v14, %v1069_v15  ;;  %v5816_v22 = vcombine.high %v1066_v16, %v1070_v17  ;;  %v1114_v4 = vld [vmem:[%s7143_s22 + $0x558] sm:$0xff] }
 0x494   : > { %v1118_v5 = vld [vmem:[%s7143_s22 + $0x578] sm:$0xff]  ;;  %v5853_v6 = vcombine.low %v1105_v58, %v1109_v59 }
 0x496   : > { %4360 = vmatpush1.bf16.msra.mxu0 %v5757_v25  ;;  %4524 = vmatpush1.bf16.msra.mxu1 %v5759_v26  ;;  %v1078_v25 = vld [vmem:[%s7143_s22 + $0x438] sm:$0xff]  ;;  %v5813_v26 = vcombine.low %v1065_v14, %v1069_v15  ;;  %v1125_v14 = vld [vmem:[%s7143_s22 + $0x5b0] sm:$0xff] }
 0x497   : > { %4361 = vmatprep.subr.bf16.mxu0 %v5766_v27  ;;  %4525 = vmatprep.subr.bf16.mxu1 %v5768_v29  ;;  %v5815_v27 = vcombine.low %v1066_v16, %v1070_v17  ;;  %v5822_v29 = vcombine.high %v1073_v42, %v1077_v23  ;;  %v5824_v30 = vcombine.high %v1074_v24, %v1078_v25  ;;  %v1122_v15 = vld [vmem:[%s7143_s22 + $0x598] sm:$0xff] }
 0x498   : > { %v1126_v16 = vld [vmem:[%s7143_s22 + $0x5b8] sm:$0xff] }
 0x49a   : > { %4362 = vmatpush1.bf16.msra.mxu0 %v5765_v35  ;;  %4526 = vmatpush1.bf16.msra.mxu1 %v5767_v36  ;;  %v1086_v35 = vld [vmem:[%s7143_s22 + $0x478] sm:$0xff]  ;;  %v5821_v36 = vcombine.low %v1073_v42, %v1077_v23  ;;  %v1133_v42 = vld [vmem:[%s7143_s22 + $0x5f0] sm:$0xff] }
 0x49b   : > { %4363 = vmatprep.subr.bf16.mxu0 %v5774_v37  ;;  %4527 = vmatprep.subr.bf16.mxu1 %v5776_v3  ;;  %v5823_v37 = vcombine.low %v1074_v24, %v1078_v25  ;;  %v5830_v3 = vcombine.high %v1081_v32, %v1085_v33  ;;  %v5832_v39 = vcombine.high %v1082_v34, %v1086_v35  ;;  %v1130_v23 = vld [vmem:[%s7143_s22 + $0x5d8] sm:$0xff] }
 0x49c   : > { %v1134_v24 = vld [vmem:[%s7143_s22 + $0x5f8] sm:$0xff] }
 0x49e   : > { %4364 = vmatpush1.bf16.msra.mxu0 %v5773_v60  ;;  %4528 = vmatpush1.bf16.msra.mxu1 %v5775_v44  ;;  %v1094_v60 = vld [vmem:[%s7143_s22 + $0x4b8] sm:$0xff]  ;;  %v5829_v44 = vcombine.low %v1081_v32, %v1085_v33  ;;  %v1141_v32 = vld [vmem:[%s7143_s22 + $0x630] sm:$0xff] }
 0x49f   : > { %4365 = vmatprep.subr.bf16.mxu0 %v5782_v45  ;;  %4529 = vmatprep.subr.bf16.mxu1 %v5784_v47  ;;  %v5831_v45 = vcombine.low %v1082_v34, %v1086_v35  ;;  %v5838_v47 = vcombine.high %v1089_v41, %v1093_v10  ;;  %v5840_v48 = vcombine.high %v1090_v43, %v1094_v60  ;;  %v1138_v33 = vld [vmem:[%s7143_s22 + $0x618] sm:$0xff] }
 0x4a0   : > { %v1142_v34 = vld [vmem:[%s7143_s22 + $0x638] sm:$0xff] }
 0x4a2   : > { %4366 = vmatpush1.bf16.msra.mxu0 %v5781_v54  ;;  %4530 = vmatpush1.bf16.msra.mxu1 %v5783_v55  ;;  %v1102_v54 = vld [vmem:[%s7143_s22 + $0x4f8] sm:$0xff]  ;;  %v5839_v55 = vcombine.low %v1090_v43, %v1094_v60 }
 0x4a3   : > { %4367 = vmatprep.subr.bf16.mxu0 %v5790_v56  ;;  %4531 = vmatprep.subr.bf16.mxu1 %v5792_v57  ;;  %v5846_v56 = vcombine.high %v1097_v49, %v1101_v51  ;;  %v5848_v57 = vcombine.high %v1098_v52, %v1102_v54  ;;  %v1150_v43 = vld [vmem:[%s7143_s22 + $0x678] sm:$0xff] }
 0x4a6   : > { %4368 = vmatpush1.bf16.msra.mxu0 %v5789_v18  ;;  %4532 = vmatpush1.bf16.msra.mxu1 %v5791_v0  ;;  %v5845_v18 = vcombine.low %v1097_v49, %v1101_v51  ;;  %v5854_v0 = vcombine.high %v1105_v58, %v1109_v59  ;;  %v1157_v49 = vld [vmem:[%s7143_s22 + $0x6b0] sm:$0xff]  ;;  %v1154_v51 = vld [vmem:[%s7143_s22 + $0x698] sm:$0xff] }
 0x4a7   : > { %4369 = vmatprep.subr.bf16.mxu0 %v5798_v1  ;;  %4533 = vmatprep.subr.bf16.mxu1 %v5800_v2  ;;  %v5856_v1 = vcombine.high %v1106_v61, %v1110_v62  ;;  %v1113_v2 = vld [vmem:[%s7143_s22 + $0x550] sm:$0xff]  ;;  %v1162_v59 = vld [vmem:[%s7143_s22 + $0x6d8] sm:$0xff] }
 0x4a8   : > { %v5861_v17 = vcombine.low %v1113_v2, %v1117_v46  ;;  %v1165_v58 = vld [vmem:[%s7143_s22 + $0x6f0] sm:$0xff] }
 0x4aa   : > { %4370 = vmatpush1.bf16.msra.mxu0 %v5797_v7  ;;  %4534 = vmatpush1.bf16.msra.mxu1 %v5799_v8  ;;  %v5855_v7 = vcombine.low %v1106_v61, %v1110_v62  ;;  %v5862_v8 = vcombine.high %v1113_v2, %v1117_v46  ;;  %v1166_v61 = vld [vmem:[%s7143_s22 + $0x6f8] sm:$0xff]  ;;  %v1173_v2 = vld [vmem:[%s7143_s22 + $0x730] sm:$0xff] }
 0x4ab   : > { %4371 = vmatprep.subr.bf16.mxu0 %v5806_v9  ;;  %4535 = vmatprep.subr.bf16.mxu1 %v5808_v11  ;;  %v5864_v9 = vcombine.high %v1114_v4, %v1118_v5  ;;  %v1121_v11 = vld [vmem:[%s7143_s22 + $0x590] sm:$0xff]  ;;  %v1170_v46 = vld [vmem:[%s7143_s22 + $0x718] sm:$0xff] }
 0x4ac   : > { %v5869_v25 = vcombine.low %v1121_v11, %v1125_v14 }
 0x4ae   : > { %4372 = vmatpush1.bf16.msra.mxu0 %v5805_v19  ;;  %4536 = vmatpush1.bf16.msra.mxu1 %v5807_v20  ;;  %v5863_v19 = vcombine.low %v1114_v4, %v1118_v5  ;;  %v5870_v20 = vcombine.high %v1121_v11, %v1125_v14  ;;  %v1174_v4 = vld [vmem:[%s7143_s22 + $0x738] sm:$0xff]  ;;  %v1181_v11 = vld [vmem:[%s7143_s22 + $0x770] sm:$0xff] }
 0x4af   : > { %4373 = vmatprep.subr.bf16.mxu0 %v5814_v50  ;;  %4537 = vmatprep.subr.bf16.mxu1 %v5816_v22  ;;  %v5872_v50 = vcombine.high %v1122_v15, %v1126_v16  ;;  %v1129_v22 = vld [vmem:[%s7143_s22 + $0x5d0] sm:$0xff]  ;;  %v1178_v14 = vld [vmem:[%s7143_s22 + $0x758] sm:$0xff] }
 0x4b0   : > { %v5877_v35 = vcombine.low %v1129_v22, %v1133_v42 }
 0x4b2   : > { %4374 = vmatpush1.bf16.msra.mxu0 %v5813_v26  ;;  %4538 = vmatpush1.bf16.msra.mxu1 %v5815_v27  ;;  %v5871_v26 = vcombine.low %v1122_v15, %v1126_v16  ;;  %v5878_v27 = vcombine.high %v1129_v22, %v1133_v42  ;;  %v1182_v15 = vld [vmem:[%s7143_s22 + $0x778] sm:$0xff]  ;;  %v1189_v22 = vld [vmem:[%s7143_s22 + $0x7b0] sm:$0xff] }
 0x4b3   : > { %4384 = vmatprep.subr.bf16.mxu0 %v5822_v29  ;;  %4548 = vmatprep.subr.bf16.mxu1 %v5824_v30  ;;  %v5880_v29 = vcombine.high %v1130_v23, %v1134_v24  ;;  %v1137_v30 = vld [vmem:[%s7143_s22 + $0x610] sm:$0xff]  ;;  %v1186_v42 = vld [vmem:[%s7143_s22 + $0x798] sm:$0xff] }
 0x4b4   : > { %v5885_v60 = vcombine.low %v1137_v30, %v1141_v32 }
 0x4b5   : > { %4376 = vmatmul.mubr.bf16.vlgmr.msra.gmra.mrb[4].mxu0 %v7364_v12  ;;  %4540 = vmatmul.mubr.bf16.vlgmr.msra.gmra.mrb[4].mxu1 %v7364_v12  ;;  %v5837_v12 = vcombine.low %v1089_v41, %v1093_v10  ;;  %v1149_v41 = vld [vmem:[%s7143_s22 + $0x670] sm:$0xff]  ;;  %v1146_v10 = vld [vmem:[%s7143_s22 + $0x658] sm:$0xff] }
 0x4b6   : > { %4385 = vmatpush1.bf16.msra.mxu0 %v5821_v36  ;;  %4549 = vmatpush1.bf16.msra.mxu1 %v5823_v37  ;;  %v5879_v36 = vcombine.low %v1130_v23, %v1134_v24  ;;  %v5886_v37 = vcombine.high %v1137_v30, %v1141_v32  ;;  %v1190_v23 = vld [vmem:[%s7143_s22 + $0x7b8] sm:$0xff]  ;;  %v1197_v30 = vld [vmem:[%s7143_s22 + $0x7f0] sm:$0xff] }
 0x4b7   : > { %4386 = vmatprep.subr.bf16.mxu0 %v5830_v3  ;;  %4550 = vmatprep.subr.bf16.mxu1 %v5832_v39  ;;  %v5888_v3 = vcombine.high %v1138_v33, %v1142_v34  ;;  %v1145_v39 = vld [vmem:[%s7143_s22 + $0x650] sm:$0xff]  ;;  %v1194_v32 = vld [vmem:[%s7143_s22 + $0x7d8] sm:$0xff] }
 0x4b8   : > { %4416 = vmatprep.mubr.bf16.mxu0 %v7370_v21  ;;  %4580 = vmatprep.mubr.bf16.mxu1 %v7370_v21  ;;  %v5847_v21 = vcombine.low %v1098_v52, %v1102_v54  ;;  %v1158_v52 = vld [vmem:[%s7143_s22 + $0x6b8] sm:$0xff]  ;;  %v5893_v54 = vcombine.low %v1145_v39, %v1149_v41 }
 0x4ba   : > { %4387 = vmatpush1.bf16.msra.mxu0 %v5829_v44  ;;  %4551 = vmatpush1.bf16.msra.mxu1 %v5831_v45  ;;  %v5887_v44 = vcombine.low %v1138_v33, %v1142_v34  ;;  %v5894_v45 = vcombine.high %v1145_v39, %v1149_v41  ;;  %v1198_v33 = vld [vmem:[%s7143_s22 + $0x7f8] sm:$0xff]  ;;  %v1205_v39 = vld [vmem:[%s7143_s22 + $0x830] sm:$0xff] }
 0x4bb   : > { %4388 = vmatprep.subr.bf16.mxu0 %v5838_v47  ;;  %4552 = vmatprep.subr.bf16.mxu1 %v5840_v48  ;;  %v5896_v47 = vcombine.high %v1146_v10, %v1150_v43  ;;  %v1153_v48 = vld [vmem:[%s7143_s22 + $0x690] sm:$0xff]  ;;  %v1202_v41 = vld [vmem:[%s7143_s22 + $0x818] sm:$0xff] }
 0x4bc   : > { %v5901_v62 = vcombine.low %v1153_v48, %v1157_v49 }
 0x4be   : > { %4389 = vmatpush1.bf16.msra.mxu0 %v5837_v12  ;;  %4553 = vmatpush1.bf16.msra.mxu1 %v5839_v55  ;;  %v5895_v12 = vcombine.low %v1146_v10, %v1150_v43  ;;  %v5902_v55 = vcombine.high %v1153_v48, %v1157_v49  ;;  %v1206_v10 = vld [vmem:[%s7143_s22 + $0x838] sm:$0xff]  ;;  %v1213_v48 = vld [vmem:[%s7143_s22 + $0x870] sm:$0xff] }
 0x4bf   : > { %4390 = vmatprep.subr.bf16.mxu0 %v5846_v56  ;;  %4554 = vmatprep.subr.bf16.mxu1 %v5848_v57  ;;  %v5904_v56 = vcombine.high %v1154_v51, %v1158_v52  ;;  %v1161_v57 = vld [vmem:[%s7143_s22 + $0x6d0] sm:$0xff]  ;;  %v1210_v49 = vld [vmem:[%s7143_s22 + $0x858] sm:$0xff] }
 0x4c0   : > { %v5909_v5 = vcombine.low %v1161_v57, %v1165_v58 }
 0x4c2   : > { %4391 = vmatpush1.bf16.msra.mxu0 %v5845_v18  ;;  %4555 = vmatpush1.bf16.msra.mxu1 %v5847_v21  ;;  %v5903_v18 = vcombine.low %v1154_v51, %v1158_v52  ;;  %v5910_v21 = vcombine.high %v1161_v57, %v1165_v58  ;;  %v1214_v51 = vld [vmem:[%s7143_s22 + $0x878] sm:$0xff]  ;;  %v1221_v57 = vld [vmem:[%s7143_s22 + $0x8b0] sm:$0xff] }
 0x4c3   : > { %4392 = vmatprep.subr.bf16.mxu0 %v5854_v0  ;;  %4556 = vmatprep.subr.bf16.mxu1 %v5856_v1  ;;  %v5912_v0 = vcombine.high %v1162_v59, %v1166_v61  ;;  %v1169_v1 = vld [vmem:[%s7143_s22 + $0x710] sm:$0xff]  ;;  %v1218_v58 = vld [vmem:[%s7143_s22 + $0x898] sm:$0xff] }
 0x4c4   : > { %v5917_v16 = vcombine.low %v1169_v1, %v1173_v2 }
 0x4c6   : > { %4393 = vmatpush1.bf16.msra.mxu0 %v5853_v6  ;;  %4557 = vmatpush1.bf16.msra.mxu1 %v5855_v7  ;;  %v5911_v6 = vcombine.low %v1162_v59, %v1166_v61  ;;  %v5918_v7 = vcombine.high %v1169_v1, %v1173_v2  ;;  %v1222_v59 = vld [vmem:[%s7143_s22 + $0x8b8] sm:$0xff]  ;;  %v1229_v1 = vld [vmem:[%s7143_s22 + $0x8f0] sm:$0xff] }
 0x4c7   : > { %4394 = vmatprep.subr.bf16.mxu0 %v5862_v8  ;;  %4558 = vmatprep.subr.bf16.mxu1 %v5864_v9  ;;  %v5920_v8 = vcombine.high %v1170_v46, %v1174_v4  ;;  %v1177_v9 = vld [vmem:[%s7143_s22 + $0x750] sm:$0xff]  ;;  %v1226_v2 = vld [vmem:[%s7143_s22 + $0x8d8] sm:$0xff] }
 0x4c8   : > { %v5925_v24 = vcombine.low %v1177_v9, %v1181_v11 }
 0x4ca   : > { %4395 = vmatpush1.bf16.msra.mxu0 %v5861_v17  ;;  %4559 = vmatpush1.bf16.msra.mxu1 %v5863_v19  ;;  %v5919_v17 = vcombine.low %v1170_v46, %v1174_v4  ;;  %v5926_v19 = vcombine.high %v1177_v9, %v1181_v11  ;;  %v1230_v46 = vld [vmem:[%s7143_s22 + $0x8f8] sm:$0xff]  ;;  %v5967_v4 = vcombine.low %v1218_v58, %v1222_v59 }
 0x4cb   : > { %4396 = vmatprep.subr.bf16.mxu0 %v5870_v20  ;;  %4560 = vmatprep.subr.bf16.mxu1 %v5872_v50  ;;  %v5928_v20 = vcombine.high %v1178_v14, %v1182_v15  ;;  %v1185_v50 = vld [vmem:[%s7143_s22 + $0x790] sm:$0xff]  ;;  %v1234_v9 = vld [vmem:[%s7143_s22 + $0x918] sm:$0xff] }
 0x4cc   : > { %v5933_v34 = vcombine.low %v1185_v50, %v1189_v22  ;;  %v1238_v11 = vld [vmem:[%s7143_s22 + $0x938] sm:$0xff] }
 0x4ce   : > { %4397 = vmatpush1.bf16.msra.mxu0 %v5869_v25  ;;  %4561 = vmatpush1.bf16.msra.mxu1 %v5871_v26  ;;  %v5927_v25 = vcombine.low %v1178_v14, %v1182_v15  ;;  %v5934_v26 = vcombine.high %v1185_v50, %v1189_v22  ;;  %v1246_v50 = vld [vmem:[%s7143_s22 + $0x978] sm:$0xff] }
 0x4cf   : > { %4398 = vmatprep.subr.bf16.mxu0 %v5878_v27  ;;  %4562 = vmatprep.subr.bf16.mxu1 %v5880_v29  ;;  %v5936_v27 = vcombine.high %v1186_v42, %v1190_v23  ;;  %v1193_v29 = vld [vmem:[%s7143_s22 + $0x7d0] sm:$0xff] }
 0x4d0   : > { %v5941_v43 = vcombine.low %v1193_v29, %v1197_v30 }
 0x4d2   : > { %4399 = vmatpush1.bf16.msra.mxu0 %v5877_v35  ;;  %4563 = vmatpush1.bf16.msra.mxu1 %v5879_v36  ;;  %v5935_v35 = vcombine.low %v1186_v42, %v1190_v23  ;;  %v5942_v36 = vcombine.high %v1193_v29, %v1197_v30  ;;  %v5983_v42 = vcombine.low %v1234_v9, %v1238_v11  ;;  %v1254_v29 = vld [vmem:[%s7143_s22 + $0x9b8] sm:$0xff] }
 0x4d3   : > { %4400 = vmatprep.subr.bf16.mxu0 %v5886_v37  ;;  %4564 = vmatprep.subr.bf16.mxu1 %v5888_v3  ;;  %v5944_v37 = vcombine.high %v1194_v32, %v1198_v33  ;;  %v1201_v3 = vld [vmem:[%s7143_s22 + $0x810] sm:$0xff] }
 0x4d4   : > { %v5949_v52 = vcombine.low %v1201_v3, %v1205_v39 }
 0x4d6   : > { %4401 = vmatpush1.bf16.msra.mxu0 %v5885_v60  ;;  %4565 = vmatpush1.bf16.msra.mxu1 %v5887_v44  ;;  %v5943_v60 = vcombine.low %v1194_v32, %v1198_v33  ;;  %v5950_v44 = vcombine.high %v1201_v3, %v1205_v39  ;;  %v1262_v3 = vld [vmem:[%s7143_s22 + $0x9f8] sm:$0xff] }
 0x4d7   : > { %4402 = vmatprep.subr.bf16.mxu0 %v5894_v45  ;;  %4566 = vmatprep.subr.bf16.mxu1 %v5896_v47  ;;  %v5952_v45 = vcombine.high %v1202_v41, %v1206_v10  ;;  %v1209_v47 = vld [vmem:[%s7143_s22 + $0x850] sm:$0xff] }
 0x4d8   : > { %v5957_v61 = vcombine.low %v1209_v47, %v1213_v48 }
 0x4da   : > { %4403 = vmatpush1.bf16.msra.mxu0 %v5893_v54  ;;  %4567 = vmatpush1.bf16.msra.mxu1 %v5895_v12  ;;  %v5951_v54 = vcombine.low %v1202_v41, %v1206_v10  ;;  %v5958_v12 = vcombine.high %v1209_v47, %v1213_v48  ;;  %v1270_v47 = vld [vmem:[%s7143_s22 + $0xa38] sm:$0xff] }
 0x4db   : > { %4404 = vmatprep.subr.bf16.mxu0 %v5902_v55  ;;  %4568 = vmatprep.subr.bf16.mxu1 %v5904_v56  ;;  %v5960_v55 = vcombine.high %v1210_v49, %v1214_v51  ;;  %v1217_v56 = vld [vmem:[%s7143_s22 + $0x890] sm:$0xff] }
 0x4de   : > { %4405 = vmatpush1.bf16.msra.mxu0 %v5901_v62  ;;  %4569 = vmatpush1.bf16.msra.mxu1 %v5903_v18  ;;  %v5959_v62 = vcombine.low %v1210_v49, %v1214_v51  ;;  %v5966_v18 = vcombine.high %v1217_v56, %v1221_v57 }
 0x4df   : > { %4406 = vmatprep.subr.bf16.mxu0 %v5910_v21  ;;  %4570 = vmatprep.subr.bf16.mxu1 %v5912_v0  ;;  %v5968_v21 = vcombine.high %v1218_v58, %v1222_v59  ;;  %v1225_v0 = vld [vmem:[%s7143_s22 + $0x8d0] sm:$0xff] }
 0x4e0   : > { %v5973_v14 = vcombine.low %v1225_v0, %v1229_v1 }
 0x4e2   : > { %4407 = vmatpush1.bf16.msra.mxu0 %v5909_v5  ;;  %4571 = vmatpush1.bf16.msra.mxu1 %v5911_v6  ;;  %v5974_v5 = vcombine.high %v1225_v0, %v1229_v1  ;;  %v5976_v6 = vcombine.high %v1226_v2, %v1230_v46  ;;  %v1286_v0 = vld [vmem:[%s7143_s22 + $0xab8] sm:$0xff] }
 0x4e3   : > { %4408 = vmatprep.subr.bf16.mxu0 %v5918_v7  ;;  %4572 = vmatprep.subr.bf16.mxu1 %v5920_v8  ;;  %v1233_v7 = vld [vmem:[%s7143_s22 + $0x910] sm:$0xff] }
 0x4e4   : > { %v1237_v8 = vld [vmem:[%s7143_s22 + $0x930] sm:$0xff] }
 0x4e5   : > { %v5982_v15 = vcombine.high %v1233_v7, %v1237_v8  ;;  %v5981_v22 = vcombine.low %v1233_v7, %v1237_v8  ;;  %v1294_v7 = vld [vmem:[%s7143_s22 + $0xaf8] sm:$0xff] }
 0x4e6   : > { %4409 = vmatpush1.bf16.msra.mxu0 %v5917_v16  ;;  %4573 = vmatpush1.bf16.msra.mxu1 %v5919_v17  ;;  %v5984_v16 = vcombine.high %v1234_v9, %v1238_v11  ;;  %v1241_v17 = vld [vmem:[%s7143_s22 + $0x950] sm:$0xff] }
 0x4e7   : > { %4410 = vmatprep.subr.bf16.mxu0 %v5926_v19  ;;  %4574 = vmatprep.subr.bf16.mxu1 %v5928_v20  ;;  %v1245_v19 = vld [vmem:[%s7143_s22 + $0x970] sm:$0xff]  ;;  %v1242_v20 = vld [vmem:[%s7143_s22 + $0x958] sm:$0xff] }
 0x4e8   : > { %v5990_v23 = vcombine.high %v1241_v17, %v1245_v19  ;;  %v5989_v30 = vcombine.low %v1241_v17, %v1245_v19  ;;  %v5991_v32 = vcombine.low %v1242_v20, %v1246_v50  ;;  %v1302_v17 = vld [vmem:[%s7143_s22 + $0xb38] sm:$0xff] }
 0x4ea   : > { %4411 = vmatpush1.bf16.msra.mxu0 %v5925_v24  ;;  %4575 = vmatpush1.bf16.msra.mxu1 %v5927_v25  ;;  %v5992_v24 = vcombine.high %v1242_v20, %v1246_v50  ;;  %v1249_v25 = vld [vmem:[%s7143_s22 + $0x990] sm:$0xff] }
 0x4eb   : > { %4412 = vmatprep.subr.bf16.mxu0 %v5934_v26  ;;  %4576 = vmatprep.subr.bf16.mxu1 %v5936_v27  ;;  %v1253_v26 = vld [vmem:[%s7143_s22 + $0x9b0] sm:$0xff]  ;;  %v1250_v27 = vld [vmem:[%s7143_s22 + $0x998] sm:$0xff] }
 0x4ec   : > { %v5998_v33 = vcombine.high %v1249_v25, %v1253_v26  ;;  %v5997_v39 = vcombine.low %v1249_v25, %v1253_v26  ;;  %v5999_v41 = vcombine.low %v1250_v27, %v1254_v29  ;;  %v1310_v25 = vld [vmem:[%s7143_s22 + $0xb78] sm:$0xff] }
 0x4ee   : > { %4413 = vmatpush1.bf16.msra.mxu0 %v5933_v34  ;;  %4577 = vmatpush1.bf16.msra.mxu1 %v5935_v35  ;;  %v6000_v34 = vcombine.high %v1250_v27, %v1254_v29  ;;  %v1257_v35 = vld [vmem:[%s7143_s22 + $0x9d0] sm:$0xff] }
 0x4ef   : > { %4414 = vmatprep.subr.bf16.mxu0 %v5942_v36  ;;  %4578 = vmatprep.subr.bf16.mxu1 %v5944_v37  ;;  %v1261_v36 = vld [vmem:[%s7143_s22 + $0x9f0] sm:$0xff]  ;;  %v1258_v37 = vld [vmem:[%s7143_s22 + $0x9d8] sm:$0xff] }
 0x4f0   : > { %v6006_v10 = vcombine.high %v1257_v35, %v1261_v36  ;;  %v6005_v48 = vcombine.low %v1257_v35, %v1261_v36  ;;  %v6007_v49 = vcombine.low %v1258_v37, %v1262_v3  ;;  %v1318_v35 = vld [vmem:[%s7143_s22 + $0xbb8] sm:$0xff] }
 0x4f2   : > { %4415 = vmatpush1.bf16.msra.mxu0 %v5941_v43  ;;  %4579 = vmatpush1.bf16.msra.mxu1 %v5943_v60  ;;  %v6008_v43 = vcombine.high %v1258_v37, %v1262_v3  ;;  %v1265_v60 = vld [vmem:[%s7143_s22 + $0xa10] sm:$0xff] }
 0x4f3   : > { %4425 = vmatprep.subr.bf16.mxu0 %v5950_v44  ;;  %4589 = vmatprep.subr.bf16.mxu1 %v5952_v45  ;;  %v1269_v44 = vld [vmem:[%s7143_s22 + $0xa30] sm:$0xff]  ;;  %v1266_v45 = vld [vmem:[%s7143_s22 + $0xa18] sm:$0xff] }
 0x4f4   : > { %v6014_v51 = vcombine.high %v1265_v60, %v1269_v44  ;;  %v6015_v58 = vcombine.low %v1266_v45, %v1270_v47 }
 0x4f5   : > { %4417 = vmatmul.mubr.bf16.vlgmr.msra.gmra.mrb[4].mxu0 %v7447_v28  ;;  %4581 = vmatmul.mubr.bf16.vlgmr.msra.gmra.mrb[4].mxu1 %v7447_v28  ;;  %v5965_v28 = vcombine.low %v1217_v56, %v1221_v57  ;;  %v1278_v56 = vld [vmem:[%s7143_s22 + $0xa78] sm:$0xff]  ;;  %v6013_v57 = vcombine.low %v1265_v60, %v1269_v44 }
 0x4f6   : > { %4426 = vmatpush1.bf16.msra.mxu0 %v5949_v52  ;;  %4590 = vmatpush1.bf16.msra.mxu1 %v5951_v54  ;;  %v6016_v52 = vcombine.high %v1266_v45, %v1270_v47  ;;  %v1273_v54 = vld [vmem:[%s7143_s22 + $0xa50] sm:$0xff]  ;;  %v1326_v60 = vld [vmem:[%s7143_s22 + $0xbf8] sm:$0xff] }
 0x4f7   : > { %4427 = vmatprep.subr.bf16.mxu0 %v5958_v12  ;;  %4591 = vmatprep.subr.bf16.mxu1 %v5960_v55  ;;  %v1277_v12 = vld [vmem:[%s7143_s22 + $0xa70] sm:$0xff]  ;;  %v1274_v55 = vld [vmem:[%s7143_s22 + $0xa58] sm:$0xff] }
 0x4f8   : > { %4457 = vmatprep.mubr.bf16.mxu0 %v7453_v38  ;;  %4621 = vmatprep.mubr.bf16.mxu1 %v7453_v38  ;;  %v5975_v38 = vcombine.low %v1226_v2, %v1230_v46  ;;  %v6022_v59 = vcombine.high %v1273_v54, %v1277_v12  ;;  %v6021_v1 = vcombine.low %v1273_v54, %v1277_v12  ;;  %v1334_v54 = vld [vmem:[%s7143_s22 + $0xc38] sm:$0xff] }
 0x4f9   : > { %v6023_v2 = vcombine.low %v1274_v55, %v1278_v56 }
 0x4fa   : > { %4428 = vmatpush1.bf16.msra.mxu0 %v5957_v61  ;;  %4592 = vmatpush1.bf16.msra.mxu1 %v5959_v62  ;;  %v6024_v61 = vcombine.high %v1274_v55, %v1278_v56  ;;  %v1281_v62 = vld [vmem:[%s7143_s22 + $0xa90] sm:$0xff] }
 0x4fb   : > { %4429 = vmatprep.subr.bf16.mxu0 %v5966_v18  ;;  %4593 = vmatprep.subr.bf16.mxu1 %v5968_v21  ;;  %v1285_v18 = vld [vmem:[%s7143_s22 + $0xab0] sm:$0xff]  ;;  %v1282_v21 = vld [vmem:[%s7143_s22 + $0xa98] sm:$0xff] }
 0x4fc   : > { %v6030_v46 = vcombine.high %v1281_v62, %v1285_v18  ;;  %v6029_v8 = vcombine.low %v1281_v62, %v1285_v18  ;;  %v6031_v9 = vcombine.low %v1282_v21, %v1286_v0  ;;  %v1342_v62 = vld [vmem:[%s7143_s22 + $0xc78] sm:$0xff] }
 0x4fe   : > { %4430 = vmatpush1.bf16.msra.mxu0 %v5965_v28  ;;  %4594 = vmatpush1.bf16.msra.mxu1 %v5967_v4  ;;  %v6032_v28 = vcombine.high %v1282_v21, %v1286_v0  ;;  %v1289_v4 = vld [vmem:[%s7143_s22 + $0xad0] sm:$0xff] }
 0x4ff   : > { %4431 = vmatprep.subr.bf16.mxu0 %v5974_v5  ;;  %4595 = vmatprep.subr.bf16.mxu1 %v5976_v6  ;;  %v1293_v5 = vld [vmem:[%s7143_s22 + $0xaf0] sm:$0xff]  ;;  %v1290_v6 = vld [vmem:[%s7143_s22 + $0xad8] sm:$0xff] }
 0x500   : > { %v6038_v11 = vcombine.high %v1289_v4, %v1293_v5  ;;  %v6037_v19 = vcombine.low %v1289_v4, %v1293_v5  ;;  %v6039_v20 = vcombine.low %v1290_v6, %v1294_v7  ;;  %v1350_v4 = vld [vmem:[%s7143_s22 + $0xcb8] sm:$0xff] }
 0x502   : > { %4432 = vmatpush1.bf16.msra.mxu0 %v5973_v14  ;;  %4596 = vmatpush1.bf16.msra.mxu1 %v5975_v38  ;;  %v6040_v14 = vcombine.high %v1290_v6, %v1294_v7  ;;  %v1297_v38 = vld [vmem:[%s7143_s22 + $0xb10] sm:$0xff] }
 0x503   : > { %4433 = vmatprep.subr.bf16.mxu0 %v5982_v15  ;;  %4597 = vmatprep.subr.bf16.mxu1 %v5984_v16  ;;  %v1301_v15 = vld [vmem:[%s7143_s22 + $0xb30] sm:$0xff]  ;;  %v1298_v16 = vld [vmem:[%s7143_s22 + $0xb18] sm:$0xff] }
 0x504   : > { %v6046_v50 = vcombine.high %v1297_v38, %v1301_v15  ;;  %v6045_v26 = vcombine.low %v1297_v38, %v1301_v15  ;;  %v6047_v27 = vcombine.low %v1298_v16, %v1302_v17  ;;  %v1358_v38 = vld [vmem:[%s7143_s22 + $0xcf8] sm:$0xff] }
 0x506   : > { %4434 = vmatpush1.bf16.msra.mxu0 %v5981_v22  ;;  %4598 = vmatpush1.bf16.msra.mxu1 %v5983_v42  ;;  %v6048_v22 = vcombine.high %v1298_v16, %v1302_v17  ;;  %v1305_v42 = vld [vmem:[%s7143_s22 + $0xb50] sm:$0xff] }
 0x507   : > { %4435 = vmatprep.subr.bf16.mxu0 %v5990_v23  ;;  %4599 = vmatprep.subr.bf16.mxu1 %v5992_v24  ;;  %v1309_v23 = vld [vmem:[%s7143_s22 + $0xb70] sm:$0xff]  ;;  %v1306_v24 = vld [vmem:[%s7143_s22 + $0xb58] sm:$0xff] }
 0x508   : > { %v6054_v29 = vcombine.high %v1305_v42, %v1309_v23  ;;  %v6053_v36 = vcombine.low %v1305_v42, %v1309_v23  ;;  %v6055_v37 = vcombine.low %v1306_v24, %v1310_v25 }
 0x50a   : > { %4436 = vmatpush1.bf16.msra.mxu0 %v5989_v30  ;;  %4600 = vmatpush1.bf16.msra.mxu1 %v5991_v32  ;;  %v6056_v30 = vcombine.high %v1306_v24, %v1310_v25  ;;  %v1313_v32 = vld [vmem:[%s7143_s22 + $0xb90] sm:$0xff] }
 0x50b   : > { %4437 = vmatprep.subr.bf16.mxu0 %v5998_v33  ;;  %4601 = vmatprep.subr.bf16.mxu1 %v6000_v34  ;;  %v1317_v33 = vld [vmem:[%s7143_s22 + $0xbb0] sm:$0xff]  ;;  %v1314_v34 = vld [vmem:[%s7143_s22 + $0xb98] sm:$0xff] }
 0x50c   : > { %v6062_v3 = vcombine.high %v1313_v32, %v1317_v33  ;;  %v6061_v44 = vcombine.low %v1313_v32, %v1317_v33  ;;  %v6063_v45 = vcombine.low %v1314_v34, %v1318_v35  ;;  %v1369_v25 = vld [vmem:[%s7143_s22 + $0xd50] sm:$0xff] }
 0x50e   : > { %4438 = vmatpush1.bf16.msra.mxu0 %v5997_v39  ;;  %4602 = vmatpush1.bf16.msra.mxu1 %v5999_v41  ;;  %v6064_v39 = vcombine.high %v1314_v34, %v1318_v35  ;;  %v1321_v41 = vld [vmem:[%s7143_s22 + $0xbd0] sm:$0xff] }
 0x50f   : > { %4439 = vmatprep.subr.bf16.mxu0 %v6006_v10  ;;  %4603 = vmatprep.subr.bf16.mxu1 %v6008_v43  ;;  %v1325_v10 = vld [vmem:[%s7143_s22 + $0xbf0] sm:$0xff]  ;;  %v1322_v43 = vld [vmem:[%s7143_s22 + $0xbd8] sm:$0xff] }
 0x510   : > { %v6070_v47 = vcombine.high %v1321_v41, %v1325_v10  ;;  %v6069_v12 = vcombine.low %v1321_v41, %v1325_v10  ;;  %v6071_v55 = vcombine.low %v1322_v43, %v1326_v60  ;;  %v1377_v35 = vld [vmem:[%s7143_s22 + $0xd90] sm:$0xff] }
 0x512   : > { %4440 = vmatpush1.bf16.msra.mxu0 %v6005_v48  ;;  %4604 = vmatpush1.bf16.msra.mxu1 %v6007_v49  ;;  %v6072_v48 = vcombine.high %v1322_v43, %v1326_v60  ;;  %v1329_v49 = vld [vmem:[%s7143_s22 + $0xc10] sm:$0xff] }
 0x513   : > { %4441 = vmatprep.subr.bf16.mxu0 %v6014_v51  ;;  %4605 = vmatprep.subr.bf16.mxu1 %v6016_v52  ;;  %v1333_v51 = vld [vmem:[%s7143_s22 + $0xc30] sm:$0xff]  ;;  %v1330_v52 = vld [vmem:[%s7143_s22 + $0xc18] sm:$0xff] }
 0x514   : > { %v6078_v56 = vcombine.high %v1329_v49, %v1333_v51  ;;  %v6077_v18 = vcombine.low %v1329_v49, %v1333_v51  ;;  %v6079_v21 = vcombine.low %v1330_v52, %v1334_v54  ;;  %v1386_v49 = vld [vmem:[%s7143_s22 + $0xdd8] sm:$0xff] }
 0x515   : > { %v1390_v51 = vld [vmem:[%s7143_s22 + $0xdf8] sm:$0xff] }
 0x516   : > { %4442 = vmatpush1.bf16.msra.mxu0 %v6013_v57  ;;  %4606 = vmatpush1.bf16.msra.mxu1 %v6015_v58  ;;  %v6080_v57 = vcombine.high %v1330_v52, %v1334_v54  ;;  %v1337_v58 = vld [vmem:[%s7143_s22 + $0xc50] sm:$0xff] }
 0x517   : > { %4443 = vmatprep.subr.bf16.mxu0 %v6022_v59  ;;  %4607 = vmatprep.subr.bf16.mxu1 %v6024_v61  ;;  %v1341_v59 = vld [vmem:[%s7143_s22 + $0xc70] sm:$0xff]  ;;  %v1338_v61 = vld [vmem:[%s7143_s22 + $0xc58] sm:$0xff] }
 0x518   : > { %v6086_v0 = vcombine.high %v1337_v58, %v1341_v59  ;;  %v6085_v5 = vcombine.low %v1337_v58, %v1341_v59  ;;  %v6087_v6 = vcombine.low %v1338_v61, %v1342_v62 }
 0x51a   : > { %4444 = vmatpush1.bf16.msra.mxu0 %v6021_v1  ;;  %4608 = vmatpush1.bf16.msra.mxu1 %v6023_v2  ;;  %v6088_v1 = vcombine.high %v1338_v61, %v1342_v62  ;;  %v1345_v2 = vld [vmem:[%s7143_s22 + $0xc90] sm:$0xff] }
 0x51b   : > { %4445 = vmatprep.subr.bf16.mxu0 %v6030_v46  ;;  %4609 = vmatprep.subr.bf16.mxu1 %v6032_v28  ;;  %v1349_v46 = vld [vmem:[%s7143_s22 + $0xcb0] sm:$0xff]  ;;  %v1346_v28 = vld [vmem:[%s7143_s22 + $0xc98] sm:$0xff] }
 0x51c   : > { %v6094_v7 = vcombine.high %v1345_v2, %v1349_v46  ;;  %v6095_v15 = vcombine.low %v1346_v28, %v1350_v4 }
 0x51e   : > { %4446 = vmatpush1.bf16.msra.mxu0 %v6029_v8  ;;  %4610 = vmatpush1.bf16.msra.mxu1 %v6031_v9  ;;  %v6096_v8 = vcombine.high %v1346_v28, %v1350_v4  ;;  %v1353_v9 = vld [vmem:[%s7143_s22 + $0xcd0] sm:$0xff]  ;;  %v1398_v28 = vld [vmem:[%s7143_s22 + $0xe38] sm:$0xff] }
 0x51f   : > { %4447 = vmatprep.subr.bf16.mxu0 %v6038_v11  ;;  %4611 = vmatprep.subr.bf16.mxu1 %v6040_v14  ;;  %v1357_v11 = vld [vmem:[%s7143_s22 + $0xcf0] sm:$0xff]  ;;  %v1354_v14 = vld [vmem:[%s7143_s22 + $0xcd8] sm:$0xff] }
 0x520   : > { %v6102_v16 = vcombine.high %v1353_v9, %v1357_v11  ;;  %v6104_v17 = vcombine.high %v1354_v14, %v1358_v38  ;;  %v6101_v42 = vcombine.low %v1353_v9, %v1357_v11  ;;  %v941_v4 = vld [vmem:[#allocation3] sm:$0xff] }
 0x521   : > { %v1401_v11 = vld [vmem:[%s7143_s22 + $0xe50] sm:$0xff] }
 0x522   : > { %4448 = vmatpush1.bf16.msra.mxu0 %v6037_v19  ;;  %4612 = vmatpush1.bf16.msra.mxu1 %v6039_v20  ;;  %v1361_v19 = vld [vmem:[%s7143_s22 + $0xd10] sm:$0xff] }
 0x523   : > { %4449 = vmatprep.subr.bf16.mxu0 %v6046_v50  ;;  %4613 = vmatprep.subr.bf16.mxu1 %v6048_v22  ;;  %v1365_v20 = vld [vmem:[%s7143_s22 + $0xd30] sm:$0xff]  ;;  %v1362_v50 = vld [vmem:[%s7143_s22 + $0xd18] sm:$0xff] }
 0x524   : > { %v1366_v22 = vld [vmem:[%s7143_s22 + $0xd38] sm:$0xff]  ;;  %v6110_v23 = vcombine.high %v1361_v19, %v1365_v20 }
 0x525   : > { %v6112_v24 = vcombine.high %v1362_v50, %v1366_v22  ;;  %v6111_v32 = vcombine.low %v1362_v50, %v1366_v22  ;;  %v1409_v50 = vld [vmem:[%s7143_s22 + $0xe90] sm:$0xff] }
 0x526   : > { %4450 = vmatpush1.bf16.msra.mxu0 %v6045_v26  ;;  %4614 = vmatpush1.bf16.msra.mxu1 %v6047_v27  ;;  %v1373_v26 = vld [vmem:[%s7143_s22 + $0xd70] sm:$0xff]  ;;  %v1370_v27 = vld [vmem:[%s7143_s22 + $0xd58] sm:$0xff] }
 0x527   : > { %4451 = vmatprep.subr.bf16.mxu0 %v6054_v29  ;;  %4615 = vmatprep.subr.bf16.mxu1 %v6056_v30  ;;  %v1374_v29 = vld [vmem:[%s7143_s22 + $0xd78] sm:$0xff]  ;;  %v6109_v30 = vcombine.low %v1361_v19, %v1365_v20  ;;  %v6118_v33 = vcombine.high %v1369_v25, %v1373_v26  ;;  %v1413_v22 = vld [vmem:[%s7143_s22 + $0xeb0] sm:$0xff] }
 0x528   : > { %v6120_v34 = vcombine.high %v1370_v27, %v1374_v29  ;;  %v6119_v41 = vcombine.low %v1370_v27, %v1374_v29  ;;  %v1417_v27 = vld [vmem:[%s7143_s22 + $0xed0] sm:$0xff] }
 0x529   : > { %v1421_v29 = vld [vmem:[%s7143_s22 + $0xef0] sm:$0xff] }
 0x52a   : > { %4452 = vmatpush1.bf16.msra.mxu0 %v6053_v36  ;;  %4616 = vmatpush1.bf16.msra.mxu1 %v6055_v37  ;;  %v1381_v36 = vld [vmem:[%s7143_s22 + $0xdb0] sm:$0xff]  ;;  %v1378_v37 = vld [vmem:[%s7143_s22 + $0xd98] sm:$0xff] }
 0x52b   : > { %4453 = vmatprep.subr.bf16.mxu0 %v6062_v3  ;;  %4617 = vmatprep.subr.bf16.mxu1 %v6064_v39  ;;  %v1382_v3 = vld [vmem:[%s7143_s22 + $0xdb8] sm:$0xff]  ;;  %v6117_v39 = vcombine.low %v1369_v25, %v1373_v26  ;;  %v6126_v10 = vcombine.high %v1377_v35, %v1381_v36  ;;  %v6158_v25 = vcombine.high %v1409_v50, %v1413_v22 }
 0x52c   : > { %v6128_v60 = vcombine.high %v1378_v37, %v1382_v3  ;;  %v6127_v59 = vcombine.low %v1378_v37, %v1382_v3  ;;  %v1425_v37 = vld [vmem:[%s7143_s22 + $0xf10] sm:$0xff] }
 0x52d   : > { %v1429_v3 = vld [vmem:[%s7143_s22 + $0xf30] sm:$0xff] }
 0x52e   : > { %4454 = vmatpush1.bf16.msra.mxu0 %v6061_v44  ;;  %4618 = vmatpush1.bf16.msra.mxu1 %v6063_v45  ;;  %v1385_v44 = vld [vmem:[%s7143_s22 + $0xdd0] sm:$0xff] }
 0x52f   : > { %4455 = vmatprep.subr.bf16.mxu0 %v6070_v47  ;;  %4619 = vmatprep.subr.bf16.mxu1 %v6072_v48  ;;  %v1389_v45 = vld [vmem:[%s7143_s22 + $0xdf0] sm:$0xff] }
 0x530   : > { %v6134_v61 = vcombine.high %v1385_v44, %v1389_v45 }
 0x532   : > { %4456 = vmatpush1.bf16.msra.mxu0 %v6069_v12  ;;  %4620 = vmatpush1.bf16.msra.mxu1 %v6071_v55  ;;  %v6125_v55 = vcombine.low %v1377_v35, %v1381_v36  ;;  %v6166_v35 = vcombine.high %v1417_v27, %v1421_v29 }
 0x533   : > { %4466 = vmatprep.subr.bf16.mxu0 %v6078_v56  ;;  %4630 = vmatprep.subr.bf16.mxu1 %v6080_v57 }
 0x535   : > { %4458 = vmatmul.mubr.bf16.vlgmr.msra.gmra.mrb[4].mxu0 %v7528_v53  ;;  %4622 = vmatmul.mubr.bf16.vlgmr.msra.gmra.mrb[4].mxu1 %v7528_v53  ;;  %v6093_v53 = vcombine.low %v1345_v2, %v1349_v46  ;;  %v1394_v46 = vld [vmem:[%s7143_s22 + $0xe18] sm:$0xff] }
 0x536   : > { %4467 = vmatpush1.bf16.msra.mxu0 %v6077_v18  ;;  %4631 = vmatpush1.bf16.msra.mxu1 %v6079_v21  ;;  %v6136_v21 = vcombine.high %v1386_v49, %v1390_v51  ;;  %v6144_v9 = vcombine.high %v1394_v46, %v1398_v28 }
 0x537   : > { %4468 = vmatprep.subr.bf16.mxu0 %v6086_v0  ;;  %4632 = vmatprep.subr.bf16.mxu1 %v6088_v1  ;;  %v1393_v0 = vld [vmem:[%s7143_s22 + $0xe10] sm:$0xff] }
 0x538   : > { %4498 = vmatprep.mubr.bf16.mxu0 %v7534_v63  ;;  %4662 = vmatprep.mubr.bf16.mxu1 %v7534_v63  ;;  %v6103_v63 = vcombine.low %v1354_v14, %v1358_v38  ;;  %v1397_v1 = vld [vmem:[%s7143_s22 + $0xe30] sm:$0xff] }
 0x539   : > { %v1405_v14 = vld [vmem:[%s7143_s22 + $0xe70] sm:$0xff] }
 0x53a   : > { %4469 = vmatpush1.bf16.msra.mxu0 %v6085_v5  ;;  %4633 = vmatpush1.bf16.msra.mxu1 %v6087_v6  ;;  %v6133_v5 = vcombine.low %v1385_v44, %v1389_v45  ;;  %v6150_v19 = vcombine.high %v1401_v11, %v1405_v14  ;;  %v1433_v45 = vld [vmem:[%s7143_s22 + $0xf50] sm:$0xff] }
 0x53b   : > { %4470 = vmatprep.subr.bf16.mxu0 %v6094_v7  ;;  %4634 = vmatprep.subr.bf16.mxu1 %v6096_v8  ;;  %v6135_v7 = vcombine.low %v1386_v49, %v1390_v51  ;;  %v6142_v8 = vcombine.high %v1393_v0, %v1397_v1  ;;  %v1438_v49 = vld [vmem:[%s7143_s22 + $0xf78] sm:$0xff]  ;;  %v6173_v51 = vcombine.low %v1425_v37, %v1429_v3 }
 0x53e   : > { %4471 = vmatpush1.bf16.msra.mxu0 %v6093_v53  ;;  %4635 = vmatpush1.bf16.msra.mxu1 %v6095_v15  ;;  %v1402_v53 = vld [vmem:[%s7143_s22 + $0xe58] sm:$0xff] }
 0x53f   : > { %4472 = vmatprep.subr.bf16.mxu0 %v6102_v16  ;;  %4636 = vmatprep.subr.bf16.mxu1 %v6104_v17  ;;  %v1406_v15 = vld [vmem:[%s7143_s22 + $0xe78] sm:$0xff]  ;;  %v6141_v16 = vcombine.low %v1393_v0, %v1397_v1  ;;  %v6143_v17 = vcombine.low %v1394_v46, %v1398_v28  ;;  %v1453_v0 = vld [vmem:[%s7143_s22 + $0xff0] sm:$0xff] }
 0x540   : > { %v6152_v20 = vcombine.high %v1402_v53, %v1406_v15  ;;  %v1450_v1 = vld [vmem:[%s7143_s22 + $0xfd8] sm:$0xff] }
 0x542   : > { %4473 = vmatpush1.bf16.msra.mxu0 %v6101_v42  ;;  %4637 = vmatpush1.bf16.msra.mxu1 %v6103_v63  ;;  %v1410_v42 = vld [vmem:[%s7143_s22 + $0xe98] sm:$0xff] }
 0x543   : > { %4474 = vmatprep.subr.bf16.mxu0 %v6110_v23  ;;  %4638 = vmatprep.subr.bf16.mxu1 %v6112_v24  ;;  %v1414_v63 = vld [vmem:[%s7143_s22 + $0xeb8] sm:$0xff]  ;;  %v6149_v23 = vcombine.low %v1401_v11, %v1405_v14  ;;  %v6151_v24 = vcombine.low %v1402_v53, %v1406_v15 }
 0x544   : > { %v6160_v26 = vcombine.high %v1410_v42, %v1414_v63 }
 0x546   : > { %4475 = vmatpush1.bf16.msra.mxu0 %v6109_v30  ;;  %4639 = vmatpush1.bf16.msra.mxu1 %v6111_v32  ;;  %v1418_v30 = vld [vmem:[%s7143_s22 + $0xed8] sm:$0xff] }
 0x547   : > { %4476 = vmatprep.subr.bf16.mxu0 %v6118_v33  ;;  %4640 = vmatprep.subr.bf16.mxu1 %v6120_v34  ;;  %v1422_v32 = vld [vmem:[%s7143_s22 + $0xef8] sm:$0xff]  ;;  %v6157_v33 = vcombine.low %v1409_v50, %v1413_v22  ;;  %v6159_v34 = vcombine.low %v1410_v42, %v1414_v63 }
 0x548   : > { %v4172_v43 = vpop.f32.mrb[0].mxu0  ;;  %v4336_v47 = vpop.f32.mrb[0].mxu1  ;;  %v6168_v36 = vcombine.high %v1418_v30, %v1422_v32  ;;  %v942_v22 = vld [vmem:[#allocation3 + $0x8] sm:$0xff] }
 0x549   : > { %v4174_v48 = vpop.f32.mrb[1].mxu0  ;;  %v4338_v54 = vpop.f32.mrb[1].mxu1 }
 0x54a   : > { %v4679_v52 = vcombine.low %v4172_v43, %v4174_v48  ;;  %v4176_v12 = vpop.f32.mrb[2].mxu0  ;;  %4477 = vmatpush1.bf16.msra.mxu0 %v6117_v39  ;;  %v4680_v56 = vcombine.low %v4336_v47, %v4338_v54  ;;  %v4340_v57 = vpop.f32.mrb[2].mxu1  ;;  %4641 = vmatpush1.bf16.msra.mxu1 %v6119_v41  ;;  %v1426_v39 = vld [vmem:[%s7143_s22 + $0xf18] sm:$0xff]  ;;  %v6167_v43 = vcombine.low %v1418_v30, %v1422_v32  ;;  %v1437_v47 = vld [vmem:[%s7143_s22 + $0xf70] sm:$0xff] }
 0x54b   : > { %v4177_v58 = vpop.f32.mrb[3].mxu0  ;;  %4478 = vmatprep.subr.bf16.mxu0 %v6126_v10  ;;  %v4341_v18 = vpop.f32.mrb[3].mxu1  ;;  %4642 = vmatprep.subr.bf16.mxu1 %v6128_v60  ;;  %v1430_v41 = vld [vmem:[%s7143_s22 + $0xf38] sm:$0xff]  ;;  %v6165_v10 = vcombine.low %v1417_v27, %v1421_v29  ;;  %v6174_v60 = vcombine.high %v1425_v37, %v1429_v3  ;;  %v6182_v54 = vcombine.high %v1433_v45, %v1437_v47  ;;  %v6602_v27 = vld [vmem:[#allocation10 + $0xc8] sm:$0xff] (!%p6201_p9)   ;;  %v6610_v37 = vld [vmem:[#allocation10 + $0xd8] sm:$0xff] (!%p6201_p9)  }
 0x54c   : > { %v4687_v62 = vrot.slane %v4679_v52, %v7294_v40  ;;  %v4694_v2 = vrot.slane %v4680_v56, %v7294_v40  ;;  %v6176_v44 = vcombine.high %v1426_v39, %v1430_v41  ;;  %v1434_v48 = vld [vmem:[%s7143_s22 + $0xf58] sm:$0xff]  ;;  %v6175_v52 = vcombine.low %v1426_v39, %v1430_v41  ;;  %v1445_v56 = vld [vmem:[%s7143_s22 + $0xfb0] sm:$0xff]  ;;  %v6611_v3 = vld [vmem:[#allocation10 + $0x18] sm:$0xff] (!%p6201_p9)  }
 0x54d   : > { %v6184_v12 = vcombine.high %v1434_v48, %v1438_v49  ;;  %v1442_v57 = vld [vmem:[%s7143_s22 + $0xf98] sm:$0xff]  ;;  %v6603_v29 = vld [vmem:[#allocation10 + $0x8] sm:$0xff] (!%p6201_p9)   ;;  %v6612_v39 = vld [vmem:[#allocation10 + $0x98] sm:$0xff] (!%p6201_p9)  }
 0x54e   : > { %4479 = vmatpush1.bf16.msra.mxu0 %v6125_v55  ;;  %v4695_v6 = vcombine.low %v4687_v62, %v4694_v2  ;;  %4643 = vmatpush1.bf16.msra.mxu1 %v6127_v59  ;;  %v1441_v55 = vld [vmem:[%s7143_s22 + $0xf90] sm:$0xff]  ;;  %v1446_v58 = vld [vmem:[%s7143_s22 + $0xfb8] sm:$0xff]  ;;  %v6181_v59 = vcombine.low %v1433_v45, %v1437_v47  ;;  %v6613_v41 = vld [vmem:[#allocation10 + $0x60] sm:$0xff] (!%p6201_p9)  }
 0x54f   : > { %4480 = vmatprep.subr.bf16.mxu0 %v6134_v61  ;;  %4644 = vmatprep.subr.bf16.mxu1 %v6136_v21  ;;  %v6183_v61 = vcombine.low %v1434_v48, %v1438_v49  ;;  %v6190_v62 = vcombine.high %v1441_v55, %v1445_v56  ;;  %v6192_v18 = vcombine.high %v1442_v57, %v1446_v58  ;;  %v1449_v21 = vld [vmem:[%s7143_s22 + $0xfd0] sm:$0xff]  ;;  %v1454_v2 = vld [vmem:[%s7143_s22 + $0xff8] sm:$0xff] }
 0x550   : > { %v4715_v38 = vadd.f32 %v4695_v6, %v941_v4  ;;  %v6189_v46 = vcombine.low %v1441_v55, %v1445_v56  ;;  %v6191_v28 = vcombine.low %v1442_v57, %v1446_v58  ;;  %v6198_v4 = vcombine.high %v1449_v21, %v1453_v0  ;;  %v6604_v30 = vld [vmem:[#allocation10 + $0x88] sm:$0xff] (!%p6201_p9)   ;;  %v6605_v32 = vld [vmem:[#allocation10 + $0x50] sm:$0xff] (!%p6201_p9)   ;;  %v6625_v56 = vld [vmem:[#allocation10 + $0x78] sm:$0xff] (!%p6201_p9)  }
 0x551   : > { %v6197_v6 = vcombine.low %v1449_v21, %v1453_v0  ;;  %v6618_v45 = vld [vmem:[#allocation10 + $0xe8] sm:$0xff] (!%p6201_p9)   ;;  %v6621_v49 = vld [vmem:[#allocation10 + $0x70] sm:$0xff] (!%p6201_p9)   ;;  %v4733_v55 = vsub.s32 (!%p6201_p9), 1, %v7286_v31  ;;  %v4737_v57 = vsub.s32 (!%p6201_p9), 2, %v7286_v31  ;;  %v6626_v58 = vld [vmem:[#allocation10 + $0xf8] sm:$0xff] (!%p6201_p9)  }
 0x552   : > { %4481 = vmatpush1.bf16.msra.mxu0 %v6133_v5  ;;  %4717 = vst [vmem:[#allocation3] sm:$0xff] %v4715_v38  ;;  %4645 = vmatpush1.bf16.msra.mxu1 %v6135_v7  ;;  %v6200_v5 = vcombine.high %v1450_v1, %v1454_v2  ;;  %v6199_v7 = vcombine.low %v1450_v1, %v1454_v2  ;;  %v6619_v47 = vld [vmem:[#allocation10 + $0x28] sm:$0xff] (!%p6201_p9)  }
 0x553   : > { %4482 = vmatprep.subr.bf16.mxu0 %v6142_v8  ;;  %4646 = vmatprep.subr.bf16.mxu1 %v6144_v9  ;;  %v6620_v48 = vld [vmem:[#allocation10 + $0xa8] sm:$0xff] (!%p6201_p9)  }
 0x556   : > { %4483 = vmatpush1.bf16.msra.mxu0 %v6141_v16  ;;  %4647 = vmatpush1.bf16.msra.mxu1 %v6143_v17 }
 0x557   : > { %4484 = vmatprep.subr.bf16.mxu0 %v6150_v19  ;;  %4648 = vmatprep.subr.bf16.mxu1 %v6152_v20 }
 0x55a   : > { %4485 = vmatpush1.bf16.msra.mxu0 %v6149_v23  ;;  %4649 = vmatpush1.bf16.msra.mxu1 %v6151_v24  ;;  %v6598_v23 = vld [vmem:[#allocation10 + $0xc0] sm:$0xff] (!%p6201_p9)  }
 0x55b   : > { %4486 = vmatprep.subr.bf16.mxu0 %v6158_v25  ;;  %4650 = vmatprep.subr.bf16.mxu1 %v6160_v26  ;;  %v6599_v24 = vld [vmem:[#allocation10] sm:$0xff] (!%p6201_p9)   ;;  %v6601_v26 = vld [vmem:[#allocation10 + $0x48] sm:$0xff] (!%p6201_p9)  }
 0x55c   : > { %v6600_v25 = vld [vmem:[#allocation10 + $0x80] sm:$0xff] (!%p6201_p9)  }
 0x55e   : > { %4487 = vmatpush1.bf16.msra.mxu0 %v6157_v33  ;;  %4651 = vmatpush1.bf16.msra.mxu1 %v6159_v34  ;;  %v6606_v33 = vld [vmem:[#allocation10 + $0xd0] sm:$0xff] (!%p6201_p9)  }
 0x55f   : > { %4488 = vmatprep.subr.bf16.mxu0 %v6166_v35  ;;  %4652 = vmatprep.subr.bf16.mxu1 %v6168_v36  ;;  %v6607_v34 = vld [vmem:[#allocation10 + $0x10] sm:$0xff] (!%p6201_p9)   ;;  %v6609_v36 = vld [vmem:[#allocation10 + $0x58] sm:$0xff] (!%p6201_p9)  }
 0x560   : > { %v6608_v35 = vld [vmem:[#allocation10 + $0x90] sm:$0xff] (!%p6201_p9)  }
 0x562   : > { %4489 = vmatpush1.bf16.msra.mxu0 %v6165_v10  ;;  %4653 = vmatpush1.bf16.msra.mxu1 %v6167_v43  ;;  %v6614_v10 = vld [vmem:[#allocation10 + $0xe0] sm:$0xff] (!%p6201_p9)  }
 0x563   : > { %4490 = vmatprep.subr.bf16.mxu0 %v6174_v60  ;;  %4654 = vmatprep.subr.bf16.mxu1 %v6176_v44  ;;  %v6615_v43 = vld [vmem:[#allocation10 + $0x20] sm:$0xff] (!%p6201_p9)   ;;  %v6617_v44 = vld [vmem:[#allocation10 + $0x68] sm:$0xff] (!%p6201_p9)  }
 0x564   : > { %v6616_v60 = vld [vmem:[#allocation10 + $0xa0] sm:$0xff] (!%p6201_p9)  }
 0x566   : > { %4491 = vmatpush1.bf16.msra.mxu0 %v6173_v51  ;;  %4655 = vmatpush1.bf16.msra.mxu1 %v6175_v52  ;;  %v6622_v51 = vld [vmem:[#allocation10 + $0xf0] sm:$0xff] (!%p6201_p9)  }
 0x567   : > { %4492 = vmatprep.subr.bf16.mxu0 %v6182_v54  ;;  %4656 = vmatprep.subr.bf16.mxu1 %v6184_v12  ;;  %v6623_v52 = vld [vmem:[#allocation10 + $0x30] sm:$0xff] (!%p6201_p9)   ;;  %v4729_v54 = vsub.s32 (!%p6201_p9), 0, %v7286_v31 }
 0x568   : > { %v6624_v12 = vld [vmem:[#allocation10 + $0xb0] sm:$0xff] (!%p6201_p9)  }
 0x56a   : > { %4493 = vmatpush1.bf16.msra.mxu0 %v6181_v59  ;;  %4657 = vmatpush1.bf16.msra.mxu1 %v6183_v61  ;;  %v4741_v59 = vsub.s32 (!%p6201_p9), 3, %v7286_v31  ;;  %v6627_v61 = vld [vmem:[#allocation10 + $0x38] sm:$0xff] (!%p6201_p9)  }
 0x56b   : > { %4494 = vmatprep.subr.bf16.mxu0 %v6190_v62  ;;  %4658 = vmatprep.subr.bf16.mxu1 %v6192_v18  ;;  %v6628_v62 = vld [vmem:[#allocation10 + $0xb8] sm:$0xff] (!%p6201_p9)  }
 0x56c   : > { %v4725_v18 = vld [vmem:[#allocation9] sm:$0xff] (!%p6201_p9) }
 0x56d   : > { %v4730_v21 = vrot.slane (!%p6201_p9), %v4725_v18, %v4729_v54  ;;  %v4734_v0 = vrot.slane (!%p6201_p9), %v4725_v18, %v4733_v55  ;;  %v4738_v1 = vrot.slane (!%p6201_p9), %v4725_v18, %v4737_v57  ;;  %v4742_v2 = vrot.slane (!%p6201_p9), %v4725_v18, %v4741_v59  ;;  %v6647_v54 = vld [vmem:[#allocation10 + $0x120] sm:$0xff] (!%p6201_p9)   ;;  %v6649_v55 = vld [vmem:[#allocation10 + $0x168] sm:$0xff] (!%p6201_p9)  }
 0x56e   : > { %4495 = vmatpush1.bf16.msra.mxu0 %v6189_v46  ;;  %4659 = vmatpush1.bf16.msra.mxu1 %v6191_v28  ;;  %v6629_v46 = vld [vmem:[#allocation10 + $0x140] sm:$0xff] (!%p6201_p9)   ;;  %v6651_v59 = vld [vmem:[#allocation10 + $0x128] sm:$0xff] (!%p6201_p9)  }
 0x56f   : > { %4496 = vmatprep.subr.bf16.mxu0 %v6198_v4  ;;  %4660 = vmatprep.subr.bf16.mxu1 %v6200_v5  ;;  %v6630_v28 = vld [vmem:[#allocation10 + $0x1c0] sm:$0xff] (!%p6201_p9)   ;;  %v4759_v4 = vcombine.low (!%p6201_p9), %v4730_v21, %v4734_v0  ;;  %v4760_v5 = vcombine.low (!%p6201_p9), %v4738_v1, %v4742_v2  ;;  %v6652_v21 = vld [vmem:[#allocation10 + $0x1a8] sm:$0xff] (!%p6201_p9)   ;;  %v6654_v2 = vld [vmem:[#allocation10 + $0x1f0] sm:$0xff] (!%p6201_p9)  }
 0x572   : > { %4497 = vmatpush1.bf16.msra.mxu0 %v6197_v6  ;;  %4661 = vmatpush1.bf16.msra.mxu1 %v6199_v7  ;;  %v4767_v6 = vrot.slane (!%p6201_p9), %v4759_v4, %v7294_v40  ;;  %v4774_v7 = vrot.slane (!%p6201_p9), %v4760_v5, %v7294_v40  ;;  %v6657_v5 = vld [vmem:[#allocation10 + $0x178] sm:$0xff] (!%p6201_p9)  }
 0x573   : > { %6335 = vmatprep.subr.bf16.mxu1 (!%p6201_p9), %v6598_v23 }
 0x575   : > { %4499 = vmatmul.mubr.bf16.vlgmr.msra.gmra.mrb[4].mxu0 %v7602_v13  ;;  %4663 = vmatmul.mubr.bf16.vlgmr.msra.gmra.mrb[4].mxu1 %v7602_v13  ;;  %v6597_v13 = vld [vmem:[#allocation10 + $0x40] sm:$0xff] (!%p6201_p9)  }
 0x576   : > { %6313 = vmatprep.subr.bf16.mxu0 (!%p6201_p9), %v6597_v13  ;;  %6336 = vmatpush3.bf16.msra.mxu1 (!%p6201_p9), %v6600_v25 }
 0x577   : > { %6314 = vmatpush3.bf16.msra.mxu0 (!%p6201_p9), %v6599_v24  ;;  %6337 = vmatprep.subr.bf16.mxu1 (!%p6201_p9), %v6602_v27  ;;  %v6631_v24 = vld [vmem:[#allocation10 + $0x100] sm:$0xff] (!%p6201_p9)  }
 0x578   : > { %6315 = vmatprep.subr.bf16.mxu0 (!%p6201_p9), %v6601_v26 }
 0x57a   : > { %6338 = vmatpush3.bf16.msra.mxu1 (!%p6201_p9), %v6604_v30 }
 0x57b   : > { %6316 = vmatpush3.bf16.msra.mxu0 (!%p6201_p9), %v6603_v29  ;;  %6339 = vmatprep.subr.bf16.mxu1 (!%p6201_p9), %v6606_v33  ;;  %v6633_v29 = vld [vmem:[#allocation10 + $0x148] sm:$0xff] (!%p6201_p9)  }
 0x57c   : > { %6317 = vmatprep.subr.bf16.mxu0 (!%p6201_p9), %v6605_v32  ;;  %v6632_v32 = vld [vmem:[#allocation10 + $0x180] sm:$0xff] (!%p6201_p9)   ;;  %v6634_v33 = vld [vmem:[#allocation10 + $0x1c8] sm:$0xff] (!%p6201_p9)  }
 0x57e   : > { %6340 = vmatpush3.bf16.msra.mxu1 (!%p6201_p9), %v6608_v35 }
 0x57f   : > { %6318 = vmatpush3.bf16.msra.mxu0 (!%p6201_p9), %v6607_v34  ;;  %6341 = vmatprep.subr.bf16.mxu1 (!%p6201_p9), %v6610_v37  ;;  %v6636_v37 = vld [vmem:[#allocation10 + $0x188] sm:$0xff] (!%p6201_p9)  }
 0x580   : > { %6319 = vmatprep.subr.bf16.mxu0 (!%p6201_p9), %v6609_v36  ;;  %v6637_v36 = vld [vmem:[#allocation10 + $0x150] sm:$0xff] (!%p6201_p9)  }
 0x582   : > { %6342 = vmatpush3.bf16.msra.mxu1 (!%p6201_p9), %v6612_v39  ;;  %v6639_v39 = vld [vmem:[#allocation10 + $0x110] sm:$0xff] (!%p6201_p9)  }
 0x583   : > { %6320 = vmatpush3.bf16.msra.mxu0 (!%p6201_p9), %v6611_v3  ;;  %6343 = vmatprep.subr.bf16.mxu1 (!%p6201_p9), %v6614_v10  ;;  %v6638_v3 = vld [vmem:[#allocation10 + $0x1d0] sm:$0xff] (!%p6201_p9)  }
 0x584   : > { %6321 = vmatprep.subr.bf16.mxu0 (!%p6201_p9), %v6613_v41 }
 0x586   : > { %6344 = vmatpush3.bf16.msra.mxu1 (!%p6201_p9), %v6616_v60  ;;  %v6640_v60 = vld [vmem:[#allocation10 + $0x190] sm:$0xff] (!%p6201_p9)  }
 0x587   : > { %6322 = vmatpush3.bf16.msra.mxu0 (!%p6201_p9), %v6615_v43  ;;  %6345 = vmatprep.subr.bf16.mxu1 (!%p6201_p9), %v6618_v45  ;;  %v6641_v43 = vld [vmem:[#allocation10 + $0x158] sm:$0xff] (!%p6201_p9)  }
 0x588   : > { %6323 = vmatprep.subr.bf16.mxu0 (!%p6201_p9), %v6617_v44  ;;  %v6642_v44 = vld [vmem:[#allocation10 + $0x1d8] sm:$0xff] (!%p6201_p9)  }
 0x589   : > { %v6643_v45 = vld [vmem:[#allocation10 + $0x118] sm:$0xff] (!%p6201_p9)  }
 0x58a   : > { %6346 = vmatpush3.bf16.msra.mxu1 (!%p6201_p9), %v6620_v48  ;;  %v6645_v48 = vld [vmem:[#allocation10 + $0x160] sm:$0xff] (!%p6201_p9)  }
 0x58b   : > { %6324 = vmatpush3.bf16.msra.mxu0 (!%p6201_p9), %v6619_v47  ;;  %6347 = vmatprep.subr.bf16.mxu1 (!%p6201_p9), %v6622_v51  ;;  %v6646_v51 = vld [vmem:[#allocation10 + $0x1e0] sm:$0xff] (!%p6201_p9)  }
 0x58c   : > { %6325 = vmatprep.subr.bf16.mxu0 (!%p6201_p9), %v6621_v49  ;;  %v6644_v49 = vld [vmem:[#allocation10 + $0x198] sm:$0xff] (!%p6201_p9)  }
 0x58e   : > { %6348 = vmatpush3.bf16.msra.mxu1 (!%p6201_p9), %v6624_v12 }
 0x58f   : > { %6326 = vmatpush3.bf16.msra.mxu0 (!%p6201_p9), %v6623_v52  ;;  %6349 = vmatprep.subr.bf16.mxu1 (!%p6201_p9), %v6626_v58  ;;  %v6650_v58 = vld [vmem:[#allocation10 + $0x1e8] sm:$0xff] (!%p6201_p9)  }
 0x590   : > { %6327 = vmatprep.subr.bf16.mxu0 (!%p6201_p9), %v6625_v56  ;;  %v6648_v56 = vld [vmem:[#allocation10 + $0x1a0] sm:$0xff] (!%p6201_p9)  }
 0x592   : > { %6350 = vmatpush3.bf16.msra.mxu1 (!%p6201_p9), %v6628_v62 }
 0x593   : > { %6328 = vmatpush3.bf16.msra.mxu0 (!%p6201_p9), %v6627_v61  ;;  %6379 = vmatprep.subr.bf16.mxu1 (!%p6201_p9), %v6630_v28 }
 0x594   : > { %6357 = vmatprep.subr.bf16.mxu0 (!%p6201_p9), %v6629_v46  ;;  %v6655_v46 = vld [vmem:[#allocation10 + $0x130] sm:$0xff] (!%p6201_p9)  }
 0x648   : > { %v4500_v8 = vpop.f32.mrb[4].mxu0  ;;  %v4664_v9 = vpop.f32.mrb[4].mxu1 }
 0x649   : > { %v4502_v11 = vpop.f32.mrb[5].mxu0  ;;  %v4666_v38 = vpop.f32.mrb[5].mxu1 }
 0x64a   : > { %v4696_v14 = vcombine.low %v4500_v8, %v4502_v11  ;;  %v4504_v53 = vpop.f32.mrb[6].mxu0  ;;  %v4697_v15 = vcombine.low %v4664_v9, %v4666_v38  ;;  %v4668_v16 = vpop.f32.mrb[6].mxu1  ;;  %v4723_v8 = vld [vmem:[#allocation3] sm:$0xff] (!%p6201_p9)  ;;  %v4775_v9 = vcombine.low (!%p6201_p9), %v4767_v6, %v4774_v7  ;;  %v4745_v38 = vsub.s32 (!%p6201_p9), 4, %v7286_v31  ;;  %v6656_v6 = vld [vmem:[#allocation10 + $0x1b0] sm:$0xff] (!%p6201_p9)  }
 0x64b   : > { %v4505_v17 = vpop.f32.mrb[7].mxu0  ;;  %v4669_v20 = vpop.f32.mrb[7].mxu1  ;;  %v4749_v53 = vsub.s32 (!%p6201_p9), 5, %v7286_v31 }
 0x64c   : > { %v4704_v19 = vrot.slane %v4696_v14, %v7294_v40  ;;  %v4711_v50 = vrot.slane %v4697_v15, %v7294_v40  ;;  %4722 = sbr.rel (%p6201_p9) target bundleno = 1875 (0x753), region = 76  ;;  %v4795_v11 = vadd.f32 (!%p6201_p9), %v4775_v9, %v4723_v8  ;;  %v4753_v17 = vsub.s32 (!%p6201_p9), 6, %v7286_v31  ;;  %v6658_v8 = vld [vmem:[#allocation10 + $0x1f8] sm:$0xff] (!%p6201_p9)  }
 0x64d   : > { %v6659_v9 = vld [vmem:[#allocation10 + $0x138] sm:$0xff] (!%p6201_p9)  }
 0x64e   : > { %v4712_v42 = vcombine.low %v4704_v19, %v4711_v50  ;;  %v4797_v14 = vmax.f32 (!%p6201_p9), %v4795_v11, 0.0  ;;  %v4757_v19 = vsub.s32 (!%p6201_p9), 7, %v7286_v31  ;;  %v4754_v25 = vrot.slane (!%p6201_p9), %v4725_v18, %v4753_v17  ;;  %v6635_v31 = vld [vmem:[#allocation10 + $0x108] sm:$0xff] (!%p6201_p9)  }
 0x650   : > { %v4716_v63 = vadd.f32 %v4712_v42, %v942_v22  ;;  %v4808_v15 = vrot.slane (!%p6201_p9), %v4797_v14, %v7294_v40  ;;  %v4801_v16 = vcombine.high (!%p6201_p9), %v4797_v14, %v4797_v14  ;;  %v4746_v42 = vrot.slane (!%p6201_p9), %v4725_v18, %v4745_v38 }
 0x651   : > { %v4758_v26 = vrot.slane (!%p6201_p9), %v4725_v18, %v4757_v19 }
 0x652   : > { %4718 = vst [vmem:[#allocation3 + $0x8] sm:$0xff] %v4716_v63  ;;  %v4816_v20 = vcombine.high (!%p6201_p9), %v4808_v15, %v4808_v15  ;;  %v4815_v50 = vrot.slane (!%p6201_p9), %v4801_v16, %v7294_v40  ;;  %v4843_v22 = vpack.c.bf16 (!%p6201_p9), %v4808_v15, %v4808_v15  ;;  %v4750_v63 = vrot.slane (!%p6201_p9), %v4725_v18, %v4749_v53  ;;  %v6653_v18 = vld [vmem:[#allocation10 + $0x170] sm:$0xff] (!%p6201_p9)  }
 0x653   : > { %v4777_v35 = vcombine.low %v4754_v25, %v4758_v26 }
 0x654   : > { %v4844_v13 = vpack.c.bf16 %v4816_v20, %v4816_v20  ;;  %v4817_v23 = vcombine.high %v4815_v50, %v4815_v50  ;;  %v4845_v27 = vpack.c.bf16 %v4815_v50, %v4815_v50  ;;  %v4776_v34 = vcombine.low %v4746_v42, %v4750_v63 }
 0x655   : > { %v4791_v10 = vrot.slane %v4777_v35, %v7294_v40 }
 0x656   : > { %5395 = vmatprep.mubr.bf16.mxu0 %v4844_v13  ;;  %v4846_v30 = vpack.c.bf16 %v4817_v23, %v4817_v23  ;;  %v4784_v41 = vrot.slane %v4776_v34, %v7294_v40 }
 0x657   : > { %5396 = vmatmul.mubr.bf16.vlgmr.msra.gmra.mrb[0].mxu0 %v4843_v22 }
 0x658   : > { %5435 = vmatprep.mubr.bf16.mxu1 %v4846_v30  ;;  %6358 = vmatpush3.bf16.msra.mxu0 %v6631_v24  ;;  %v4792_v47 = vcombine.low %v4784_v41, %v4791_v10 }
 0x659   : > { %5436 = vmatmul.mubr.bf16.vlgmr.msra.gmra.mrb[0].mxu1 %v4845_v27  ;;  %6359 = vmatprep.subr.bf16.mxu0 %v6633_v29  ;;  %v4724_v52 = vld [vmem:[#allocation3 + $0x8] sm:$0xff] }
 0x65a   : > { %6380 = vmatpush3.bf16.msra.mxu1 %v6632_v32  ;;  %v4796_v12 = vadd.f32 %v4792_v47, %v4724_v52 }
 0x65b   : > { %6381 = vmatprep.subr.bf16.mxu1 %v6634_v33 }
 0x65c   : > { %6360 = vmatpush3.bf16.msra.mxu0 %v6635_v31  ;;  %v4798_v57 = vmax.f32 %v4796_v12, 0.0 }
 0x65d   : > { %6361 = vmatprep.subr.bf16.mxu0 %v6637_v36 }
 0x65e   : > { %6382 = vmatpush3.bf16.msra.mxu1 %v6636_v37  ;;  %v4825_v61 = vrot.slane %v4798_v57, %v7294_v40  ;;  %v4818_v62 = vcombine.high %v4798_v57, %v4798_v57 }
 0x65f   : > { %6383 = vmatprep.subr.bf16.mxu1 %v6638_v3 }
 0x660   : > { %6362 = vmatpush3.bf16.msra.mxu0 %v6639_v39  ;;  %v4833_v0 = vcombine.high %v4825_v61, %v4825_v61  ;;  %v4832_v1 = vrot.slane %v4818_v62, %v7294_v40  ;;  %v6660_v40 = vld [vmem:[#allocation10 + $0x1b8] sm:$0xff]   ;;  %v4847_v11 = vpack.c.bf16 %v4825_v61, %v4825_v61 }
 0x661   : > { %6363 = vmatprep.subr.bf16.mxu0 %v6641_v43 }
 0x662   : > { %6384 = vmatpush3.bf16.msra.mxu1 %v6640_v60  ;;  %v4848_v28 = vpack.c.bf16 %v4833_v0, %v4833_v0  ;;  %v4834_v4 = vcombine.high %v4832_v1, %v4832_v1  ;;  %v4849_v14 = vpack.c.bf16 %v4832_v1, %v4832_v1 }
 0x663   : > { %6385 = vmatprep.subr.bf16.mxu1 %v6642_v44 }
 0x664   : > { %6364 = vmatpush3.bf16.msra.mxu0 %v6643_v45  ;;  %5475 = vmatprep.mubr.bf16.mxu0 %v4848_v28  ;;  %v4850_v7 = vpack.c.bf16 %v4834_v4, %v4834_v4 }
 0x665   : > { %6365 = vmatprep.subr.bf16.mxu0 %v6645_v48 }
 0x666   : > { %6386 = vmatpush3.bf16.msra.mxu1 %v6644_v49  ;;  %5515 = vmatprep.mubr.bf16.mxu1 %v4850_v7 }
 0x667   : > { %6387 = vmatprep.subr.bf16.mxu1 %v6646_v51 }
 0x668   : > { %6366 = vmatpush3.bf16.msra.mxu0 %v6647_v54 }
 0x669   : > { %6367 = vmatprep.subr.bf16.mxu0 %v6649_v55 }
 0x66a   : > { %6388 = vmatpush3.bf16.msra.mxu1 %v6648_v56 }
 0x66b   : > { %6389 = vmatprep.subr.bf16.mxu1 %v6650_v58 }
 0x66c   : > { %6368 = vmatpush3.bf16.msra.mxu0 %v6651_v59 }
 0x66d   : > { %6369 = vmatprep.subr.bf16.mxu0 %v6653_v18 }
 0x66e   : > { %6390 = vmatpush3.bf16.msra.mxu1 %v6652_v21 }
 0x66f   : > { %6391 = vmatprep.subr.bf16.mxu1 %v6654_v2 }
 0x670   : > { %6370 = vmatpush3.bf16.msra.mxu0 %v6655_v46 }
 0x671   : > { %6371 = vmatprep.subr.bf16.mxu0 %v6657_v5 }
 0x672   : > { %6392 = vmatpush3.bf16.msra.mxu1 %v6656_v6 }
 0x673   : > { %6393 = vmatprep.subr.bf16.mxu1 %v6658_v8 }
 0x674   : > { %6372 = vmatpush3.bf16.msra.mxu0 %v6659_v9 }
 0x676   : > { %6394 = vmatpush3.bf16.msra.mxu1 %v6660_v40 }
 0x677   : > { %5476 = vmatmul.mubr.bf16.vlgmr.msra.gmra.mrb[4].mxu0 %v4847_v11 }
 0x679   : > { %5516 = vmatmul.mubr.bf16.vlgmr.msra.gmra.mrb[4].mxu1 %v4849_v14 }
 0x72a   : > { %v6329_v38 = vpop.f32.mrb[0].mxu0 }
 0x72b   : > { %v6330_v53 = vpop.f32.mrb[1].mxu0 }
 0x72c   : > { %v6351_v15 = vpop.f32.mrb[0].mxu1  ;;  %v6331_v16 = vadd.f32 %v6330_v53, %v6329_v38  ;;  %v6332_v17 = vpop.f32.mrb[2].mxu0 }
 0x72d   : > { %v6352_v19 = vpop.f32.mrb[1].mxu1  ;;  %v6333_v20 = vpop.f32.mrb[3].mxu0 }
 0x72e   : > { %v6353_v50 = vadd.f32 %v6352_v19, %v6351_v15  ;;  %v6354_v22 = vpop.f32.mrb[2].mxu1 }
 0x72f   : > { %v6355_v42 = vpop.f32.mrb[3].mxu1 }
 0x730   : > { %v5438_v63 = vadd.f32 %v6353_v50, %v6331_v16 }
 0x74a   : > { %v6373_v13 = vpop.f32.mrb[4].mxu0 }
 0x74b   : > { %v6374_v23 = vpop.f32.mrb[5].mxu0 }
 0x74c   : > { %v6395_v24 = vpop.f32.mrb[4].mxu1  ;;  %v6375_v25 = vadd.f32 %v6374_v23, %v6373_v13  ;;  %v6376_v26 = vpop.f32.mrb[6].mxu0 }
 0x74d   : > { %v6396_v27 = vpop.f32.mrb[5].mxu1  ;;  %v6377_v29 = vpop.f32.mrb[7].mxu0 }
 0x74e   : > { %v5478_v30 = vadd.f32 %v6375_v25, %v5438_v63  ;;  %v6397_v32 = vadd.f32 %v6396_v27, %v6395_v24  ;;  %v6398_v33 = vpop.f32.mrb[6].mxu1 }
 0x74f   : > { %v6399_v31 = vpop.f32.mrb[7].mxu1 }
 0x750   : > { %v5518_v34 = vadd.f32 %v6397_v32, %v5478_v30 }
 0x752   : > { %5523 = vst [vmem:[%s7921_s7] sm:$0x3] %v5518_v34 }
 0x753 PF: > { %s20_s29 = sadd.s32 1, %s6869_s29   ;;  %s7935_s24 = smov %s6853_s25 }
 0x754   : > { %p17_p8 = scmp.ge.s32.totalorder %s20_s29, 4   ;;  %s7936_s25 = smov %s6857_s26 }
 0x755   : > { %s7937_s26 = smov %s7087_s14  ;;  %s7938_s27 = smov %s6865_s28 }
 0x756   : > { %s7939_s28 = smov %s7941_s21  ;;  %19 = sbr.rel (!%p17_p8) target bundleno = 5 (0x5), region = 115 }
 0x75d   :  { %5543 = vsyncpa [#allocation5], 1 }
 0x75e   :  { %5545 = vsyncpa [#allocation5 + $0x1], 1 }
 0x75f   :  { %5546 = vsyncpa [#allocation7], 1 }
 0x760   :  { %5547 = vsyncpa [#allocation11], 1 }

</bundles_post_ra>
